<compile_context>
chip_gen: v7x
topology: tpu7x:2x2x1
jax: 0.10.0
libtpu: 0.0.40
codegen_flags: <defaults>
</compile_context>

<pallas_src>
import functools

import numpy as np
import jax
import jax.numpy as jnp
from jax.experimental import pallas as pl
from jax.experimental.pallas import tpu as pltpu

EPS = 1e-6

# Flip to jnp.bfloat16 on v6e/v7x for MXU peak (accumulation stays f32 via
# preferred_element_type).  Kept f32 by default: the gating products reach
# O(10-30), so bf16 operand rounding can approach the 2e-2 max-abs check, and
# at K<=144 / N=256 these dots are nowhere near the bottleneck of this kernel.
MXU_DTYPE = jnp.float32


def mlka_kernel(x_ref, w32_ref, w16_ref, wconv_ref, vec_ref, pos_ref, o_ref,
                *, H, W):
    C, HW = x_ref.shape[1], x_ref.shape[2]
    Ch = C // 2

    x = x_ref[0]                                      # (C, HW) f32, lane-dense

    # ---- packed scale/bias vectors: each a (C,1)/(Ch,1) lane-broadcast column
    vec = vec_ref[...]
    ln_w, ln_b = vec[:, 0:1], vec[:, 1:2]
    b_pf, b_pl = vec[:, 2:3], vec[:, 3:4]
    b_l0s, b_l0p = vec[:Ch, 4:5], vec[:Ch, 5:6]
    b_l1d, b_l1p = vec[:Ch, 6:7], vec[:Ch, 7:8]

    # ---- LayerNorm (channels_first): per-pixel stats over the channel axis
    u = jnp.mean(x, axis=0, keepdims=True)            # (1, HW)
    xc = x - u
    var = jnp.mean(xc * xc, axis=0, keepdims=True)
    xn = xc * jax.lax.rsqrt(var + EPS)
    xn = xn * ln_w + ln_b                             # (C, HW)

    # ---- proj_first: one fused (32,32) @ (32,HW) dot, then split halves
    w_pf = w32_ref[0:C, :]
    y = jnp.dot(w_pf.astype(MXU_DTYPE), xn.astype(MXU_DTYPE),
                preferred_element_type=jnp.float32) + b_pf
    y1, y2 = y[:Ch, :], y[Ch:, :]                     # (Ch, HW) each

    # ---- spatial shifts: lane roll + zero-pad edge masks (precomputed indices,
    #      so no vector integer div/mod inside the kernel)
    row, col = pos_ref[0:1, :], pos_ref[1:2, :]       # (1, HW) int32
    row_ok = {d: (row >= -d) & (row < H - d) for d in range(-2, 3)}
    col_ok = {d: (col >= -d) & (col < W - d) for d in range(-2, 3)}

    def shifted(v, dyo, dxo):
        s = dyo * W + dxo
        r = pltpu.roll(v, (-s) % HW, axis=1) if s != 0 else v
        if dyo == 0 and dxo == 0:
            return r
        return jnp.where(row_ok[dyo] & col_ok[dxo], r, 0.0)

    # ---- LKA[0]: 3x3 grouped conv (groups=4) as ONE K=144 dot, then 1x1 conv
    taps3 = [shifted(y1, dy - 1, dx - 1) for dy in range(3) for dx in range(3)]
    stacked = jnp.concatenate(taps3, axis=0)          # (9*Ch, HW)
    w_l0s = wconv_ref[0:Ch, :]                        # (Ch, 9*Ch)
    acc0 = jnp.dot(w_l0s.astype(MXU_DTYPE), stacked.astype(MXU_DTYPE),
                   preferred_element_type=jnp.float32) + b_l0s
    w_l0p = w16_ref[0:Ch, :]
    lka0 = jnp.dot(w_l0p.astype(MXU_DTYPE), acc0.astype(MXU_DTYPE),
                   preferred_element_type=jnp.float32) + b_l0p

    # ---- LKA[1]: 5x5 depthwise conv as masked lane-roll MACs (2 accumulators),
    #      then 1x1 conv
    dw = wconv_ref[Ch:C, 0:25]                        # (Ch, 25)
    acc_a = jnp.zeros((Ch, HW), jnp.float32)
    acc_b = jnp.zeros((Ch, HW), jnp.float32)
    for t in range(25):
        dy, dx = divmod(t, 5)
        term = shifted(y2, dy - 2, dx - 2) * dw[:, t:t + 1]
        if t % 2 == 0:
            acc_a = acc_a + term
        else:
            acc_b = acc_b + term
    acc1 = acc_a + acc_b + b_l1d
    w_l1p = w16_ref[Ch:C, :]
    lka1 = jnp.dot(w_l1p.astype(MXU_DTYPE), acc1.astype(MXU_DTYPE),
                   preferred_element_type=jnp.float32) + b_l1p

    # ---- gating + fused proj_last (one 32x32 dot) + residual
    z = jnp.concatenate([lka0 * y1 * y1, lka1 * y2 * y2], axis=0)   # (C, HW)
    w_pl = w32_ref[C:2 * C, :]
    out = jnp.dot(w_pl.astype(MXU_DTYPE), z.astype(MXU_DTYPE),
                  preferred_element_type=jnp.float32) + b_pl
    o_ref[0] = out + x


# --------------------------------------------------------------------------
# parameter init (deterministic, synthetic) and packing glue
# --------------------------------------------------------------------------
def init_params(key, dim_feats=32):
    ks = jax.random.split(key, 14)

    def w(k, shape, fan_in):
        return jax.random.normal(k, shape, jnp.float32) / jnp.sqrt(fan_in)

    p = {}
    p["ln_w"] = 1.0 + 0.1 * jax.random.normal(ks[0], (dim_feats,), jnp.float32)
    p["ln_b"] = 0.1 * jax.random.normal(ks[1], (dim_feats,), jnp.float32)
    p["pf_w"] = w(ks[2], (dim_feats, dim_feats, 1, 1), dim_feats)
    p["pf_b"] = 0.01 * jax.random.normal(ks[3], (dim_feats,), jnp.float32)
    p["l0s_w"] = w(ks[4], (16, 4, 3, 3), 4 * 9)      # Conv2d(16,16,3,groups=4)
    p["l0s_b"] = 0.01 * jax.random.normal(ks[5], (16,), jnp.float32)
    p["l0p_w"] = w(ks[6], (16, 16, 1, 1), 16)        # Conv2d(16,16,1)
    p["l0p_b"] = 0.01 * jax.random.normal(ks[7], (16,), jnp.float32)
    p["l1d_w"] = w(ks[8], (16, 1, 5, 5), 25)         # Conv2d(16,16,5,groups=16)
    p["l1d_b"] = 0.01 * jax.random.normal(ks[9], (16,), jnp.float32)
    p["l1p_w"] = w(ks[10], (16, 16, 1, 1), 16)       # Conv2d(16,16,1)
    p["l1p_b"] = 0.01 * jax.random.normal(ks[11], (16,), jnp.float32)
    p["pl_w"] = w(ks[12], (dim_feats, dim_feats, 1, 1), dim_feats)
    p["pl_b"] = 0.01 * jax.random.normal(ks[13], (dim_feats,), jnp.float32)
    return p


def pack_kernel_params(p):
    C = p["pf_w"].shape[0]
    Ch = C // 2

    # 1x1 weights stacked along sublanes: rows [0:C)=proj_first, [C:2C)=proj_last
    w32 = np.concatenate([np.asarray(p["pf_w"])[:, :, 0, 0],
                          np.asarray(p["pl_w"])[:, :, 0, 0]], axis=0)
    # rows [0:Ch)=LKA0 pointwise, [Ch:2Ch)=LKA1 pointwise
    w16 = np.concatenate([np.asarray(p["l0p_w"])[:, :, 0, 0],
                          np.asarray(p["l1p_w"])[:, :, 0, 0]], axis=0)

    # grouped 3x3 (groups=4) -> dense (out, tap*in) = (Ch, 9*Ch); column
    # t*Ch + ic multiplies shifted tap t of input channel ic.
    w3 = np.asarray(p["l0s_w"])                       # (16, 4, 3, 3)
    l0s = np.zeros((Ch, 9, Ch), np.float32)
    for o in range(Ch):
        g = o // 4
        for t in range(9):
            dy, dx = divmod(t, 3)
            l0s[o, t, 4 * g:4 * g + 4] = w3[o, :, dy, dx]
    l0s = l0s.reshape(Ch, 9 * Ch)

    # depthwise 5x5 -> (channel, tap) = (Ch, 25), lane-padded to share the slab
    dw = np.asarray(p["l1d_w"])[:, 0].reshape(Ch, 25)
    dw_pad = np.zeros((Ch, 9 * Ch), np.float32)
    dw_pad[:, :25] = dw
    wconv = np.concatenate([l0s, dw_pad], axis=0)     # (2*Ch, 9*Ch)

    def col32(v):
        return np.asarray(v).reshape(C, 1).astype(np.float32)

    def col16(v):
        c = np.zeros((C, 1), np.float32)
        c[:Ch, 0] = np.asarray(v)
        return c

    # (C, 8): cols = ln_w, ln_b, pf_b, pl_b, l0s_b, l0p_b, l1d_b, l1p_b
    vec = np.concatenate(
        [col32(p["ln_w"]), col32(p["ln_b"]), col32(p["pf_b"]), col32(p["pl_b"]),
         col16(p["l0s_b"]), col16(p["l0p_b"]), col16(p["l1d_b"]),
         col16(p["l1p_b"])], axis=1)

    return (jnp.asarray(w32), jnp.asarray(w16),
            jnp.asarray(wconv), jnp.asarray(vec))


def mlka_forward(x_nchw, params):
    B, C, H, W = x_nchw.shape
    HW = H * W
    x = x_nchw.reshape(B, C, HW).astype(jnp.float32)  # trailing-dim reshape only
    w32, w16, wconv, vec = pack_kernel_params(params)

    # flat pixel index -> (row, col), precomputed so the kernel avoids vector
    # integer div/mod
    pix = np.arange(HW, dtype=np.int32)
    pos = jnp.asarray(np.stack([pix // W, pix % W], axis=0))    # (2, HW)

    kernel = functools.partial(mlka_kernel, H=H, W=W)
    const = lambda b: (0, 0)

    out = pl.pallas_call(
        kernel,
        out_shape=jax.ShapeDtypeStruct((B, C, HW), jnp.float32),
        grid=(B,),
        in_specs=[
            pl.BlockSpec((1, C, HW), lambda b: (b, 0, 0)),
            pl.BlockSpec(w32.shape, const),
            pl.BlockSpec(w16.shape, const),
            pl.BlockSpec(wconv.shape, const),
            pl.BlockSpec(vec.shape, const),
            pl.BlockSpec(pos.shape, const),
        ],
        out_specs=pl.BlockSpec((1, C, HW), lambda b: (b, 0, 0)),
        compiler_params=pltpu.CompilerParams(
            dimension_semantics=("parallel",)),
    )(x, w32, w16, wconv, vec, pos)
    # TODO(synk): for large H*W, add halo-aware row tiling (2/4-row halos) so the
    # per-step working set stays within v7x's 64 MiB VMEM and both v7x
    # TensorCores get >1 grid step; unnecessary at this test size.
    return out.reshape(B, C, H, W)


# --------------------------------------------------------------------------
# pure-JAX reference (mirrors the PyTorch forward exactly, NCHW)
# --------------------------------------------------------------------------
def reference_forward(x, p):
    u = jnp.mean(x, axis=1, keepdims=True)
    s = jnp.mean((x - u) ** 2, axis=1, keepdims=True)
    xn = (x - u) / jnp.sqrt(s + EPS)
    xn = p["ln_w"][None, :, None, None] * xn + p["ln_b"][None, :, None, None]

    def conv(z, w, b, groups=1, pad=0):
        y = jax.lax.conv_general_dilated(
            z, w, (1, 1), [(pad, pad), (pad, pad)],
            feature_group_count=groups,
            dimension_numbers=("NCHW", "OIHW", "NCHW"))
        return y + b[None, :, None, None]

    y = conv(xn, p["pf_w"], p["pf_b"])
    x1, x2 = y[:, :16], y[:, 16:]
    l0 = conv(conv(x1, p["l0s_w"], p["l0s_b"], groups=4, pad=1),
              p["l0p_w"], p["l0p_b"])
    l1 = conv(conv(x2, p["l1d_w"], p["l1d_b"], groups=16, pad=2),
              p["l1p_w"], p["l1p_b"])
    xcat = jnp.concatenate([l0 * x1, l1 * x2], axis=1)
    return conv(xcat * y, p["pl_w"], p["pl_b"]) + x


if __name__ == "__main__":
    key = jax.random.PRNGKey(0)
    kx, kp = jax.random.split(key)
    B, C, H, W = 2, 32, 16, 16   # dim_feats must be 32 (16 + 16 channel split)
    x = jax.random.normal(kx, (B, C, H, W), jnp.float32)
    params = init_params(kp, C)

    out = mlka_forward(x, params)
    out = jax.block_until_ready(out)

    ref = reference_forward(x, params)
    err = float(jnp.max(jnp.abs(out - ref)))
    assert out.shape == (B, C, H, W)
    assert err < 2e-2, f"max abs error vs reference: {err}"
    print("KERNEL_OK")
</pallas_src>

<mosaic_0001>
module attributes {stable_mosaic.version = 11 : i64} {
  func.func @mlka_kernel(%arg0: i32, %arg1: memref<1x32x256xf32, #tpu.memory_space<vmem>>, %arg2: memref<64x32xf32, #tpu.memory_space<vmem>>, %arg3: memref<32x16xf32, #tpu.memory_space<vmem>>, %arg4: memref<32x144xf32, #tpu.memory_space<vmem>>, %arg5: memref<32x8xf32, #tpu.memory_space<vmem>>, %arg6: memref<2x256xi32, #tpu.memory_space<vmem>>, %arg7: memref<1x32x256xf32, #tpu.memory_space<vmem>>) attributes {dimension_semantics = [#tpu.dimension_semantics<parallel>], iteration_bounds = array<i64: 2>, scalar_prefetch = 0 : i64, scratch_operands = 0 : i64, tpu.core_type = #tpu.core_type<tc>, window_params = [{transform_indices = @transform_0, window_bounds = array<i64: 1, 32, 256>}, {pipeline_mode = #tpu.pipeline_mode<synchronous>, transform_indices = @transform_1, window_bounds = array<i64: 64, 32>}, {pipeline_mode = #tpu.pipeline_mode<synchronous>, transform_indices = @transform_2, window_bounds = array<i64: 32, 16>}, {pipeline_mode = #tpu.pipeline_mode<synchronous>, transform_indices = @transform_3, window_bounds = array<i64: 32, 144>}, {pipeline_mode = #tpu.pipeline_mode<synchronous>, transform_indices = @transform_4, window_bounds = array<i64: 32, 8>}, {pipeline_mode = #tpu.pipeline_mode<synchronous>, transform_indices = @transform_5, window_bounds = array<i64: 2, 256>}, {transform_indices = @transform_6, window_bounds = array<i64: 1, 32, 256>}]} {
    %c0 = arith.constant 0 : index
    %c0_0 = arith.constant 0 : index
    %c0_1 = arith.constant 0 : index
    %0 = vector.load %arg1[%c0, %c0_0, %c0_1] : memref<1x32x256xf32, #tpu.memory_space<vmem>>, vector<1x32x256xf32>
    %1 = vector.shape_cast %0 : vector<1x32x256xf32> to vector<32x256xf32>
    %c0_2 = arith.constant 0 : index
    %c0_3 = arith.constant 0 : index
    %2 = vector.load %arg5[%c0_2, %c0_3] : memref<32x8xf32, #tpu.memory_space<vmem>>, vector<32x8xf32>
    %3 = vector.extract_strided_slice %2 {offsets = [0, 0], sizes = [32, 1], strides = [1, 1]} : vector<32x8xf32> to vector<32x1xf32>
    %4 = vector.extract_strided_slice %2 {offsets = [0, 1], sizes = [32, 1], strides = [1, 1]} : vector<32x8xf32> to vector<32x1xf32>
    %5 = vector.extract_strided_slice %2 {offsets = [0, 2], sizes = [32, 1], strides = [1, 1]} : vector<32x8xf32> to vector<32x1xf32>
    %6 = vector.extract_strided_slice %2 {offsets = [0, 3], sizes = [32, 1], strides = [1, 1]} : vector<32x8xf32> to vector<32x1xf32>
    %7 = vector.extract_strided_slice %2 {offsets = [0, 4], sizes = [16, 1], strides = [1, 1]} : vector<32x8xf32> to vector<16x1xf32>
    %8 = vector.extract_strided_slice %2 {offsets = [0, 5], sizes = [16, 1], strides = [1, 1]} : vector<32x8xf32> to vector<16x1xf32>
    %9 = vector.extract_strided_slice %2 {offsets = [0, 6], sizes = [16, 1], strides = [1, 1]} : vector<32x8xf32> to vector<16x1xf32>
    %10 = vector.extract_strided_slice %2 {offsets = [0, 7], sizes = [16, 1], strides = [1, 1]} : vector<32x8xf32> to vector<16x1xf32>
    %cst = arith.constant dense<0.000000e+00> : vector<256xf32>
    %11 = vector.multi_reduction <add>, %1, %cst [0] : vector<32x256xf32> to vector<256xf32>
    %12 = vector.shape_cast %11 : vector<256xf32> to vector<1x256xf32>
    %cst_4 = arith.constant 3.200000e+01 : f32
    %13 = vector.broadcast %cst_4 : f32 to vector<1x256xf32>
    %14 = arith.divf %12, %13 : vector<1x256xf32>
    %15 = vector.broadcast %14 : vector<1x256xf32> to vector<32x256xf32>
    %16 = arith.subf %1, %15 : vector<32x256xf32>
    %17 = arith.mulf %16, %16 : vector<32x256xf32>
    %cst_5 = arith.constant dense<0.000000e+00> : vector<256xf32>
    %18 = vector.multi_reduction <add>, %17, %cst_5 [0] : vector<32x256xf32> to vector<256xf32>
    %19 = vector.shape_cast %18 : vector<256xf32> to vector<1x256xf32>
    %cst_6 = arith.constant 3.200000e+01 : f32
    %20 = vector.broadcast %cst_6 : f32 to vector<1x256xf32>
    %21 = arith.divf %19, %20 : vector<1x256xf32>
    %cst_7 = arith.constant 9.99999997E-7 : f32
    %22 = vector.broadcast %cst_7 : f32 to vector<1x256xf32>
    %23 = arith.addf %21, %22 : vector<1x256xf32>
    %24 = math.rsqrt %23 : vector<1x256xf32>
    %25 = vector.broadcast %24 : vector<1x256xf32> to vector<32x256xf32>
    %26 = arith.mulf %16, %25 : vector<32x256xf32>
    %27 = vector.broadcast %3 : vector<32x1xf32> to vector<32x256xf32>
    %28 = arith.mulf %26, %27 : vector<32x256xf32>
    %29 = vector.broadcast %4 : vector<32x1xf32> to vector<32x256xf32>
    %30 = arith.addf %28, %29 : vector<32x256xf32>
    %c0_8 = arith.constant 0 : index
    %c0_9 = arith.constant 0 : index
    %31 = vector.load %arg2[%c0_8, %c0_9] : memref<64x32xf32, #tpu.memory_space<vmem>>, vector<32x32xf32>
    %cst_10 = arith.constant dense<0.000000e+00> : vector<32x256xf32>
    %32 = tpu.matmul %31, %30, %cst_10 {dimension_numbers = #tpu.dot_dimension_numbers<[1], [0], [0], [1], [0, 0, 1, 1], [], []>} : vector<32x32xf32>, vector<32x256xf32>, vector<32x256xf32> -> vector<32x256xf32>
    %33 = vector.broadcast %5 : vector<32x1xf32> to vector<32x256xf32>
    %34 = arith.addf %32, %33 : vector<32x256xf32>
    %35 = vector.extract_strided_slice %34 {offsets = [0, 0], sizes = [16, 256], strides = [1, 1]} : vector<32x256xf32> to vector<16x256xf32>
    %36 = vector.extract_strided_slice %34 {offsets = [16, 0], sizes = [16, 256], strides = [1, 1]} : vector<32x256xf32> to vector<16x256xf32>
    %c0_11 = arith.constant 0 : index
    %c0_12 = arith.constant 0 : index
    %37 = vector.load %arg6[%c0_11, %c0_12] : memref<2x256xi32, #tpu.memory_space<vmem>>, vector<1x256xi32>
    %c1 = arith.constant 1 : index
    %c0_13 = arith.constant 0 : index
    %38 = vector.load %arg6[%c1, %c0_13] : memref<2x256xi32, #tpu.memory_space<vmem>>, vector<1x256xi32>
    %c2_i32 = arith.constant 2 : i32
    %39 = vector.broadcast %c2_i32 : i32 to vector<1x256xi32>
    %40 = arith.cmpi sge, %37, %39 : vector<1x256xi32>
    %c18_i32 = arith.constant 18 : i32
    %41 = vector.broadcast %c18_i32 : i32 to vector<1x256xi32>
    %42 = arith.cmpi slt, %37, %41 : vector<1x256xi32>
    %43 = arith.andi %40, %42 : vector<1x256xi1>
    %c1_i32 = arith.constant 1 : i32
    %44 = vector.broadcast %c1_i32 : i32 to vector<1x256xi32>
    %45 = arith.cmpi sge, %37, %44 : vector<1x256xi32>
    %c17_i32 = arith.constant 17 : i32
    %46 = vector.broadcast %c17_i32 : i32 to vector<1x256xi32>
    %47 = arith.cmpi slt, %37, %46 : vector<1x256xi32>
    %48 = arith.andi %45, %47 : vector<1x256xi1>
    %c0_i32 = arith.constant 0 : i32
    %49 = vector.broadcast %c0_i32 : i32 to vector<1x256xi32>
    %50 = arith.cmpi sge, %37, %49 : vector<1x256xi32>
    %c16_i32 = arith.constant 16 : i32
    %51 = vector.broadcast %c16_i32 : i32 to vector<1x256xi32>
    %52 = arith.cmpi slt, %37, %51 : vector<1x256xi32>
    %53 = arith.andi %50, %52 : vector<1x256xi1>
    %c-1_i32 = arith.constant -1 : i32
    %54 = vector.broadcast %c-1_i32 : i32 to vector<1x256xi32>
    %55 = arith.cmpi sge, %37, %54 : vector<1x256xi32>
    %c15_i32 = arith.constant 15 : i32
    %56 = vector.broadcast %c15_i32 : i32 to vector<1x256xi32>
    %57 = arith.cmpi slt, %37, %56 : vector<1x256xi32>
    %58 = arith.andi %55, %57 : vector<1x256xi1>
    %c-2_i32 = arith.constant -2 : i32
    %59 = vector.broadcast %c-2_i32 : i32 to vector<1x256xi32>
    %60 = arith.cmpi sge, %37, %59 : vector<1x256xi32>
    %c14_i32 = arith.constant 14 : i32
    %61 = vector.broadcast %c14_i32 : i32 to vector<1x256xi32>
    %62 = arith.cmpi slt, %37, %61 : vector<1x256xi32>
    %63 = arith.andi %60, %62 : vector<1x256xi1>
    %c2_i32_14 = arith.constant 2 : i32
    %64 = vector.broadcast %c2_i32_14 : i32 to vector<1x256xi32>
    %65 = arith.cmpi sge, %38, %64 : vector<1x256xi32>
    %c18_i32_15 = arith.constant 18 : i32
    %66 = vector.broadcast %c18_i32_15 : i32 to vector<1x256xi32>
    %67 = arith.cmpi slt, %38, %66 : vector<1x256xi32>
    %68 = arith.andi %65, %67 : vector<1x256xi1>
    %c1_i32_16 = arith.constant 1 : i32
    %69 = vector.broadcast %c1_i32_16 : i32 to vector<1x256xi32>
    %70 = arith.cmpi sge, %38, %69 : vector<1x256xi32>
    %c17_i32_17 = arith.constant 17 : i32
    %71 = vector.broadcast %c17_i32_17 : i32 to vector<1x256xi32>
    %72 = arith.cmpi slt, %38, %71 : vector<1x256xi32>
    %73 = arith.andi %70, %72 : vector<1x256xi1>
    %c0_i32_18 = arith.constant 0 : i32
    %74 = vector.broadcast %c0_i32_18 : i32 to vector<1x256xi32>
    %75 = arith.cmpi sge, %38, %74 : vector<1x256xi32>
    %c16_i32_19 = arith.constant 16 : i32
    %76 = vector.broadcast %c16_i32_19 : i32 to vector<1x256xi32>
    %77 = arith.cmpi slt, %38, %76 : vector<1x256xi32>
    %78 = arith.andi %75, %77 : vector<1x256xi1>
    %c-1_i32_20 = arith.constant -1 : i32
    %79 = vector.broadcast %c-1_i32_20 : i32 to vector<1x256xi32>
    %80 = arith.cmpi sge, %38, %79 : vector<1x256xi32>
    %c15_i32_21 = arith.constant 15 : i32
    %81 = vector.broadcast %c15_i32_21 : i32 to vector<1x256xi32>
    %82 = arith.cmpi slt, %38, %81 : vector<1x256xi32>
    %83 = arith.andi %80, %82 : vector<1x256xi1>
    %c-2_i32_22 = arith.constant -2 : i32
    %84 = vector.broadcast %c-2_i32_22 : i32 to vector<1x256xi32>
    %85 = arith.cmpi sge, %38, %84 : vector<1x256xi32>
    %c14_i32_23 = arith.constant 14 : i32
    %86 = vector.broadcast %c14_i32_23 : i32 to vector<1x256xi32>
    %87 = arith.cmpi slt, %38, %86 : vector<1x256xi32>
    %88 = arith.andi %85, %87 : vector<1x256xi1>
    %c17_i32_24 = arith.constant 17 : i32
    %89 = tpu.dynamic_rotate %35 by %c17_i32_24 dim 1 : vector<16x256xf32>, i32 -> vector<16x256xf32>
    %90 = arith.andi %48, %73 : vector<1x256xi1>
    %cst_25 = arith.constant 0.000000e+00 : f32
    %91 = vector.shape_cast %90 : vector<1x256xi1> to vector<1x256xi1>
    %92 = vector.broadcast %91 : vector<1x256xi1> to vector<16x256xi1>
    %93 = vector.broadcast %cst_25 : f32 to vector<16x256xf32>
    %94 = arith.select %92, %89, %93 : vector<16x256xi1>, vector<16x256xf32>
    %c16_i32_26 = arith.constant 16 : i32
    %95 = tpu.dynamic_rotate %35 by %c16_i32_26 dim 1 : vector<16x256xf32>, i32 -> vector<16x256xf32>
    %96 = arith.andi %48, %78 : vector<1x256xi1>
    %cst_27 = arith.constant 0.000000e+00 : f32
    %97 = vector.shape_cast %96 : vector<1x256xi1> to vector<1x256xi1>
    %98 = vector.broadcast %97 : vector<1x256xi1> to vector<16x256xi1>
    %99 = vector.broadcast %cst_27 : f32 to vector<16x256xf32>
    %100 = arith.select %98, %95, %99 : vector<16x256xi1>, vector<16x256xf32>
    %c15_i32_28 = arith.constant 15 : i32
    %101 = tpu.dynamic_rotate %35 by %c15_i32_28 dim 1 : vector<16x256xf32>, i32 -> vector<16x256xf32>
    %102 = arith.andi %48, %83 : vector<1x256xi1>
    %cst_29 = arith.constant 0.000000e+00 : f32
    %103 = vector.shape_cast %102 : vector<1x256xi1> to vector<1x256xi1>
    %104 = vector.broadcast %103 : vector<1x256xi1> to vector<16x256xi1>
    %105 = vector.broadcast %cst_29 : f32 to vector<16x256xf32>
    %106 = arith.select %104, %101, %105 : vector<16x256xi1>, vector<16x256xf32>
    %c1_i32_30 = arith.constant 1 : i32
    %107 = tpu.dynamic_rotate %35 by %c1_i32_30 dim 1 : vector<16x256xf32>, i32 -> vector<16x256xf32>
    %108 = arith.andi %53, %73 : vector<1x256xi1>
    %cst_31 = arith.constant 0.000000e+00 : f32
    %109 = vector.shape_cast %108 : vector<1x256xi1> to vector<1x256xi1>
    %110 = vector.broadcast %109 : vector<1x256xi1> to vector<16x256xi1>
    %111 = vector.broadcast %cst_31 : f32 to vector<16x256xf32>
    %112 = arith.select %110, %107, %111 : vector<16x256xi1>, vector<16x256xf32>
    %c255_i32 = arith.constant 255 : i32
    %113 = tpu.dynamic_rotate %35 by %c255_i32 dim 1 : vector<16x256xf32>, i32 -> vector<16x256xf32>
    %114 = arith.andi %53, %83 : vector<1x256xi1>
    %cst_32 = arith.constant 0.000000e+00 : f32
    %115 = vector.shape_cast %114 : vector<1x256xi1> to vector<1x256xi1>
    %116 = vector.broadcast %115 : vector<1x256xi1> to vector<16x256xi1>
    %117 = vector.broadcast %cst_32 : f32 to vector<16x256xf32>
    %118 = arith.select %116, %113, %117 : vector<16x256xi1>, vector<16x256xf32>
    %c241_i32 = arith.constant 241 : i32
    %119 = tpu.dynamic_rotate %35 by %c241_i32 dim 1 : vector<16x256xf32>, i32 -> vector<16x256xf32>
    %120 = arith.andi %58, %73 : vector<1x256xi1>
    %cst_33 = arith.constant 0.000000e+00 : f32
    %121 = vector.shape_cast %120 : vector<1x256xi1> to vector<1x256xi1>
    %122 = vector.broadcast %121 : vector<1x256xi1> to vector<16x256xi1>
    %123 = vector.broadcast %cst_33 : f32 to vector<16x256xf32>
    %124 = arith.select %122, %119, %123 : vector<16x256xi1>, vector<16x256xf32>
    %c240_i32 = arith.constant 240 : i32
    %125 = tpu.dynamic_rotate %35 by %c240_i32 dim 1 : vector<16x256xf32>, i32 -> vector<16x256xf32>
    %126 = arith.andi %58, %78 : vector<1x256xi1>
    %cst_34 = arith.constant 0.000000e+00 : f32
    %127 = vector.shape_cast %126 : vector<1x256xi1> to vector<1x256xi1>
    %128 = vector.broadcast %127 : vector<1x256xi1> to vector<16x256xi1>
    %129 = vector.broadcast %cst_34 : f32 to vector<16x256xf32>
    %130 = arith.select %128, %125, %129 : vector<16x256xi1>, vector<16x256xf32>
    %c239_i32 = arith.constant 239 : i32
    %131 = tpu.dynamic_rotate %35 by %c239_i32 dim 1 : vector<16x256xf32>, i32 -> vector<16x256xf32>
    %132 = arith.andi %58, %83 : vector<1x256xi1>
    %cst_35 = arith.constant 0.000000e+00 : f32
    %133 = vector.shape_cast %132 : vector<1x256xi1> to vector<1x256xi1>
    %134 = vector.broadcast %133 : vector<1x256xi1> to vector<16x256xi1>
    %135 = vector.broadcast %cst_35 : f32 to vector<16x256xf32>
    %136 = arith.select %134, %131, %135 : vector<16x256xi1>, vector<16x256xf32>
    %137 = tpu.concatenate %94, %100, %106, %112, %35, %118, %124, %130, %136 in 0 : vector<16x256xf32>, vector<16x256xf32>, vector<16x256xf32>, vector<16x256xf32>, vector<16x256xf32>, vector<16x256xf32>, vector<16x256xf32>, vector<16x256xf32>, vector<16x256xf32> -> vector<144x256xf32>
    %c0_36 = arith.constant 0 : index
    %c0_37 = arith.constant 0 : index
    %138 = vector.load %arg4[%c0_36, %c0_37] : memref<32x144xf32, #tpu.memory_space<vmem>>, vector<16x144xf32>
    %cst_38 = arith.constant dense<0.000000e+00> : vector<16x256xf32>
    %139 = tpu.matmul %138, %137, %cst_38 {dimension_numbers = #tpu.dot_dimension_numbers<[1], [0], [0], [1], [0, 0, 1, 1], [], []>} : vector<16x144xf32>, vector<144x256xf32>, vector<16x256xf32> -> vector<16x256xf32>
    %140 = vector.broadcast %7 : vector<16x1xf32> to vector<16x256xf32>
    %141 = arith.addf %139, %140 : vector<16x256xf32>
    %c0_39 = arith.constant 0 : index
    %c0_40 = arith.constant 0 : index
    %142 = vector.load %arg3[%c0_39, %c0_40] : memref<32x16xf32, #tpu.memory_space<vmem>>, vector<16x16xf32>
    %cst_41 = arith.constant dense<0.000000e+00> : vector<16x256xf32>
    %143 = tpu.matmul %142, %141, %cst_41 {dimension_numbers = #tpu.dot_dimension_numbers<[1], [0], [0], [1], [0, 0, 1, 1], [], []>} : vector<16x16xf32>, vector<16x256xf32>, vector<16x256xf32> -> vector<16x256xf32>
    %144 = vector.broadcast %8 : vector<16x1xf32> to vector<16x256xf32>
    %145 = arith.addf %143, %144 : vector<16x256xf32>
    %c16 = arith.constant 16 : index
    %c0_42 = arith.constant 0 : index
    %146 = vector.load %arg4[%c16, %c0_42] : memref<32x144xf32, #tpu.memory_space<vmem>>, vector<16x25xf32>
    %cst_43 = arith.constant 0.000000e+00 : f32
    %147 = vector.broadcast %cst_43 : f32 to vector<16x256xf32>
    %cst_44 = arith.constant 0.000000e+00 : f32
    %148 = vector.broadcast %cst_44 : f32 to vector<16x256xf32>
    %c34_i32 = arith.constant 34 : i32
    %149 = tpu.dynamic_rotate %36 by %c34_i32 dim 1 : vector<16x256xf32>, i32 -> vector<16x256xf32>
    %150 = arith.andi %43, %68 : vector<1x256xi1>
    %cst_45 = arith.constant 0.000000e+00 : f32
    %151 = vector.shape_cast %150 : vector<1x256xi1> to vector<1x256xi1>
    %152 = vector.broadcast %151 : vector<1x256xi1> to vector<16x256xi1>
    %153 = vector.broadcast %cst_45 : f32 to vector<16x256xf32>
    %154 = arith.select %152, %149, %153 : vector<16x256xi1>, vector<16x256xf32>
    %155 = vector.extract_strided_slice %146 {offsets = [0, 0], sizes = [16, 1], strides = [1, 1]} : vector<16x25xf32> to vector<16x1xf32>
    %156 = vector.broadcast %155 : vector<16x1xf32> to vector<16x256xf32>
    %157 = arith.mulf %154, %156 : vector<16x256xf32>
    %158 = arith.addf %147, %157 : vector<16x256xf32>
    %c33_i32 = arith.constant 33 : i32
    %159 = tpu.dynamic_rotate %36 by %c33_i32 dim 1 : vector<16x256xf32>, i32 -> vector<16x256xf32>
    %160 = arith.andi %43, %73 : vector<1x256xi1>
    %cst_46 = arith.constant 0.000000e+00 : f32
    %161 = vector.shape_cast %160 : vector<1x256xi1> to vector<1x256xi1>
    %162 = vector.broadcast %161 : vector<1x256xi1> to vector<16x256xi1>
    %163 = vector.broadcast %cst_46 : f32 to vector<16x256xf32>
    %164 = arith.select %162, %159, %163 : vector<16x256xi1>, vector<16x256xf32>
    %165 = vector.extract_strided_slice %146 {offsets = [0, 1], sizes = [16, 1], strides = [1, 1]} : vector<16x25xf32> to vector<16x1xf32>
    %166 = vector.broadcast %165 : vector<16x1xf32> to vector<16x256xf32>
    %167 = arith.mulf %164, %166 : vector<16x256xf32>
    %168 = arith.addf %148, %167 : vector<16x256xf32>
    %c32_i32 = arith.constant 32 : i32
    %169 = tpu.dynamic_rotate %36 by %c32_i32 dim 1 : vector<16x256xf32>, i32 -> vector<16x256xf32>
    %170 = arith.andi %43, %78 : vector<1x256xi1>
    %cst_47 = arith.constant 0.000000e+00 : f32
    %171 = vector.shape_cast %170 : vector<1x256xi1> to vector<1x256xi1>
    %172 = vector.broadcast %171 : vector<1x256xi1> to vector<16x256xi1>
    %173 = vector.broadcast %cst_47 : f32 to vector<16x256xf32>
    %174 = arith.select %172, %169, %173 : vector<16x256xi1>, vector<16x256xf32>
    %175 = vector.extract_strided_slice %146 {offsets = [0, 2], sizes = [16, 1], strides = [1, 1]} : vector<16x25xf32> to vector<16x1xf32>
    %176 = vector.broadcast %175 : vector<16x1xf32> to vector<16x256xf32>
    %177 = arith.mulf %174, %176 : vector<16x256xf32>
    %178 = arith.addf %158, %177 : vector<16x256xf32>
    %c31_i32 = arith.constant 31 : i32
    %179 = tpu.dynamic_rotate %36 by %c31_i32 dim 1 : vector<16x256xf32>, i32 -> vector<16x256xf32>
    %180 = arith.andi %43, %83 : vector<1x256xi1>
    %cst_48 = arith.constant 0.000000e+00 : f32
    %181 = vector.shape_cast %180 : vector<1x256xi1> to vector<1x256xi1>
    %182 = vector.broadcast %181 : vector<1x256xi1> to vector<16x256xi1>
    %183 = vector.broadcast %cst_48 : f32 to vector<16x256xf32>
    %184 = arith.select %182, %179, %183 : vector<16x256xi1>, vector<16x256xf32>
    %185 = vector.extract_strided_slice %146 {offsets = [0, 3], sizes = [16, 1], strides = [1, 1]} : vector<16x25xf32> to vector<16x1xf32>
    %186 = vector.broadcast %185 : vector<16x1xf32> to vector<16x256xf32>
    %187 = arith.mulf %184, %186 : vector<16x256xf32>
    %188 = arith.addf %168, %187 : vector<16x256xf32>
    %c30_i32 = arith.constant 30 : i32
    %189 = tpu.dynamic_rotate %36 by %c30_i32 dim 1 : vector<16x256xf32>, i32 -> vector<16x256xf32>
    %190 = arith.andi %43, %88 : vector<1x256xi1>
    %cst_49 = arith.constant 0.000000e+00 : f32
    %191 = vector.shape_cast %190 : vector<1x256xi1> to vector<1x256xi1>
    %192 = vector.broadcast %191 : vector<1x256xi1> to vector<16x256xi1>
    %193 = vector.broadcast %cst_49 : f32 to vector<16x256xf32>
    %194 = arith.select %192, %189, %193 : vector<16x256xi1>, vector<16x256xf32>
    %195 = vector.extract_strided_slice %146 {offsets = [0, 4], sizes = [16, 1], strides = [1, 1]} : vector<16x25xf32> to vector<16x1xf32>
    %196 = vector.broadcast %195 : vector<16x1xf32> to vector<16x256xf32>
    %197 = arith.mulf %194, %196 : vector<16x256xf32>
    %198 = arith.addf %178, %197 : vector<16x256xf32>
    %c18_i32_50 = arith.constant 18 : i32
    %199 = tpu.dynamic_rotate %36 by %c18_i32_50 dim 1 : vector<16x256xf32>, i32 -> vector<16x256xf32>
    %200 = arith.andi %48, %68 : vector<1x256xi1>
    %cst_51 = arith.constant 0.000000e+00 : f32
    %201 = vector.shape_cast %200 : vector<1x256xi1> to vector<1x256xi1>
    %202 = vector.broadcast %201 : vector<1x256xi1> to vector<16x256xi1>
    %203 = vector.broadcast %cst_51 : f32 to vector<16x256xf32>
    %204 = arith.select %202, %199, %203 : vector<16x256xi1>, vector<16x256xf32>
    %205 = vector.extract_strided_slice %146 {offsets = [0, 5], sizes = [16, 1], strides = [1, 1]} : vector<16x25xf32> to vector<16x1xf32>
    %206 = vector.broadcast %205 : vector<16x1xf32> to vector<16x256xf32>
    %207 = arith.mulf %204, %206 : vector<16x256xf32>
    %208 = arith.addf %188, %207 : vector<16x256xf32>
    %c17_i32_52 = arith.constant 17 : i32
    %209 = tpu.dynamic_rotate %36 by %c17_i32_52 dim 1 : vector<16x256xf32>, i32 -> vector<16x256xf32>
    %210 = arith.andi %48, %73 : vector<1x256xi1>
    %cst_53 = arith.constant 0.000000e+00 : f32
    %211 = vector.shape_cast %210 : vector<1x256xi1> to vector<1x256xi1>
    %212 = vector.broadcast %211 : vector<1x256xi1> to vector<16x256xi1>
    %213 = vector.broadcast %cst_53 : f32 to vector<16x256xf32>
    %214 = arith.select %212, %209, %213 : vector<16x256xi1>, vector<16x256xf32>
    %215 = vector.extract_strided_slice %146 {offsets = [0, 6], sizes = [16, 1], strides = [1, 1]} : vector<16x25xf32> to vector<16x1xf32>
    %216 = vector.broadcast %215 : vector<16x1xf32> to vector<16x256xf32>
    %217 = arith.mulf %214, %216 : vector<16x256xf32>
    %218 = arith.addf %198, %217 : vector<16x256xf32>
    %c16_i32_54 = arith.constant 16 : i32
    %219 = tpu.dynamic_rotate %36 by %c16_i32_54 dim 1 : vector<16x256xf32>, i32 -> vector<16x256xf32>
    %220 = arith.andi %48, %78 : vector<1x256xi1>
    %cst_55 = arith.constant 0.000000e+00 : f32
    %221 = vector.shape_cast %220 : vector<1x256xi1> to vector<1x256xi1>
    %222 = vector.broadcast %221 : vector<1x256xi1> to vector<16x256xi1>
    %223 = vector.broadcast %cst_55 : f32 to vector<16x256xf32>
    %224 = arith.select %222, %219, %223 : vector<16x256xi1>, vector<16x256xf32>
    %225 = vector.extract_strided_slice %146 {offsets = [0, 7], sizes = [16, 1], strides = [1, 1]} : vector<16x25xf32> to vector<16x1xf32>
    %226 = vector.broadcast %225 : vector<16x1xf32> to vector<16x256xf32>
    %227 = arith.mulf %224, %226 : vector<16x256xf32>
    %228 = arith.addf %208, %227 : vector<16x256xf32>
    %c15_i32_56 = arith.constant 15 : i32
    %229 = tpu.dynamic_rotate %36 by %c15_i32_56 dim 1 : vector<16x256xf32>, i32 -> vector<16x256xf32>
    %230 = arith.andi %48, %83 : vector<1x256xi1>
    %cst_57 = arith.constant 0.000000e+00 : f32
    %231 = vector.shape_cast %230 : vector<1x256xi1> to vector<1x256xi1>
    %232 = vector.broadcast %231 : vector<1x256xi1> to vector<16x256xi1>
    %233 = vector.broadcast %cst_57 : f32 to vector<16x256xf32>
    %234 = arith.select %232, %229, %233 : vector<16x256xi1>, vector<16x256xf32>
    %235 = vector.extract_strided_slice %146 {offsets = [0, 8], sizes = [16, 1], strides = [1, 1]} : vector<16x25xf32> to vector<16x1xf32>
    %236 = vector.broadcast %235 : vector<16x1xf32> to vector<16x256xf32>
    %237 = arith.mulf %234, %236 : vector<16x256xf32>
    %238 = arith.addf %218, %237 : vector<16x256xf32>
    %c14_i32_58 = arith.constant 14 : i32
    %239 = tpu.dynamic_rotate %36 by %c14_i32_58 dim 1 : vector<16x256xf32>, i32 -> vector<16x256xf32>
    %240 = arith.andi %48, %88 : vector<1x256xi1>
    %cst_59 = arith.constant 0.000000e+00 : f32
    %241 = vector.shape_cast %240 : vector<1x256xi1> to vector<1x256xi1>
    %242 = vector.broadcast %241 : vector<1x256xi1> to vector<16x256xi1>
    %243 = vector.broadcast %cst_59 : f32 to vector<16x256xf32>
    %244 = arith.select %242, %239, %243 : vector<16x256xi1>, vector<16x256xf32>
    %245 = vector.extract_strided_slice %146 {offsets = [0, 9], sizes = [16, 1], strides = [1, 1]} : vector<16x25xf32> to vector<16x1xf32>
    %246 = vector.broadcast %245 : vector<16x1xf32> to vector<16x256xf32>
    %247 = arith.mulf %244, %246 : vector<16x256xf32>
    %248 = arith.addf %228, %247 : vector<16x256xf32>
    %c2_i32_60 = arith.constant 2 : i32
    %249 = tpu.dynamic_rotate %36 by %c2_i32_60 dim 1 : vector<16x256xf32>, i32 -> vector<16x256xf32>
    %250 = arith.andi %53, %68 : vector<1x256xi1>
    %cst_61 = arith.constant 0.000000e+00 : f32
    %251 = vector.shape_cast %250 : vector<1x256xi1> to vector<1x256xi1>
    %252 = vector.broadcast %251 : vector<1x256xi1> to vector<16x256xi1>
    %253 = vector.broadcast %cst_61 : f32 to vector<16x256xf32>
    %254 = arith.select %252, %249, %253 : vector<16x256xi1>, vector<16x256xf32>
    %255 = vector.extract_strided_slice %146 {offsets = [0, 10], sizes = [16, 1], strides = [1, 1]} : vector<16x25xf32> to vector<16x1xf32>
    %256 = vector.broadcast %255 : vector<16x1xf32> to vector<16x256xf32>
    %257 = arith.mulf %254, %256 : vector<16x256xf32>
    %258 = arith.addf %238, %257 : vector<16x256xf32>
    %c1_i32_62 = arith.constant 1 : i32
    %259 = tpu.dynamic_rotate %36 by %c1_i32_62 dim 1 : vector<16x256xf32>, i32 -> vector<16x256xf32>
    %260 = arith.andi %53, %73 : vector<1x256xi1>
    %cst_63 = arith.constant 0.000000e+00 : f32
    %261 = vector.shape_cast %260 : vector<1x256xi1> to vector<1x256xi1>
    %262 = vector.broadcast %261 : vector<1x256xi1> to vector<16x256xi1>
    %263 = vector.broadcast %cst_63 : f32 to vector<16x256xf32>
    %264 = arith.select %262, %259, %263 : vector<16x256xi1>, vector<16x256xf32>
    %265 = vector.extract_strided_slice %146 {offsets = [0, 11], sizes = [16, 1], strides = [1, 1]} : vector<16x25xf32> to vector<16x1xf32>
    %266 = vector.broadcast %265 : vector<16x1xf32> to vector<16x256xf32>
    %267 = arith.mulf %264, %266 : vector<16x256xf32>
    %268 = arith.addf %248, %267 : vector<16x256xf32>
    %269 = vector.extract_strided_slice %146 {offsets = [0, 12], sizes = [16, 1], strides = [1, 1]} : vector<16x25xf32> to vector<16x1xf32>
    %270 = vector.broadcast %269 : vector<16x1xf32> to vector<16x256xf32>
    %271 = arith.mulf %36, %270 : vector<16x256xf32>
    %272 = arith.addf %258, %271 : vector<16x256xf32>
    %c255_i32_64 = arith.constant 255 : i32
    %273 = tpu.dynamic_rotate %36 by %c255_i32_64 dim 1 : vector<16x256xf32>, i32 -> vector<16x256xf32>
    %274 = arith.andi %53, %83 : vector<1x256xi1>
    %cst_65 = arith.constant 0.000000e+00 : f32
    %275 = vector.shape_cast %274 : vector<1x256xi1> to vector<1x256xi1>
    %276 = vector.broadcast %275 : vector<1x256xi1> to vector<16x256xi1>
    %277 = vector.broadcast %cst_65 : f32 to vector<16x256xf32>
    %278 = arith.select %276, %273, %277 : vector<16x256xi1>, vector<16x256xf32>
    %279 = vector.extract_strided_slice %146 {offsets = [0, 13], sizes = [16, 1], strides = [1, 1]} : vector<16x25xf32> to vector<16x1xf32>
    %280 = vector.broadcast %279 : vector<16x1xf32> to vector<16x256xf32>
    %281 = arith.mulf %278, %280 : vector<16x256xf32>
    %282 = arith.addf %268, %281 : vector<16x256xf32>
    %c254_i32 = arith.constant 254 : i32
    %283 = tpu.dynamic_rotate %36 by %c254_i32 dim 1 : vector<16x256xf32>, i32 -> vector<16x256xf32>
    %284 = arith.andi %53, %88 : vector<1x256xi1>
    %cst_66 = arith.constant 0.000000e+00 : f32
    %285 = vector.shape_cast %284 : vector<1x256xi1> to vector<1x256xi1>
    %286 = vector.broadcast %285 : vector<1x256xi1> to vector<16x256xi1>
    %287 = vector.broadcast %cst_66 : f32 to vector<16x256xf32>
    %288 = arith.select %286, %283, %287 : vector<16x256xi1>, vector<16x256xf32>
    %289 = vector.extract_strided_slice %146 {offsets = [0, 14], sizes = [16, 1], strides = [1, 1]} : vector<16x25xf32> to vector<16x1xf32>
    %290 = vector.broadcast %289 : vector<16x1xf32> to vector<16x256xf32>
    %291 = arith.mulf %288, %290 : vector<16x256xf32>
    %292 = arith.addf %272, %291 : vector<16x256xf32>
    %c242_i32 = arith.constant 242 : i32
    %293 = tpu.dynamic_rotate %36 by %c242_i32 dim 1 : vector<16x256xf32>, i32 -> vector<16x256xf32>
    %294 = arith.andi %58, %68 : vector<1x256xi1>
    %cst_67 = arith.constant 0.000000e+00 : f32
    %295 = vector.shape_cast %294 : vector<1x256xi1> to vector<1x256xi1>
    %296 = vector.broadcast %295 : vector<1x256xi1> to vector<16x256xi1>
    %297 = vector.broadcast %cst_67 : f32 to vector<16x256xf32>
    %298 = arith.select %296, %293, %297 : vector<16x256xi1>, vector<16x256xf32>
    %299 = vector.extract_strided_slice %146 {offsets = [0, 15], sizes = [16, 1], strides = [1, 1]} : vector<16x25xf32> to vector<16x1xf32>
    %300 = vector.broadcast %299 : vector<16x1xf32> to vector<16x256xf32>
    %301 = arith.mulf %298, %300 : vector<16x256xf32>
    %302 = arith.addf %282, %301 : vector<16x256xf32>
    %c241_i32_68 = arith.constant 241 : i32
    %303 = tpu.dynamic_rotate %36 by %c241_i32_68 dim 1 : vector<16x256xf32>, i32 -> vector<16x256xf32>
    %304 = arith.andi %58, %73 : vector<1x256xi1>
    %cst_69 = arith.constant 0.000000e+00 : f32
    %305 = vector.shape_cast %304 : vector<1x256xi1> to vector<1x256xi1>
    %306 = vector.broadcast %305 : vector<1x256xi1> to vector<16x256xi1>
    %307 = vector.broadcast %cst_69 : f32 to vector<16x256xf32>
    %308 = arith.select %306, %303, %307 : vector<16x256xi1>, vector<16x256xf32>
    %309 = vector.extract_strided_slice %146 {offsets = [0, 16], sizes = [16, 1], strides = [1, 1]} : vector<16x25xf32> to vector<16x1xf32>
    %310 = vector.broadcast %309 : vector<16x1xf32> to vector<16x256xf32>
    %311 = arith.mulf %308, %310 : vector<16x256xf32>
    %312 = arith.addf %292, %311 : vector<16x256xf32>
    %c240_i32_70 = arith.constant 240 : i32
    %313 = tpu.dynamic_rotate %36 by %c240_i32_70 dim 1 : vector<16x256xf32>, i32 -> vector<16x256xf32>
    %314 = arith.andi %58, %78 : vector<1x256xi1>
    %cst_71 = arith.constant 0.000000e+00 : f32
    %315 = vector.shape_cast %314 : vector<1x256xi1> to vector<1x256xi1>
    %316 = vector.broadcast %315 : vector<1x256xi1> to vector<16x256xi1>
    %317 = vector.broadcast %cst_71 : f32 to vector<16x256xf32>
    %318 = arith.select %316, %313, %317 : vector<16x256xi1>, vector<16x256xf32>
    %319 = vector.extract_strided_slice %146 {offsets = [0, 17], sizes = [16, 1], strides = [1, 1]} : vector<16x25xf32> to vector<16x1xf32>
    %320 = vector.broadcast %319 : vector<16x1xf32> to vector<16x256xf32>
    %321 = arith.mulf %318, %320 : vector<16x256xf32>
    %322 = arith.addf %302, %321 : vector<16x256xf32>
    %c239_i32_72 = arith.constant 239 : i32
    %323 = tpu.dynamic_rotate %36 by %c239_i32_72 dim 1 : vector<16x256xf32>, i32 -> vector<16x256xf32>
    %324 = arith.andi %58, %83 : vector<1x256xi1>
    %cst_73 = arith.constant 0.000000e+00 : f32
    %325 = vector.shape_cast %324 : vector<1x256xi1> to vector<1x256xi1>
    %326 = vector.broadcast %325 : vector<1x256xi1> to vector<16x256xi1>
    %327 = vector.broadcast %cst_73 : f32 to vector<16x256xf32>
    %328 = arith.select %326, %323, %327 : vector<16x256xi1>, vector<16x256xf32>
    %329 = vector.extract_strided_slice %146 {offsets = [0, 18], sizes = [16, 1], strides = [1, 1]} : vector<16x25xf32> to vector<16x1xf32>
    %330 = vector.broadcast %329 : vector<16x1xf32> to vector<16x256xf32>
    %331 = arith.mulf %328, %330 : vector<16x256xf32>
    %332 = arith.addf %312, %331 : vector<16x256xf32>
    %c238_i32 = arith.constant 238 : i32
    %333 = tpu.dynamic_rotate %36 by %c238_i32 dim 1 : vector<16x256xf32>, i32 -> vector<16x256xf32>
    %334 = arith.andi %58, %88 : vector<1x256xi1>
    %cst_74 = arith.constant 0.000000e+00 : f32
    %335 = vector.shape_cast %334 : vector<1x256xi1> to vector<1x256xi1>
    %336 = vector.broadcast %335 : vector<1x256xi1> to vector<16x256xi1>
    %337 = vector.broadcast %cst_74 : f32 to vector<16x256xf32>
    %338 = arith.select %336, %333, %337 : vector<16x256xi1>, vector<16x256xf32>
    %339 = vector.extract_strided_slice %146 {offsets = [0, 19], sizes = [16, 1], strides = [1, 1]} : vector<16x25xf32> to vector<16x1xf32>
    %340 = vector.broadcast %339 : vector<16x1xf32> to vector<16x256xf32>
    %341 = arith.mulf %338, %340 : vector<16x256xf32>
    %342 = arith.addf %322, %341 : vector<16x256xf32>
    %c226_i32 = arith.constant 226 : i32
    %343 = tpu.dynamic_rotate %36 by %c226_i32 dim 1 : vector<16x256xf32>, i32 -> vector<16x256xf32>
    %344 = arith.andi %63, %68 : vector<1x256xi1>
    %cst_75 = arith.constant 0.000000e+00 : f32
    %345 = vector.shape_cast %344 : vector<1x256xi1> to vector<1x256xi1>
    %346 = vector.broadcast %345 : vector<1x256xi1> to vector<16x256xi1>
    %347 = vector.broadcast %cst_75 : f32 to vector<16x256xf32>
    %348 = arith.select %346, %343, %347 : vector<16x256xi1>, vector<16x256xf32>
    %349 = vector.extract_strided_slice %146 {offsets = [0, 20], sizes = [16, 1], strides = [1, 1]} : vector<16x25xf32> to vector<16x1xf32>
    %350 = vector.broadcast %349 : vector<16x1xf32> to vector<16x256xf32>
    %351 = arith.mulf %348, %350 : vector<16x256xf32>
    %352 = arith.addf %332, %351 : vector<16x256xf32>
    %c225_i32 = arith.constant 225 : i32
    %353 = tpu.dynamic_rotate %36 by %c225_i32 dim 1 : vector<16x256xf32>, i32 -> vector<16x256xf32>
    %354 = arith.andi %63, %73 : vector<1x256xi1>
    %cst_76 = arith.constant 0.000000e+00 : f32
    %355 = vector.shape_cast %354 : vector<1x256xi1> to vector<1x256xi1>
    %356 = vector.broadcast %355 : vector<1x256xi1> to vector<16x256xi1>
    %357 = vector.broadcast %cst_76 : f32 to vector<16x256xf32>
    %358 = arith.select %356, %353, %357 : vector<16x256xi1>, vector<16x256xf32>
    %359 = vector.extract_strided_slice %146 {offsets = [0, 21], sizes = [16, 1], strides = [1, 1]} : vector<16x25xf32> to vector<16x1xf32>
    %360 = vector.broadcast %359 : vector<16x1xf32> to vector<16x256xf32>
    %361 = arith.mulf %358, %360 : vector<16x256xf32>
    %362 = arith.addf %342, %361 : vector<16x256xf32>
    %c224_i32 = arith.constant 224 : i32
    %363 = tpu.dynamic_rotate %36 by %c224_i32 dim 1 : vector<16x256xf32>, i32 -> vector<16x256xf32>
    %364 = arith.andi %63, %78 : vector<1x256xi1>
    %cst_77 = arith.constant 0.000000e+00 : f32
    %365 = vector.shape_cast %364 : vector<1x256xi1> to vector<1x256xi1>
    %366 = vector.broadcast %365 : vector<1x256xi1> to vector<16x256xi1>
    %367 = vector.broadcast %cst_77 : f32 to vector<16x256xf32>
    %368 = arith.select %366, %363, %367 : vector<16x256xi1>, vector<16x256xf32>
    %369 = vector.extract_strided_slice %146 {offsets = [0, 22], sizes = [16, 1], strides = [1, 1]} : vector<16x25xf32> to vector<16x1xf32>
    %370 = vector.broadcast %369 : vector<16x1xf32> to vector<16x256xf32>
    %371 = arith.mulf %368, %370 : vector<16x256xf32>
    %372 = arith.addf %352, %371 : vector<16x256xf32>
    %c223_i32 = arith.constant 223 : i32
    %373 = tpu.dynamic_rotate %36 by %c223_i32 dim 1 : vector<16x256xf32>, i32 -> vector<16x256xf32>
    %374 = arith.andi %63, %83 : vector<1x256xi1>
    %cst_78 = arith.constant 0.000000e+00 : f32
    %375 = vector.shape_cast %374 : vector<1x256xi1> to vector<1x256xi1>
    %376 = vector.broadcast %375 : vector<1x256xi1> to vector<16x256xi1>
    %377 = vector.broadcast %cst_78 : f32 to vector<16x256xf32>
    %378 = arith.select %376, %373, %377 : vector<16x256xi1>, vector<16x256xf32>
    %379 = vector.extract_strided_slice %146 {offsets = [0, 23], sizes = [16, 1], strides = [1, 1]} : vector<16x25xf32> to vector<16x1xf32>
    %380 = vector.broadcast %379 : vector<16x1xf32> to vector<16x256xf32>
    %381 = arith.mulf %378, %380 : vector<16x256xf32>
    %382 = arith.addf %362, %381 : vector<16x256xf32>
    %c222_i32 = arith.constant 222 : i32
    %383 = tpu.dynamic_rotate %36 by %c222_i32 dim 1 : vector<16x256xf32>, i32 -> vector<16x256xf32>
    %384 = arith.andi %63, %88 : vector<1x256xi1>
    %cst_79 = arith.constant 0.000000e+00 : f32
    %385 = vector.shape_cast %384 : vector<1x256xi1> to vector<1x256xi1>
    %386 = vector.broadcast %385 : vector<1x256xi1> to vector<16x256xi1>
    %387 = vector.broadcast %cst_79 : f32 to vector<16x256xf32>
    %388 = arith.select %386, %383, %387 : vector<16x256xi1>, vector<16x256xf32>
    %389 = vector.extract_strided_slice %146 {offsets = [0, 24], sizes = [16, 1], strides = [1, 1]} : vector<16x25xf32> to vector<16x1xf32>
    %390 = vector.broadcast %389 : vector<16x1xf32> to vector<16x256xf32>
    %391 = arith.mulf %388, %390 : vector<16x256xf32>
    %392 = arith.addf %372, %391 : vector<16x256xf32>
    %393 = arith.addf %392, %382 : vector<16x256xf32>
    %394 = vector.broadcast %9 : vector<16x1xf32> to vector<16x256xf32>
    %395 = arith.addf %393, %394 : vector<16x256xf32>
    %c16_80 = arith.constant 16 : index
    %c0_81 = arith.constant 0 : index
    %396 = vector.load %arg3[%c16_80, %c0_81] : memref<32x16xf32, #tpu.memory_space<vmem>>, vector<16x16xf32>
    %cst_82 = arith.constant dense<0.000000e+00> : vector<16x256xf32>
    %397 = tpu.matmul %396, %395, %cst_82 {dimension_numbers = #tpu.dot_dimension_numbers<[1], [0], [0], [1], [0, 0, 1, 1], [], []>} : vector<16x16xf32>, vector<16x256xf32>, vector<16x256xf32> -> vector<16x256xf32>
    %398 = vector.broadcast %10 : vector<16x1xf32> to vector<16x256xf32>
    %399 = arith.addf %397, %398 : vector<16x256xf32>
    %400 = arith.mulf %145, %35 : vector<16x256xf32>
    %401 = arith.mulf %400, %35 : vector<16x256xf32>
    %402 = arith.mulf %399, %36 : vector<16x256xf32>
    %403 = arith.mulf %402, %36 : vector<16x256xf32>
    %404 = tpu.concatenate %401, %403 in 0 : vector<16x256xf32>, vector<16x256xf32> -> vector<32x256xf32>
    %c32 = arith.constant 32 : index
    %c0_83 = arith.constant 0 : index
    %405 = vector.load %arg2[%c32, %c0_83] : memref<64x32xf32, #tpu.memory_space<vmem>>, vector<32x32xf32>
    %cst_84 = arith.constant dense<0.000000e+00> : vector<32x256xf32>
    %406 = tpu.matmul %405, %404, %cst_84 {dimension_numbers = #tpu.dot_dimension_numbers<[1], [0], [0], [1], [0, 0, 1, 1], [], []>} : vector<32x32xf32>, vector<32x256xf32>, vector<32x256xf32> -> vector<32x256xf32>
    %407 = vector.broadcast %6 : vector<32x1xf32> to vector<32x256xf32>
    %408 = arith.addf %406, %407 : vector<32x256xf32>
    %409 = arith.addf %408, %1 : vector<32x256xf32>
    %c0_85 = arith.constant 0 : index
    %c0_86 = arith.constant 0 : index
    %c0_87 = arith.constant 0 : index
    %410 = vector.load %arg7[%c0_85, %c0_86, %c0_87] : memref<1x32x256xf32, #tpu.memory_space<vmem>>, vector<1x32x256xf32>
    %411 = vector.shape_cast %410 : vector<1x32x256xf32> to vector<32x256xf32>
    %412 = vector.shape_cast %409 : vector<32x256xf32> to vector<1x32x256xf32>
    tpu.vector_store %arg7[%c0_85, %c0_86, %c0_87], %412 {strides = array<i32>} : memref<1x32x256xf32, #tpu.memory_space<vmem>>, vector<1x32x256xf32>,
    return
  }
  func.func @transform_0(%arg0: i32) -> (i32, i32, i32) {
    %c0_i32 = arith.constant 0 : i32
    %c0_i32_0 = arith.constant 0 : i32
    %c0_i32_1 = arith.constant 0 : i32
    return %arg0, %c0_i32, %c0_i32_0 : i32, i32, i32
  }
  func.func @transform_1(%arg0: i32) -> (i32, i32) {
    %c0_i32 = arith.constant 0 : i32
    %c0_i32_0 = arith.constant 0 : i32
    %c0_i32_1 = arith.constant 0 : i32
    return %c0_i32, %c0_i32_0 : i32, i32
  }
  func.func @transform_2(%arg0: i32) -> (i32, i32) {
    %c0_i32 = arith.constant 0 : i32
    %c0_i32_0 = arith.constant 0 : i32
    %c0_i32_1 = arith.constant 0 : i32
    return %c0_i32, %c0_i32_0 : i32, i32
  }
  func.func @transform_3(%arg0: i32) -> (i32, i32) {
    %c0_i32 = arith.constant 0 : i32
    %c0_i32_0 = arith.constant 0 : i32
    %c0_i32_1 = arith.constant 0 : i32
    return %c0_i32, %c0_i32_0 : i32, i32
  }
  func.func @transform_4(%arg0: i32) -> (i32, i32) {
    %c0_i32 = arith.constant 0 : i32
    %c0_i32_0 = arith.constant 0 : i32
    %c0_i32_1 = arith.constant 0 : i32
    return %c0_i32, %c0_i32_0 : i32, i32
  }
  func.func @transform_5(%arg0: i32) -> (i32, i32) {
    %c0_i32 = arith.constant 0 : i32
    %c0_i32_0 = arith.constant 0 : i32
    %c0_i32_1 = arith.constant 0 : i32
    return %c0_i32, %c0_i32_0 : i32, i32
  }
  func.func @transform_6(%arg0: i32) -> (i32, i32, i32) {
    %c0_i32 = arith.constant 0 : i32
    %c0_i32_0 = arith.constant 0 : i32
    %c0_i32_1 = arith.constant 0 : i32
    return %arg0, %c0_i32, %c0_i32_0 : i32, i32, i32
  }
}

</mosaic_0001>

<bundles_post_ra>
// kernel: tpu_custom_call.1
= control target key start
LH: loop header
LB: loop body
LE: loop exit
PB: predicated region body
PF: predicated region fallthrough
CT: control target
= control target key end

     0   :  { %s5090_s0 = inlined_call_operand.vmem [shape: f32[2,32,256], index: 0, kind: input, shape index: {}]   ;;  %s5091_s1 = inlined_call_operand.vmem [shape: f32[64,32], index: 1, kind: input, shape index: {}]   ;;  %s5092_s2 = inlined_call_operand.vmem [shape: f32[32,16], index: 2, kind: input, shape index: {}]   ;;  %s5093_s3 = inlined_call_operand.vmem [shape: f32[32,144], index: 3, kind: input, shape index: {}]   ;;  %s5094_s4 = inlined_call_operand.vmem [shape: f32[32,8], index: 4, kind: input, shape index: {}]   ;;  %s5095_s5 = inlined_call_operand.vmem [shape: s32[2,256], index: 5, kind: input, shape index: {}]   ;;  %s5096_s6 = inlined_call_operand.hbm [shape: f32[2,32,256], index: 6, kind: output, shape index: {}]  }
   0x1   :  { %5338 = sst [smem:[#allocation104_spill]] %s5090_s0 }
   0x2   :  { %11 = vsyncpa [#allocation3], 0 }
   0x3   :  { %13 = vsyncpa [#allocation3 + $0x1], 0  ;;  %s2829_s21 = smov 0   ;;  %s2831_s22 = smov 0  }
   0x4   :  { %s2833_s23 = smov 0   ;;  %s2835_s24 = smov 0  }
   0x5 LB: > { %5339 = sst [smem:[#allocation5_spill]] %s2736_s23  ;;  %s2850_s25 = sadd.s32 4294967295, %s2740_s24   ;;  %s2740_s24 = sphi %s2835_s24, %s5898_s24   ;;  %s2736_s23 = sphi %s2833_s23, %s5895_s23   ;;  %s2732_s22 = sphi %s2831_s22, %s5897_s22   ;;  %s2728_s21 = sphi %s2829_s21, %s5896_s21  }
   0x6   : > { %s2295_s26 = sadd.s32 4294967294, %s2740_s24   ;;  %s2854_s27 = sadd.s32 1, %s2740_s24  }
   0x7   : > { %s157_s28 = sadd.s32 1, %s2736_s23  ;;  %s154_s29 = ssub.s32 %s2740_s24, %s2854_s27 }
   0x8   : > { %p167_p0 = scmp.ne.s32.totalorder %s2736_s23, %s2732_s22  ;;  %p155_p1 = scmp.eq.s32.totalorder %s154_s29, 0 }
   0x9   : > { %p168_p2 = scmp.eq.s32.totalorder %s2850_s25, 1  ;;  %p173_p3 = scmp.ne.s32.totalorder %s2732_s22, %s2728_s21 }
   0xa   : > { %p174_p4 = scmp.eq.s32.totalorder %s2295_s26, 1  ;;  %p2298_p7 = scmp.ge.s32.totalorder %s2740_s24, 1 }
   0xb   : > { %s2865_s30 = scalar_select %p155_p1, %s2736_s23, %s157_s28  }
   0xc   : > { %p2867_p5 = por %p168_p2, %p167_p0  ;;  %p2871_p6 = por %p174_p4, %p173_p3 }
   0xd   : > { %5340 = sst [smem:[#allocation6_spill]] %s2865_s30  ;;  %p215_p8 = scmp.lt.s32.totalorder %s2740_s24, 3 }
   0xf   : > { %p216_p9 = pnand %p2298_p7, %p215_p8 }
  0x11   : > { %219 = sbr.rel (%p216_p9) target bundleno = 1319 (0x527), region = 44 }
  0x18   : > { %v2880_v0 = vld [vmem:[%s5094_s4] sm:$0xff]  ;;  %v2742_v1 = vmov 1   ;;  %v5130_v2 = vmov 0   ;;  %v2889_v3 = vld [vmem:[%s5094_s4 + $0x8] sm:$0xff]  ;;  %p245_p10 = scmp.lt.s32.totalorder %s2850_s25, 1  ;;  %v260_v4 = vld [vmem:[%s5094_s4 + $0x10] sm:$0xff] }
  0x19   : > { %2523 = vset.pattern.permute.xlu1 %v2742_v1  ;;  %2522 = vset.pattern.permute.xlu0 %v5130_v2  ;;  %v261_v5 = vld [vmem:[%s5094_s4 + $0x18] sm:$0xff]  ;;  %s5343_s0 = sld [smem:[#allocation104_spill]]  ;;  %v5123_v11 = vmov 0.0   ;;  %v2745_v22 = vmov 2   ;;  %v2930_v24 = vld [vmem:[%s5093_s3 + $0x20] sm:$0xff]  ;;  %v2936_v27 = vld [vmem:[%s5093_s3 + $0x30] sm:$0xff] }
  0x1a   : > { %360 = vperm.xlu1 %2523, %v2880_v0   ;;  %333 = vperm.xlu0 %2522, %v2880_v0   ;;  %s246_s17 = scalar_select %p245_p10, %s2850_s25, 1  ;;  %v5126_v35 = vmov 3   ;;  %v5125_v39 = vmov 7   ;;  %v2748_v44 = vmov 9   ;;  %v2749_v51 = vmov 4  }
  0x1b   : > { %480 = vmatprep.mubr.f32.mxu1 %v5123_v11  ;;  %948 = vmatprep.mubr.f32.mxu0 %v5123_v11  ;;  %v2750_v52 = vmov 10   ;;  %v5128_v59 = vmov 5   ;;  %v2752_v62 = vmov 11   ;;  %vm5156_vm0 = vcmask 261120   ;;  %s5101_s19 = smov 16   ;;  %s5209_s20 = smov 17  }
  0x1c   : > { %s2354_s18 = sshll.u32 %s246_s17, 6  ;;  %s5208_s28 = smov 15   ;;  %vm5158_vm1 = vcmask 130048  }
  0x1d   : > { %s5200_s29 = smov 1   ;;  %s5199_s9 = smov 127  }
  0x1e   : > { %364 = vperm.xlu1 %2523, %v2889_v3   ;;  %338 = vperm.xlu0 %2522, %v2889_v3   ;;  %s5181_s10 = smov 113   ;;  %s5107_s11 = smov 112  }
  0x1f   : > { %s2907_s26 = scalar_lea.vmem %s5343_s0, %s2354_s18  ;;  %s5121_s12 = smov 111  }
  0x20   : > { %v250_v6 = vld [vmem:[%s2907_s26] sm:$0xff]  ;;  %v252_v7 = vld [vmem:[%s2907_s26 + $0x10] sm:$0xff]  ;;  %v251_v8 = vld [vmem:[%s2907_s26 + $0x8] sm:$0xff]  ;;  %s5113_s13 = smov 33   ;;  %s5109_s16 = smov 34  }
  0x21   : > { %v253_v9 = vld [vmem:[%s2907_s26 + $0x18] sm:$0xff]  ;;  %v262_v10 = vadd.f32 %v252_v7, %v250_v6  ;;  %v254_v12 = vld [vmem:[%s2907_s26 + $0x20] sm:$0xff]  ;;  %v255_v14 = vld [vmem:[%s2907_s26 + $0x28] sm:$0xff]  ;;  %s5114_s17 = smov 31   ;;  %s5111_s18 = smov 32  }
  0x22   : > { %2524 = vset.pattern.permute.xlu1 %v5130_v2  ;;  %343 = vperm.xlu0 %2522, %v260_v4   ;;  %v271_v13 = vadd.f32 %v253_v9, %v251_v8  ;;  %v2919_v16 = vld [vmem:[%s2907_s26 + $0x30] sm:$0xff]  ;;  %v2922_v18 = vld [vmem:[%s2907_s26 + $0x38] sm:$0xff]  ;;  %s5097_s14 = smov 30   ;;  %s5099_s15 = smov 18  }
  0x23   : > { %348 = vperm.xlu1 %2524, %v261_v5   ;;  %v263_v15 = vadd.f32 %v262_v10, %v254_v12  ;;  %v2755_v10 = vmov 13   ;;  %s5497_s23 = smov 17   ;;  %s2789_s30 = smov 96  }
  0x24   : > { %v272_v17 = vadd.f32 %v271_v13, %v255_v14 }
  0x25   : > { %v264_v19 = vadd.f32 %v263_v15, %v2919_v16 }
  0x26   : > { %2525 = vset.pattern.permute.xlu0 %v2742_v1  ;;  %v273_v20 = vadd.f32 %v272_v17, %v2922_v18  ;;  %v2757_v17 = vmov 8  }
  0x27   : > { %2526 = vset.pattern.permute.xlu1 %v2742_v1  ;;  %368 = vperm.xlu0 %2525, %v260_v4   ;;  %v265_v21 = vrot.slane %v264_v19, 4 }
  0x28   : > { %372 = vperm.xlu1 %2526, %v261_v5   ;;  %v274_v23 = vrot.slane %v273_v20, 4 }
  0x29   : > { %v266_v25 = vadd.f32 %v265_v21, %v264_v19  ;;  %v2758_v19 = vmov 15  }
  0x2a   : > { %v275_v26 = vadd.f32 %v274_v23, %v273_v20  ;;  %v2759_v23 = vmov 16  }
  0x2b   : > { %2528 = vset.pattern.permute.xlu0 %v5130_v2  ;;  %v267_v28 = vrot.slane %v266_v25, 2 }
  0x2c   : > { %2527 = vset.pattern.permute.xlu1 %v2745_v22  ;;  %994 = vperm.xlu0 %2528, %v2930_v24   ;;  %v276_v29 = vrot.slane %v275_v26, 2 }
  0x2d   : > { %388 = vperm.xlu1 %2527, %v2880_v0   ;;  %v268_v30 = vadd.f32 %v267_v28, %v266_v25  ;;  %v2760_v28 = vmov 17  }
  0x2e   : > { %v277_v31 = vadd.f32 %v276_v29, %v275_v26 }
  0x2f   : > { %v269_v32 = vrot.slane %v268_v30, 1 }
  0x30   : > { %2529 = vset.pattern.permute.xlu0 %v2745_v22  ;;  %v278_v33 = vrot.slane %v277_v31, 1 }
  0x31   : > { %400 = vperm.xlu1 %2527, %v261_v5   ;;  %392 = vperm.xlu0 %2529, %v2889_v3   ;;  %v270_v34 = vadd.f32 %v269_v32, %v268_v30 }
  0x32   : > { %v279_v36 = vadd.f32 %v278_v33, %v277_v31  ;;  %v2761_v31 = vmov 18  }
  0x33   : > { %v281_v37 = vmul.f32 0.03125, %v270_v34 }
  0x34   : > { %v282_v38 = vmul.f32 0.03125, %v279_v36 }
  0x35   : > { %2530 = vset.pattern.permute.xlu1 %v5130_v2  ;;  %396 = vperm.xlu0 %2529, %v260_v4   ;;  %v2950_v40 = vsub.f32 %v250_v6, %v281_v37  ;;  %v2952_v41 = vsub.f32 %v252_v7, %v281_v37  ;;  %v2962_v45 = vsub.f32 %v254_v12, %v281_v37  ;;  %v2753_v6 = vmov 12  }
  0x36   : > { %999 = vperm.xlu1 %2530, %v2936_v27   ;;  %v2955_v42 = vsub.f32 %v251_v8, %v282_v38  ;;  %v2957_v43 = vsub.f32 %v253_v9, %v282_v38  ;;  %v2968_v48 = vsub.f32 %v255_v14, %v282_v38  ;;  %v2977_v53 = vsub.f32 %v2919_v16, %v281_v37 }
  0x37   : > { %v291_v46 = vmul.f32 %v2950_v40, %v2950_v40  ;;  %v293_v47 = vmul.f32 %v2952_v41, %v2952_v41  ;;  %v295_v54 = vmul.f32 %v2962_v45, %v2962_v45  ;;  %v2983_v56 = vsub.f32 %v2922_v18, %v282_v38 }
  0x38   : > { %v292_v49 = vmul.f32 %v2955_v42, %v2955_v42  ;;  %v294_v50 = vmul.f32 %v2957_v43, %v2957_v43  ;;  %v296_v57 = vmul.f32 %v2968_v48, %v2968_v48  ;;  %v297_v60 = vmul.f32 %v2977_v53, %v2977_v53 }
  0x39   : > { %1089 = vperm.xlu0 %2529, %v2936_v27   ;;  %v299_v55 = vadd.f32 %v293_v47, %v291_v46  ;;  %v298_v63 = vmul.f32 %v2983_v56, %v2983_v56  ;;  %v2754_v7 = vmov 6   ;;  %v2756_v14 = vmov 14  }
  0x3a   : > { %2531 = vset.pattern.permute.xlu1 %v2745_v22  ;;  %v308_v58 = vadd.f32 %v294_v50, %v292_v49 }
  0x3b   : > { %1085 = vperm.xlu1 %2531, %v2930_v24   ;;  %v300_v61 = vadd.f32 %v299_v55, %v295_v54 }
  0x3d   : > { %2533 = vset.pattern.permute.xlu0 %v5126_v35  ;;  %v301_v4 = vadd.f32 %v300_v61, %v297_v60 }
  0x3e   : > { %1130 = vperm.xlu0 %2533, %v2930_v24  }
  0x3f   : > { %2532 = vset.pattern.permute.xlu1 %v2742_v1  ;;  %v309_v1 = vadd.f32 %v308_v58, %v296_v57  ;;  %v302_v8 = vrot.slane %v301_v4, 4 }
  0x40   : > { %1040 = vperm.xlu1 %2532, %v2930_v24  }
  0x41   : > { %v310_v5 = vadd.f32 %v309_v1, %v298_v63  ;;  %v303_v12 = vadd.f32 %v302_v8, %v301_v4 }
  0x42   : > { %2539 = vset.pattern.permute.xlu0 %v5125_v39 }
  0x43   : > { %1288 = vperm.xlu0 %2539, %v2936_v27   ;;  %v311_v9 = vrot.slane %v310_v5, 4  ;;  %v304_v15 = vrot.slane %v303_v12, 2 }
  0x44   : > { %1044 = vperm.xlu1 %2532, %v2936_v27  }
  0x45   : > { %v312_v13 = vadd.f32 %v311_v9, %v310_v5  ;;  %v305_v18 = vadd.f32 %v304_v15, %v303_v12 }
  0x47   : > { %2541 = vset.pattern.permute.xlu0 %v2748_v44  ;;  %v313_v16 = vrot.slane %v312_v13, 2  ;;  %v306_v21 = vrot.slane %v305_v18, 1 }
  0x48   : > { %2534 = vset.pattern.permute.xlu1 %v5126_v35  ;;  %1361 = vperm.xlu0 %2541, %v2930_v24  }
  0x49   : > { %1134 = vperm.xlu1 %2534, %v2936_v27   ;;  %v314_v20 = vadd.f32 %v313_v16, %v312_v13  ;;  %v307_v25 = vadd.f32 %v306_v21, %v305_v18  ;;  %v384_v18 = vld [vmem:[%s5091_s1 + $0x8] sm:$0xff]  ;;  %v2762_v21 = vmov 19  }
  0x4b   : > { %v315_v22 = vrot.slane %v314_v20, 1  ;;  %v317_v29 = vmul.f32 0.03125, %v307_v25 }
  0x4c   : > { %2544 = vset.pattern.permute.xlu0 %v2750_v52 }
  0x4d   : > { %2535 = vset.pattern.permute.xlu1 %v2749_v51  ;;  %1410 = vperm.xlu0 %2544, %v2936_v27   ;;  %v316_v26 = vadd.f32 %v315_v22, %v314_v20  ;;  %v319_v32 = vadd.f32 1e-06, %v317_v29  ;;  %v386_v20 = vld [vmem:[%s5091_s1 + $0x18] sm:$0xff] }
  0x4e   : > { %1175 = vperm.xlu1 %2535, %v2930_v24  }
  0x4f   : > { %v318_v30 = vmul.f32 0.03125, %v316_v26  ;;  %2661 = vrsqrt.f32 %v319_v32 }
  0x51   : > { %2545 = vset.pattern.permute.xlu0 %v2752_v62  ;;  %v320_v33 = vadd.f32 1e-06, %v318_v30 }
  0x52   : > { %2536 = vset.pattern.permute.xlu1 %v5128_v59  ;;  %1438 = vperm.xlu0 %2545, %v2930_v24  }
  0x53   : > { %1220 = vperm.xlu1 %2536, %v2930_v24   ;;  %2663 = vrsqrt.f32 %v320_v33 }
  0x56   : > { %2548 = vset.pattern.permute.xlu0 %v2753_v6 }
  0x57   : > { %1224 = vperm.xlu1 %2536, %v2936_v27   ;;  %1458 = vperm.xlu0 %2548, %v2936_v27  }
  0x59   : > { %v2662_v34 = vpop.eup %2661 }
  0x5a   : > { %v323_v37 = vmul.f32 %v2662_v34, %v2950_v40  ;;  %v325_v47 = vmul.f32 %v2662_v34, %v2952_v41  ;;  %v327_v41 = vmul.f32 %v2662_v34, %v2962_v45  ;;  %v329_v1 = vmul.f32 %v2662_v34, %v2977_v53 }
  0x5b   : > { %2537 = vset.pattern.permute.xlu1 %v2754_v7  ;;  %2549 = vset.pattern.permute.xlu0 %v2755_v10 }
  0x5c   : > { %1256 = vperm.xlu1 %2537, %v2936_v27   ;;  %1486 = vperm.xlu0 %2549, %v2930_v24  }
  0x5d   : > { %v2664_v36 = vpop.eup %2663 }
  0x5e   : > { %v324_v38 = vmul.f32 %v2664_v36, %v2955_v42  ;;  %v326_v49 = vmul.f32 %v2664_v36, %v2957_v43  ;;  %v328_v43 = vmul.f32 %v2664_v36, %v2968_v48  ;;  %v330_v4 = vmul.f32 %v2664_v36, %v2983_v56 }
  0x60   : > { %2538 = vset.pattern.permute.xlu1 %v5125_v39  ;;  %2552 = vset.pattern.permute.xlu0 %v2756_v14  ;;  %v5387_v39 = vmov 0 }
  0x61   : > { %1284 = vperm.xlu1 %2538, %v2930_v24   ;;  %1535 = vperm.xlu0 %2552, %v2936_v27  }
  0x65   : > { %2540 = vset.pattern.permute.xlu1 %v2757_v17  ;;  %2553 = vset.pattern.permute.xlu0 %v2758_v19  ;;  %v383_v17 = vld [vmem:[%s5091_s1] sm:$0xff] }
  0x66   : > { %1316 = vperm.xlu1 %2540, %v2930_v24   ;;  %1576 = vperm.xlu0 %2553, %v2930_v24  }
  0x6a   : > { %1320 = vperm.xlu1 %2540, %v2936_v27   ;;  %2556 = vset.pattern.permute.xlu0 %v2759_v23 }
  0x6b   : > { %1612 = vperm.xlu0 %2556, %v2936_v27  }
  0x6e   : > { %2542 = vset.pattern.permute.xlu1 %v2748_v44 }
  0x6f   : > { %1365 = vperm.xlu1 %2542, %v2936_v27   ;;  %2557 = vset.pattern.permute.xlu0 %v2760_v28 }
  0x70   : > { %1640 = vperm.xlu0 %2557, %v2930_v24  }
  0x73   : > { %2543 = vset.pattern.permute.xlu1 %v2750_v52 }
  0x74   : > { %1406 = vperm.xlu1 %2543, %v2930_v24   ;;  %2600 = vset.pattern.permute.xlu0 %v2761_v31 }
  0x78   : > { %2546 = vset.pattern.permute.xlu1 %v2752_v62 }
  0x79   : > { %1442 = vperm.xlu1 %2546, %v2936_v27  }
  0x7d   : > { %2547 = vset.pattern.permute.xlu1 %v2753_v6 }
  0x7e   : > { %1454 = vperm.xlu1 %2547, %v2930_v24  }
  0x82   : > { %2550 = vset.pattern.permute.xlu1 %v2755_v10 }
  0x83   : > { %1490 = vperm.xlu1 %2550, %v2936_v27  }
  0x87   : > { %2551 = vset.pattern.permute.xlu1 %v2756_v14 }
  0x88   : > { %1531 = vperm.xlu1 %2551, %v2930_v24  }
  0x8c   : > { %2554 = vset.pattern.permute.xlu1 %v2758_v19  ;;  %v385_v19 = vld [vmem:[%s5091_s1 + $0x10] sm:$0xff] }
  0x8d   : > { %1580 = vperm.xlu1 %2554, %v2936_v27  }
  0x91   : > { %2555 = vset.pattern.permute.xlu1 %v2759_v23 }
  0x92   : > { %1608 = vperm.xlu1 %2555, %v2930_v24  }
  0x96   : > { %2558 = vset.pattern.permute.xlu1 %v2760_v28 }
  0x97   : > { %1644 = vperm.xlu1 %2558, %v2936_v27  }
  0x99   : > { %v361_v44 = vpop.permute.xlu1 %360  ;;  %v334_v46 = vpop.permute.xlu0 %333 }
  0x9a   : > { %v351_v50 = vmul.f32 %v334_v46, %v323_v37  ;;  %v352_v52 = vmul.f32 %v334_v46, %v324_v38 }
  0x9b   : > { %2559 = vset.pattern.permute.xlu1 %v2761_v31 }
  0x9c   : > { %v376_v60 = vadd.f32 %v361_v44, %v352_v52  ;;  %v375_v61 = vadd.f32 %v361_v44, %v351_v50  ;;  %1672 = vperm.xlu1 %2559, %v2930_v24  }
  0x9d   : > { %v365_v54 = vpop.permute.xlu1 %364  ;;  %v339_v55 = vpop.permute.xlu0 %338 }
  0x9e   : > { %v353_v57 = vmul.f32 %v339_v55, %v325_v47  ;;  %v354_v58 = vmul.f32 %v339_v55, %v326_v49  ;;  %v2767_v49 = vmov 20  }
  0xa0   : > { %v378_v40 = vadd.f32 %v365_v54, %v354_v58  ;;  %v377_v42 = vadd.f32 %v365_v54, %v353_v57  ;;  %2602 = vset.pattern.permute.xlu1 %v2762_v21  ;;  %v2770_v54 = vmov 21   ;;  %v2772_v57 = vmov 22  }
  0xa1   : > { %v344_v62 = vpop.permute.xlu0 %343 }
  0xa2   : > { %v349_v63 = vpop.permute.xlu1 %348  ;;  %v2356_v5 = vpack.c.bf16 %v378_v40, %v376_v60  ;;  %v2358_v6 = vpack.c.bf16 %v377_v42, %v375_v61  ;;  %v355_v8 = vmul.f32 %v344_v62, %v327_v41  ;;  %v356_v9 = vmul.f32 %v344_v62, %v328_v43 }
  0xa3   : > { %v357_v10 = vmul.f32 %v349_v63, %v329_v1  ;;  %v358_v12 = vmul.f32 %v349_v63, %v330_v4  ;;  %v2774_v42 = vmov 23  }
  0xa4   : > { %2357 = vmatprep.subr.bf16.mxu1 %v2356_v5 }
  0xa5   : > { %2359 = vmatpush1.bf16.msra.mxu1 %v2358_v6 }
  0xa6   : > { %v369_v13 = vpop.permute.xlu0 %368 }
  0xa7   : > { %v379_v45 = vadd.f32 %v369_v13, %v355_v8  ;;  %v380_v14 = vadd.f32 %v369_v13, %v356_v9  ;;  %v373_v48 = vpop.permute.xlu1 %372 }
  0xa8   : > { %v381_v15 = vadd.f32 %v373_v48, %v357_v10  ;;  %v382_v16 = vadd.f32 %v373_v48, %v358_v12 }
  0xaa   : > { %v2360_v53 = vpack.c.bf16 %v382_v16, %v380_v14  ;;  %v2362_v56 = vpack.c.bf16 %v381_v15, %v379_v45 }
  0xab   : > { %v3045_v23 = vpop.permute.xlu0 %994 }
  0xac   : > { %2361 = vmatprep.subr.bf16.mxu1 %v2360_v53  ;;  %v389_v22 = vpop.permute.xlu1 %388 }
  0xad   : > { %2363 = vmatpush1.bf16.msra.mxu1 %v2362_v56 }
  0xb0   : > { %2302 = vmatmul.mubr.msk.f32.vlgmr.msra.gmra.mrb[0].mxu1 %vm5156_vm0, %v383_v17  ;;  %v3047_v25 = vpop.permute.xlu1 %400  ;;  %v393_v29 = vpop.permute.xlu0 %392 }
  0xb1   : > { %486 = vmatprep.mubr.f32.mxu1 %v5123_v11 }
  0xb4   : > { %2303 = vmatmul.mubr.msk.f32.gmra.mrb[2].mxu1 %vm5156_vm0, %v384_v18  ;;  %v3105_v41 = vpop.permute.xlu0 %396 }
  0xb5   : > { %492 = vmatprep.mubr.f32.mxu1 %v5123_v11  ;;  %v3053_v34 = vpop.permute.xlu1 %999 }
  0xb6   : > { %5346 = vst [vmem:[#allocation9_spill] sm:$0xff] %v3053_v34 }
  0xb8   : > { %2304 = vmatmul.mubr.msk.f32.gmra.mrb[4].mxu1 %vm5156_vm0, %v385_v19  ;;  %v3113_v63 = vpop.permute.xlu0 %1089 }
  0xb9   : > { %498 = vmatprep.mubr.f32.mxu1 %v5123_v11  ;;  %5353 = vst [vmem:[#allocation16_spill] sm:$0xff] %v3113_v63 }
  0xba   : > { %v3063_v44 = vpop.permute.xlu1 %1085 }
  0xbc   : > { %2305 = vmatmul.mubr.msk.f32.gmra.mrb[6].mxu1 %vm5156_vm0, %v386_v20 }
  0xbd   : > { %v3119_v4 = vpop.permute.xlu0 %1130 }
  0xbf   : > { %v3072_v50 = vpop.permute.xlu1 %1040 }
  0xc2   : > { %v3126_v6 = vpop.permute.xlu0 %1288 }
  0xc3   : > { %v3078_v52 = vpop.permute.xlu1 %1044  ;;  %5354 = vst [vmem:[#allocation17_spill] sm:$0xff] %v3126_v6  ;;  %v5404_v6 = vmov 0 }
  0xc4   : > { %5347 = vst [vmem:[#allocation10_spill] sm:$0xff] %v3078_v52 }
  0xc7   : > { %v3133_v8 = vpop.permute.xlu0 %1361 }
  0xc8   : > { %v3083_v55 = vpop.permute.xlu1 %1134 }
  0xc9   : > { %5348 = vst [vmem:[#allocation11_spill] sm:$0xff] %v3083_v55 }
  0xcc   : > { %v3141_v10 = vpop.permute.xlu0 %1410 }
  0xcd   : > { %v3089_v58 = vpop.permute.xlu1 %1175  ;;  %5357 = vst [vmem:[#allocation20_spill] sm:$0xff] %v3141_v10 }
  0xd1   : > { %v3158_v13 = vpop.permute.xlu0 %1438 }
  0xd2   : > { %v3098_v61 = vpop.permute.xlu1 %1220 }
  0xd6   : > { %v3103_v62 = vpop.permute.xlu1 %1224  ;;  %v3170_v45 = vpop.permute.xlu0 %1458 }
  0xd7   : > { %5351 = vst [vmem:[#allocation14_spill] sm:$0xff] %v3103_v62  ;;  %5360 = vst [vmem:[#allocation23_spill] sm:$0xff] %v3170_v45 }
  0xdb   : > { %v3111_v43 = vpop.permute.xlu1 %1256  ;;  %v3176_v14 = vpop.permute.xlu0 %1486 }
  0xdc   : > { %5352 = vst [vmem:[#allocation15_spill] sm:$0xff] %v3111_v43  ;;  %5361 = vst [vmem:[#allocation24_spill] sm:$0xff] %v3176_v14 }
  0xe0   : > { %v3117_v1 = vpop.permute.xlu1 %1284  ;;  %v3188_v16 = vpop.permute.xlu0 %1535 }
  0xe1   : > { %5364 = vst [vmem:[#allocation27_spill] sm:$0xff] %v3188_v16 }
  0xe5   : > { %v3124_v5 = vpop.permute.xlu1 %1316  ;;  %v3198_v56 = vpop.permute.xlu0 %1576 }
  0xe6   : > { %5366 = vst [vmem:[#allocation29_spill] sm:$0xff] %v3198_v56 }
  0xea   : > { %v3208_v18 = vpop.permute.xlu0 %1612 }
  0xeb   : > { %5368 = vst [vmem:[#allocation31_spill] sm:$0xff] %v3208_v18  ;;  %v5395_v18 = vmov 0  }
 0x183   : > { %v482_v26 = vpop.f32.mrb[0].mxu1 }
 0x184   : > { %v484_v28 = vpop.f32.mrb[1].mxu1  ;;  %v3049_v31 = vadd.f32 %v482_v26, %v389_v22 }
 0x185   : > { %v3091_v60 = vadd.f32 %v484_v28, %v389_v22 }
 0x186   : > { %5344 = vst [vmem:[#allocation7_spill] sm:$0xff] %v3049_v31 }
 0x187   : > { %v488_v30 = vpop.f32.mrb[2].mxu1  ;;  %5350 = vst [vmem:[#allocation13_spill] sm:$0xff] %v3091_v60 }
 0x188   : > { %v3051_v32 = vadd.f32 %v488_v30, %v393_v29  ;;  %v490_v33 = vpop.f32.mrb[3].mxu1 }
 0x18a   : > { %5345 = vst [vmem:[#allocation8_spill] sm:$0xff] %v3051_v32  ;;  %v2565_v36 = vpack.i.bf16 %v3051_v32, %v3049_v31 }
 0x18b   : > { %v3057_v37 = vpop.f32.mrb[4].mxu1 }
 0x18c   : > { %v3059_v38 = vpop.f32.mrb[5].mxu1  ;;  %2566 = vrot.lane.b32.xlu0 %v2565_v36, %s5101_s19  ;;  %2561 = vrot.lane.b32.xlu1 %v2565_v36, %s5209_s20  ;;  %v3145_v12 = vadd.f32 %v3057_v37, %v3105_v41 }
 0x18d   : > { %v3214_v19 = vadd.f32 %v3059_v38, %v3105_v41  ;;  %v5381_v41 = vmov 0 }
 0x18e   : > { %5358 = vst [vmem:[#allocation21_spill] sm:$0xff] %v3145_v12 }
 0x18f   : > { %v3065_v46 = vpop.f32.mrb[6].mxu1  ;;  %5369 = vst [vmem:[#allocation32_spill] sm:$0xff] %v3214_v19 }
 0x190   : > { %v3067_v47 = vpop.f32.mrb[7].mxu1  ;;  %2571 = vrot.lane.b32.xlu0 %v2565_v36, %s5208_s28  ;;  %1721 = vperm.xlu1 %2602, %v2936_v27   ;;  %v3230_v22 = vadd.f32 %v3065_v46, %v3047_v25 }
 0x192   : > { %5372 = vst [vmem:[#allocation35_spill] sm:$0xff] %v3230_v22 }
 0x194   : > { %2576 = vrot.lane.b32.xlu0 %v2565_v36, %s5200_s29  ;;  %2603 = vset.pattern.permute.xlu1 %v2767_v49 }
 0x195   : > { %1762 = vperm.xlu1 %2603, %v2930_v24  }
 0x198   : > { %2581 = vrot.lane.b32.xlu0 %v2565_v36, %s5199_s9 }
 0x199   : > { %2606 = vset.pattern.permute.xlu1 %v2749_v51 }
 0x19a   : > { %781 = vperm.xlu1 %2606, %v2889_v3   ;;  %v3087_v3 = vadd.f32 %v490_v33, %v393_v29 }
 0x19c   : > { %2586 = vrot.lane.b32.xlu0 %v2565_v36, %s5181_s10  ;;  %5349 = vst [vmem:[#allocation12_spill] sm:$0xff] %v3087_v3  ;;  %v2611_v40 = vpack.i.bf16 %v3087_v3, %v3091_v60 }
 0x19e   : > { %2607 = vset.pattern.permute.xlu1 %v2770_v54 }
 0x19f   : > { %1807 = vperm.xlu1 %2607, %v2930_v24  }
 0x1a0   : > { %2591 = vrot.lane.b32.xlu0 %v2565_v36, %s5107_s11 }
 0x1a3   : > { %2609 = vset.pattern.permute.xlu1 %v2772_v57  ;;  %v3286_v57 = vld [vmem:[%s5095_s5 + $0x1] ss:$2 sm:$0x3] }
 0x1a4   : > { %2596 = vrot.lane.b32.xlu0 %v2565_v36, %s5121_s12  ;;  %1852 = vperm.xlu1 %2609, %v2930_v24   ;;  %vm526_vm4 = vcmp.ge.s32.totalorder %v3286_v57, 1  ;;  %vm527_vm5 = vcmp.lt.s32.totalorder %v3286_v57, 17  ;;  %vm529_vm6 = vcmp.ge.s32.totalorder %v3286_v57, 0  ;;  %vm530_vm7 = vcmp.lt.s32.totalorder %v3286_v57, 16 }
 0x1a5   : > { %vm3308_vm9 = vmand %vm526_vm4, %vm527_vm5  ;;  %vm532_vm12 = vcmp.ge.s32.totalorder %v3286_v57, 4294967295  ;;  %vm533_vm13 = vcmp.lt.s32.totalorder %v3286_v57, 15 }
 0x1a6   : > { %vm3314_vm10 = vmand %vm529_vm6, %vm530_vm7 }
 0x1a7   : > { %v5388_v39 = vsel %vm3314_vm10, 4294967295, %v5387_v39  ;;  %vm3342_vm15 = vmand %vm532_vm12, %vm533_vm13 }
 0x1a8   : > { %1676 = vperm.xlu0 %2600, %v2936_v27   ;;  %1856 = vperm.xlu1 %2609, %v2936_v27   ;;  %5389 = vst [vmem:[#allocation43_spill] sm:$0xff] %v5388_v39 }
 0x1ac   : > { %2601 = vset.pattern.permute.xlu0 %v2762_v21  ;;  %2612 = vrot.lane.b32.xlu1 %v2611_v40, %s5209_s20  ;;  %v3222_v21 = vpop.permute.xlu0 %1640 }
 0x1ad   : > { %1717 = vperm.xlu0 %2601, %v2930_v24   ;;  %2631 = vset.pattern.permute.xlu1 %v2774_v42  ;;  %5371 = vst [vmem:[#allocation34_spill] sm:$0xff] %v3222_v21 }
 0x1b0   : > { %2617 = vrot.lane.b32.xlu1 %v2611_v40, %s5101_s19 }
 0x1b1   : > { %2604 = vset.pattern.permute.xlu0 %v2767_v49  ;;  %v3277_v49 = vld [vmem:[%s5095_s5] ss:$2 sm:$0x3] }
 0x1b2   : > { %1766 = vperm.xlu0 %2604, %v2936_v27   ;;  %vm511_vm2 = vcmp.ge.s32.totalorder %v3277_v49, 1  ;;  %vm512_vm3 = vcmp.lt.s32.totalorder %v3277_v49, 17  ;;  %vm518_vm0 = vcmp.lt.s32.totalorder %v3277_v49, 15 }
 0x1b3   : > { %vm3302_vm8 = vmand %vm511_vm2, %vm512_vm3  ;;  %vm514_vm2 = vcmp.ge.s32.totalorder %v3277_v49, 0  ;;  %vm515_vm3 = vcmp.lt.s32.totalorder %v3277_v49, 16 }
 0x1b4   : > { %2622 = vrot.lane.b32.xlu1 %v2611_v40, %s5208_s28  ;;  %v5382_v41 = vsel %vm3302_vm8, 4294967295, %v5381_v41  ;;  %vm553_vm11 = vmand %vm3302_vm8, %vm3308_vm9 }
 0x1b5   : > { %vm582_vm14 = vmand %vm3302_vm8, %vm3314_vm10 }
 0x1b6   : > { %2605 = vset.pattern.permute.xlu0 %v2749_v51  ;;  %v2775_v51 = vmov 24   ;;  %v583_v16 = vsel %vm582_vm14, 1, %v5395_v18  ;;  %vm611_vm4 = vmand %vm3302_vm8, %vm3342_vm15 }
 0x1b7   : > { %1179 = vperm.xlu0 %2605, %v2936_v27   ;;  %vm3367_vm5 = vmand %vm514_vm2, %vm515_vm3 }
 0x1b8   : > { %2627 = vrot.lane.b32.xlu1 %v2611_v40, %s5200_s29  ;;  %vm640_vm7 = vmand %vm3367_vm5, %vm3308_vm9 }
 0x1bb   : > { %777 = vperm.xlu0 %2605, %v2880_v0   ;;  %v3131_v0 = vpop.permute.xlu1 %1320 }
 0x1bc   : > { %1901 = vperm.xlu1 %2631, %v2936_v27   ;;  %5355 = vst [vmem:[#allocation18_spill] sm:$0xff] %v3131_v0 }
 0x1bf   : > { %2608 = vset.pattern.permute.xlu0 %v2770_v54  ;;  %v3139_v9 = vpop.permute.xlu1 %1365 }
 0x1c0   : > { %1811 = vperm.xlu0 %2608, %v2936_v27   ;;  %2633 = vrot.lane.b32.xlu1 %v2611_v40, %s5199_s9  ;;  %5356 = vst [vmem:[#allocation19_spill] sm:$0xff] %v3139_v9 }
 0x1c1   : > { %2652 = vset.pattern.permute.xlu1 %v2775_v51 }
 0x1c4   : > { %2610 = vset.pattern.permute.xlu0 %v2774_v42  ;;  %2638 = vrot.lane.b32.xlu1 %v2611_v40, %s5181_s10  ;;  %v546_v42 = vlaneseq }
 0x1c5   : > { %1897 = vperm.xlu0 %2610, %v2930_v24  }
 0x1c6   : > { %v556_v35 = vshrl.u32 %v546_v42, 7 }
 0x1c8   : > { %2643 = vrot.lane.b32.xlu1 %v2611_v40, %s5107_s11 }
 0x1c9   : > { %2653 = vset.pattern.permute.xlu0 %v2775_v51 }
 0x1ca   : > { %1946 = vperm.xlu0 %2653, %v2936_v27   ;;  %v773_v27 = vld [vmem:[%s5093_s3 + $0x8] sm:$0xff] }
 0x1cb   : > { %2339 = vmatprep.mubr.msk.f32.mxu1 %vm5158_vm1, %v773_v27  ;;  %v5383_v27 = vmov 0 }
 0x1cc   : > { %2648 = vrot.lane.b32.xlu1 %v2611_v40, %s5121_s12  ;;  %v5384_v27 = vsel %vm3308_vm9, 4294967295, %v5383_v27 }
 0x1cd   : > { %5385 = vst [vmem:[#allocation41_spill] sm:$0xff] %v5384_v27 }
 0x1ce   : > { %2654 = vset.pattern.permute.xlu0 %v2754_v7 }
 0x1cf   : > { %1252 = vperm.xlu0 %2654, %v2930_v24  }
 0x1d0   : > { %1942 = vperm.xlu1 %2652, %v2930_v24   ;;  %v3156_v24 = vpop.permute.xlu1 %1406 }
 0x1d3   : > { %1010 = vrot.lane.b32.xlu0 %v3145_v12, %s5113_s13 }
 0x1d4   : > { %963 = vrot.lane.b32.xlu1 %v3145_v12, %s5109_s16 }
 0x1d5   : > { %2655 = vset.pattern.permute.xlu1 %v2754_v7  ;;  %v3168_v7 = vpop.permute.xlu1 %1442 }
 0x1d6   : > { %5359 = vst [vmem:[#allocation22_spill] sm:$0xff] %v3168_v7 }
 0x1d7   : > { %1100 = vrot.lane.b32.xlu0 %v3145_v12, %s5114_s17 }
 0x1d8   : > { %1055 = vrot.lane.b32.xlu1 %v3145_v12, %s5111_s18 }
 0x1d9   : > { %v3178_v48 = vpop.permute.xlu1 %1454 }
 0x1da   : > { %5362 = vst [vmem:[#allocation25_spill] sm:$0xff] %v3178_v48 }
 0x1db   : > { %1145 = vrot.lane.b32.xlu0 %v3145_v12, %s5097_s14  ;;  %s5201_s14 = smov 14  }
 0x1dc   : > { %1190 = vrot.lane.b32.xlu1 %v3145_v12, %s5099_s15  ;;  %s5103_s15 = smov 2  }
 0x1dd   : > { %v3184_v15 = vpop.permute.xlu1 %1490 }
 0x1de   : > { %5363 = vst [vmem:[#allocation26_spill] sm:$0xff] %v3184_v15  ;;  %v3352_v15 = vand.u32 127, %v546_v42 }
 0x1df   : > { %1235 = vrot.lane.b32.xlu0 %v3145_v12, %s5209_s20 }
 0x1e0   : > { %1267 = vrot.lane.b32.xlu1 %v3145_v12, %s5101_s19  ;;  %s5105_s19 = smov 126   ;;  %vm5157_vm6 = vcmp.lt.s32.totalorder %v3352_v15, 17 }
 0x1e1   : > { %v3196_v53 = vpop.permute.xlu1 %1531 }
 0x1e2   : > { %5365 = vst [vmem:[#allocation28_spill] sm:$0xff] %v3196_v53 }
 0x1e3   : > { %1299 = vrot.lane.b32.xlu0 %v3145_v12, %s5208_s28 }
 0x1e4   : > { %1331 = vrot.lane.b32.xlu1 %v3145_v12, %s5201_s14 }
 0x1e5   : > { %v3204_v17 = vpop.permute.xlu1 %1580 }
 0x1e6   : > { %5367 = vst [vmem:[#allocation30_spill] sm:$0xff] %v3204_v17  ;;  %v554_v17 = vsel %vm553_vm11, 1, %v5395_v18  ;;  %vm5160_vm11 = vcmp.lt.s32.totalorder %v3352_v15, 16 }
 0x1e7   : > { %1376 = vrot.lane.b32.xlu0 %v3145_v12, %s5103_s15  ;;  %s5186_s15 = smov 114  }
 0x1e8   : > { %1421 = vrot.lane.b32.xlu1 %v3145_v12, %s5200_s29 }
 0x1e9   : > { %v3220_v20 = vpop.permute.xlu1 %1608 }
 0x1ea   : > { %5370 = vst [vmem:[#allocation33_spill] sm:$0xff] %v3220_v20 }
 0x1eb   : > { %1501 = vrot.lane.b32.xlu0 %v3145_v12, %s5105_s19  ;;  %s5119_s19 = smov 110  }
 0x1ec   : > { %1469 = vrot.lane.b32.xlu1 %v3145_v12, %s5199_s9 }
 0x1ed   : > { %v3232_v26 = vpop.permute.xlu1 %1644 }
 0x1ee   : > { %5373 = vst [vmem:[#allocation36_spill] sm:$0xff] %v3232_v26  ;;  %v5392_v26 = vmov 0 }
 0x1ef   : > { %1591 = vrot.lane.b32.xlu0 %v3145_v12, %s5181_s10  ;;  %v5393_v26 = vsel %vm3342_vm15, 4294967295, %v5392_v26 }
 0x1f0   : > { %1546 = vrot.lane.b32.xlu1 %v3145_v12, %s5186_s15  ;;  %5394 = vst [vmem:[#allocation45_spill] sm:$0xff] %v5393_v26 }
 0x1f1   : > { %v3244_v29 = vpop.permute.xlu1 %1672 }
 0x1f2   : > { %5374 = vst [vmem:[#allocation37_spill] sm:$0xff] %v3244_v29 }
 0x1f3   : > { %1623 = vrot.lane.b32.xlu0 %v3145_v12, %s5107_s11  ;;  %s5117_s11 = smov 98  }
 0x1f4   : > { %1687 = vrot.lane.b32.xlu1 %v3145_v12, %s5119_s19  ;;  %s5390_s19 = smov 2  }
 0x1f7   : > { %1655 = vrot.lane.b32.xlu0 %v3145_v12, %s5121_s12  ;;  %s5436_s12 = smov 112  }
 0x1f8   : > { %967 = vrot.lane.b32.xlu1 %v3214_v19, %s5109_s16  ;;  %s5115_s16 = smov 97  }
 0x1fb   : > { %1732 = vrot.lane.b32.xlu0 %v3145_v12, %s5117_s11  ;;  %s5407_s11 = smov 126  }
 0x1fc   : > { %1059 = vrot.lane.b32.xlu1 %v3214_v19, %s5111_s18  ;;  %s5375_s18 = smov 30  }
 0x1fe   : > { %v3234_v28 = vpop.permute.xlu0 %2566  ;;  %v3252_v33 = vpop.permute.xlu1 %2561 }
 0x1ff   : > { %1777 = vrot.lane.b32.xlu0 %v3145_v12, %s5115_s16  ;;  %v2564_v43 = vunpack.i.h.bf16 %v3252_v33  ;;  %v2563_v34 = vunpack.i.l.bf16 %v3252_v33  ;;  %v641_v33 = vsel %vm640_vm7, 1, %v5395_v18  ;;  %s5443_s16 = smov 111  }
 0x200   : > { %1012 = vrot.lane.b32.xlu1 %v3230_v22, %s5113_s13 }
 0x202   : > { %v3246_v30 = vpop.permute.xlu0 %2571 }
 0x203   : > { %1014 = vrot.lane.b32.xlu0 %v3214_v19, %s5113_s13  ;;  %s5376_s13 = smov 18  }
 0x204   : > { %1102 = vrot.lane.b32.xlu1 %v3230_v22, %s5114_s17 }
 0x206   : > { %v3254_v36 = vpop.permute.xlu0 %2576 }
 0x207   : > { %1104 = vrot.lane.b32.xlu0 %v3214_v19, %s5114_s17  ;;  %s5378_s17 = smov 16  }
 0x208   : > { %1147 = vrot.lane.b32.xlu1 %v3230_v22, %s5375_s18 }
 0x20a   : > { %v3266_v38 = vpop.permute.xlu0 %2581 }
 0x20b   : > { %1149 = vrot.lane.b32.xlu0 %v3214_v19, %s5375_s18 }
 0x20c   : > { %1192 = vrot.lane.b32.xlu1 %v3230_v22, %s5376_s13 }
 0x20e   : > { %v3279_v54 = vpop.permute.xlu0 %2586 }
 0x20f   : > { %1194 = vrot.lane.b32.xlu0 %v3214_v19, %s5376_s13  ;;  %v3262_v37 = vpop.permute.xlu1 %1721 }
 0x210   : > { %5377 = vst [vmem:[#allocation38_spill] sm:$0xff] %v3262_v37  ;;  %1237 = vrot.lane.b32.xlu1 %v3230_v22, %s5209_s20  ;;  %v3340_v37 = vsub.s32 1, %v556_v35 }
 0x212   : > { %v3306_v51 = vpop.permute.xlu0 %2591  ;;  %v562_v10 = vrot.slane %v554_v17, %v3340_v37  ;;  %v591_v45 = vrot.slane %v583_v16, %v3340_v37 }
 0x213   : > { %1239 = vrot.lane.b32.xlu0 %v3214_v19, %s5209_s20  ;;  %s5498_s20 = smov 15  }
 0x214   : > { %1269 = vrot.lane.b32.xlu1 %v3230_v22, %s5378_s17  ;;  %v3272_v46 = vpop.permute.xlu1 %1762  ;;  %vm3383_vm12 = vcmp.eq.s32.totalorder %v562_v10, 1  ;;  %vm3391_vm14 = vcmp.eq.s32.totalorder %v591_v45, 1 }
 0x215   : > { %5379 = vst [vmem:[#allocation39_spill] sm:$0xff] %v3272_v46  ;;  %v5405_v6 = vsel %vm3391_vm14, 4294967295, %v5404_v6  ;;  %vm2365_vm3 = vmpackc.low %vm3383_vm12, %vm3383_vm12 }
 0x216   : > { %v3332_v59 = vpop.permute.xlu0 %2596  ;;  %5406 = vst [vmem:[#allocation48_spill] sm:$0xff] %v5405_v6  ;;  %vm2371_vm1 = vmpackc.low %vm3391_vm14, %vm3391_vm14 }
 0x217   : > { %1271 = vrot.lane.b32.xlu0 %v3214_v19, %s5378_s17 }
 0x218   : > { %1301 = vrot.lane.b32.xlu1 %v3230_v22, %s5208_s28 }
 0x219   : > { %v3290_v40 = vpop.permute.xlu1 %781 }
 0x21a   : > { %5380 = vst [vmem:[#allocation40_spill] sm:$0xff] %v3290_v40  ;;  %v3338_v40 = vsub.s32 0, %v556_v35 }
 0x21b   : > { %1303 = vrot.lane.b32.xlu0 %v3214_v19, %s5208_s28  ;;  %s5495_s28 = smov 31  }
 0x21c   : > { %1333 = vrot.lane.b32.xlu1 %v3230_v22, %s5201_s14  ;;  %v558_v9 = vrot.slane %v554_v17, %v3338_v40  ;;  %v587_v0 = vrot.slane %v583_v16, %v3338_v40  ;;  %v5402_v16 = vmov 0 }
 0x21e   : > { %v3312_v11 = vpop.permute.xlu1 %1807  ;;  %vm3387_vm13 = vcmp.eq.s32.totalorder %v558_v9, 1  ;;  %vm3401_vm2 = vcmp.eq.s32.totalorder %v587_v0, 1  ;;  %v5409_v9 = vmov 0 }
 0x21f   : > { %5386 = vst [vmem:[#allocation42_spill] sm:$0xff] %v3312_v11  ;;  %1335 = vrot.lane.b32.xlu0 %v3214_v19, %s5201_s14  ;;  %v5403_v16 = vsel %vm3387_vm13, 4294967295, %v5402_v16  ;;  %v5410_v9 = vsel %vm3401_vm2, 4294967295, %v5409_v9  ;;  %s5488_s14 = smov 33  }
 0x220   : > { %1378 = vrot.lane.b32.xlu1 %v3230_v22, %s5390_s19  ;;  %5411 = vst [vmem:[#allocation50_spill] sm:$0xff] %v5410_v9 }
 0x223   : > { %1380 = vrot.lane.b32.xlu0 %v3214_v19, %s5390_s19  ;;  %v3336_v2 = vpop.permute.xlu1 %1852 }
 0x224   : > { %5391 = vst [vmem:[#allocation44_spill] sm:$0xff] %v3336_v2  ;;  %1423 = vrot.lane.b32.xlu1 %v3230_v22, %s5200_s29 }
 0x227   : > { %1425 = vrot.lane.b32.xlu0 %v3214_v19, %s5200_s29  ;;  %v3360_v35 = vpop.permute.xlu1 %1856  ;;  %v3362_v7 = vpop.permute.xlu0 %1676  ;;  %s5481_s29 = smov 34  }
 0x228   : > { %5396 = vst [vmem:[#allocation46_spill] sm:$0xff] %v3360_v35  ;;  %5397 = vst [vmem:[#allocation47_spill] sm:$0xff] %v3362_v7  ;;  %1471 = vrot.lane.b32.xlu1 %v3230_v22, %s5199_s9  ;;  %v612_v35 = vsel %vm611_vm4, 1, %v5395_v18  ;;  %v5400_v7 = vmov 0 }
 0x229   : > { %v5401_v7 = vsel %vm3383_vm12, 4294967295, %v5400_v7  ;;  %v616_v45 = vrot.slane %v612_v35, %v3338_v40  ;;  %v620_v11 = vrot.slane %v612_v35, %v3340_v37  ;;  %vm2368_vm4 = vmpackc.low %vm3387_vm13, %vm3387_vm13  ;;  %vm5426_vm13 = vcmp.lt.s32.totalorder %v3352_v15, 15 }
 0x22b   : > { %1473 = vrot.lane.b32.xlu0 %v3214_v19, %s5199_s9  ;;  %v2613_v17 = vpop.permute.xlu1 %2612  ;;  %vm3441_vm7 = vcmp.eq.s32.totalorder %v620_v11, 1  ;;  %s5473_s9 = smov 97  }
 0x22c   : > { %v2615_v63 = vunpack.i.h.bf16 %v2613_v17  ;;  %v2614_v2 = vunpack.i.l.bf16 %v2613_v17  ;;  %1503 = vrot.lane.b32.xlu1 %v3230_v22, %s5407_s11  ;;  %v3399_v10 = vpop.permute.xlu0 %1717 }
 0x22d   : > { %5408 = vst [vmem:[#allocation49_spill] sm:$0xff] %v3399_v10 }
 0x22e   : > { %v549_v17 = vsel %vm5157_vm6, %v2563_v34, %v2614_v2  ;;  %v550_v0 = vsel %vm5157_vm6, %v2564_v43, %v2615_v63  ;;  %v551_v46 = vsel %vm5157_vm6, %v2614_v2, %v2563_v34  ;;  %v552_v10 = vsel %vm5157_vm6, %v2615_v63, %v2564_v43 }
 0x22f   : > { %v2367_v35 = vpack.c.bf16 %v552_v10, %v551_v46  ;;  %1505 = vrot.lane.b32.xlu0 %v3214_v19, %s5407_s11  ;;  %v2618_v29 = vpop.permute.xlu1 %2617  ;;  %v2364_v21 = vpack.c.bf16 %v550_v0, %v549_v17  ;;  %v2569_v2 = vunpack.i.h.bf16 %v3234_v28  ;;  %v2568_v34 = vunpack.i.l.bf16 %v3234_v28 }
 0x230   : > { %v2620_v43 = vunpack.i.h.bf16 %v2618_v29  ;;  %v2619_v63 = vunpack.i.l.bf16 %v2618_v29  ;;  %1548 = vrot.lane.b32.xlu1 %v3230_v22, %s5186_s15  ;;  %v5413_v10 = vmov 0  ;;  %v649_v28 = vrot.slane %v641_v33, %v3340_v37 }
 0x231   : > { %2366 = vmatprep.subr.msk.bf16.mxu1 %vm2365_vm3, %v2364_v21  ;;  %v3439_v46 = vpop.permute.xlu0 %1766  ;;  %v5414_v10 = vsel %vm3441_vm7, 4294967295, %v5413_v10  ;;  %vm3464_vm6 = vcmp.eq.s32.totalorder %v616_v45, 1  ;;  %vm5427_vm3 = vmmov %vm5426_vm13 }
 0x232   : > { %5412 = vst [vmem:[#allocation51_spill] sm:$0xff] %v3439_v46  ;;  %5415 = vst [vmem:[#allocation52_spill] sm:$0xff] %v5414_v10  ;;  %v579_v29 = vsel %vm5160_vm11, %v2569_v2, %v2620_v43  ;;  %v581_v21 = vsel %vm5160_vm11, %v2620_v43, %v2569_v2  ;;  %v578_v17 = vsel %vm5160_vm11, %v2568_v34, %v2619_v63  ;;  %2369 = vmatpush1.bf16.msk.msra.mxu1 %vm2368_vm4, %v2367_v35  ;;  %v5416_v46 = vmov 0 }
 0x233   : > { %v580_v0 = vsel %vm5160_vm11, %v2619_v63, %v2568_v34  ;;  %1550 = vrot.lane.b32.xlu0 %v3214_v19, %s5186_s15  ;;  %v2623_v2 = vpop.permute.xlu1 %2622  ;;  %v2370_v43 = vpack.c.bf16 %v579_v29, %v578_v17  ;;  %v5417_v46 = vsel %vm3464_vm6, 4294967295, %v5416_v46  ;;  %v645_v34 = vrot.slane %v641_v33, %v3338_v40  ;;  %vm5428_vm8 = vmmov %vm5427_vm3  ;;  %s5460_s15 = smov 98  }
 0x234   : > { %v2373_v11 = vpack.c.bf16 %v581_v21, %v580_v0  ;;  %5418 = vst [vmem:[#allocation53_spill] sm:$0xff] %v5417_v46  ;;  %vm5419_vm4 = vcmp.ge.s32.totalorder %v3277_v49, 4294967295  ;;  %v5420_v35 = vmov 0  ;;  %v2574_v63 = vunpack.i.h.bf16 %v3246_v30  ;;  %1593 = vrot.lane.b32.xlu1 %v3230_v22, %s5181_s10 }
 0x235   : > { %vm3473_vm11 = vmand %vm5419_vm4, %vm518_vm0  ;;  %v2573_v21 = vunpack.i.l.bf16 %v3246_v30  ;;  %v2625_v0 = vunpack.i.h.bf16 %v2623_v2  ;;  %v2624_v29 = vunpack.i.l.bf16 %v2623_v2  ;;  %2372 = vmatprep.subr.msk.bf16.mxu1 %vm2371_vm1, %v2370_v43  ;;  %vm3494_vm12 = vcmp.eq.s32.totalorder %v649_v28, 1 }
 0x236   : > { %v5421_v35 = vsel %vm3473_vm11, 4294967295, %v5420_v35  ;;  %vm2377_vm4 = vmpackc.low %vm3441_vm7, %vm3441_vm7  ;;  %v5423_v30 = vmov 0  ;;  %v3511_v28 = vpop.permute.xlu0 %1179 }
 0x237   : > { %5422 = vst [vmem:[#allocation54_spill] sm:$0xff] %v5421_v35  ;;  %v5424_v30 = vsel %vm3494_vm12, 4294967295, %v5423_v30  ;;  %v608_v45 = vsel %vm5426_vm13, %v2574_v63, %v2625_v0  ;;  %v610_v33 = vsel %vm5427_vm3, %v2625_v0, %v2574_v63  ;;  %v607_v17 = vsel %vm5428_vm8, %v2573_v21, %v2624_v29  ;;  %vm5429_vm1 = vmmov %vm5427_vm3  ;;  %1595 = vrot.lane.b32.xlu0 %v3214_v19, %s5181_s10  ;;  %v2628_v63 = vpop.permute.xlu1 %2627  ;;  %s5452_s10 = smov 110  }
 0x238   : > { %5425 = vst [vmem:[#allocation55_spill] sm:$0xff] %v5424_v30  ;;  %v609_v2 = vsel %vm5429_vm1, %v2624_v29, %v2573_v21  ;;  %vm5430_vm0 = vmpackc.low %vm3401_vm2, %vm3401_vm2  ;;  %v2376_v0 = vpack.c.bf16 %v608_v45, %v607_v17  ;;  %vm3522_vm3 = vcmp.eq.s32.totalorder %v645_v34, 1  ;;  %v5432_v21 = vmov 0  ;;  %1625 = vrot.lane.b32.xlu1 %v3230_v22, %s5436_s12 }
 0x239   : > { %2375 = vmatpush1.bf16.msk.msra.mxu1 %vm5430_vm0, %v2373_v11  ;;  %5431 = vst [vmem:[#allocation56_spill] sm:$0xff] %v3511_v28  ;;  %vm698_vm13 = vmand %vm3473_vm11, %vm3308_vm9  ;;  %v2379_v43 = vpack.c.bf16 %v610_v33, %v609_v2  ;;  %v5433_v21 = vsel %vm3522_vm3, 4294967295, %v5432_v21  ;;  %v2579_v29 = vunpack.i.h.bf16 %v3254_v36  ;;  %v2578_v33 = vunpack.i.l.bf16 %v3254_v36 }
 0x23a   : > { %vm2380_vm8 = vmpackc.low %vm3464_vm6, %vm3464_vm6  ;;  %5434 = vst [vmem:[#allocation57_spill] sm:$0xff] %v5433_v21  ;;  %v2630_v45 = vunpack.i.h.bf16 %v2628_v63  ;;  %v2629_v17 = vunpack.i.l.bf16 %v2628_v63  ;;  %2378 = vmatprep.subr.msk.bf16.mxu1 %vm2377_vm4, %v2376_v0  ;;  %v699_v36 = vsel %vm698_vm13, 1, %v5395_v18  ;;  %v3558_v28 = vpop.permute.xlu0 %777  ;;  %vm5185_vm13 = vcmp.lt.s32.totalorder %v3352_v15, 127 }
 0x23b   : > { %vm5435_vm0 = vmand %vm3367_vm5, %vm3342_vm15  ;;  %5441 = vst [vmem:[#allocation58_spill] sm:$0xff] %v3558_v28  ;;  %1627 = vrot.lane.b32.xlu0 %v3214_v19, %s5436_s12  ;;  %v3565_v56 = vpop.permute.xlu1 %1901  ;;  %v5529_v35 = vmov 0 }
 0x23c   : > { %v670_v11 = vsel %vm5435_vm0, 1, %v5395_v18  ;;  %vm5437_vm0 = vcmp.lt.s32.totalorder %v3352_v15, 1  ;;  %vm2386_vm1 = vmpackc.low %vm3522_vm3, %vm3522_vm3  ;;  %5442 = vst [vmem:[#allocation59_spill] sm:$0xff] %v3565_v56  ;;  %1657 = vrot.lane.b32.xlu1 %v3230_v22, %s5443_s16 }
 0x23d   : > { %v637_v34 = vsel %vm5437_vm0, %v2579_v29, %v2630_v45  ;;  %vm5438_vm6 = vmmov %vm5437_vm0  ;;  %2381 = vmatpush1.bf16.msk.msra.mxu1 %vm2380_vm8, %v2379_v43  ;;  %v678_v53 = vrot.slane %v670_v11, %v3340_v37  ;;  %v2388_v43 = vpack.c.bf16 %v3087_v3, %v3091_v60  ;;  %v2583_v3 = vunpack.i.l.bf16 %v3266_v38 }
 0x23e   : > { %v639_v2 = vsel %vm5438_vm6, %v2630_v45, %v2579_v29  ;;  %vm5439_vm7 = vmmov %vm5437_vm0  ;;  %v674_v45 = vrot.slane %v670_v11, %v3338_v40  ;;  %v2390_v11 = vpack.c.bf16 %v3051_v32, %v3049_v31 }
 0x23f   : > { %v636_v63 = vsel %vm5439_vm7, %v2578_v33, %v2629_v17  ;;  %vm5440_vm4 = vmmov %vm5437_vm0  ;;  %1659 = vrot.lane.b32.xlu0 %v3214_v19, %s5443_s16  ;;  %vm3591_vm8 = vcmp.eq.s32.totalorder %v678_v53, 1  ;;  %v5453_v53 = vmov 0 }
 0x240   : > { %v638_v0 = vsel %vm5440_vm4, %v2629_v17, %v2578_v33  ;;  %v2382_v29 = vpack.c.bf16 %v637_v34, %v636_v63  ;;  %vm727_vm6 = vmand %vm3473_vm11, %vm3314_vm10  ;;  %v707_v33 = vrot.slane %v699_v36, %v3340_v37  ;;  %v2634_v34 = vpop.permute.xlu1 %2633  ;;  %v5446_v63 = vmov 0  ;;  %1689 = vrot.lane.b32.xlu1 %v3230_v22, %s5452_s10 }
 0x241   : > { %v2385_v20 = vpack.c.bf16 %v639_v2, %v638_v0  ;;  %vm5444_vm7 = vmpackc.low %vm3494_vm12, %vm3494_vm12  ;;  %v728_v17 = vsel %vm727_vm6, 1, %v5395_v18  ;;  %v3589_v2 = vpop.permute.xlu0 %1811  ;;  %v5447_v63 = vsel %vm3591_vm8, 4294967295, %v5446_v63  ;;  %vm3595_vm0 = vcmp.eq.s32.totalorder %v674_v45, 1 }
 0x242   : > { %2384 = vmatprep.subr.msk.bf16.mxu1 %vm5444_vm7, %v2382_v29  ;;  %5445 = vst [vmem:[#allocation60_spill] sm:$0xff] %v3589_v2  ;;  %5448 = vst [vmem:[#allocation61_spill] sm:$0xff] %v5447_v63  ;;  %v703_v0 = vrot.slane %v699_v36, %v3338_v40  ;;  %v2584_v29 = vunpack.i.h.bf16 %v3266_v38  ;;  %v2636_v32 = vunpack.i.h.bf16 %v2634_v34  ;;  %v2635_v60 = vunpack.i.l.bf16 %v2634_v34 }
 0x243   : > { %2387 = vmatpush1.bf16.msk.msra.mxu1 %vm2386_vm1, %v2385_v20  ;;  %v5449_v20 = vmov 0  ;;  %vm3609_vm6 = vcmp.eq.s32.totalorder %v707_v33, 1  ;;  %v732_v36 = vrot.slane %v728_v17, %v3338_v40  ;;  %v736_v38 = vrot.slane %v728_v17, %v3340_v37  ;;  %vm2393_vm7 = vmpackc.low %vm3591_vm8, %vm3591_vm8  ;;  %1691 = vrot.lane.b32.xlu0 %v3214_v19, %s5452_s10 }
 0x244   : > { %2389 = vmatprep.subr.bf16.mxu1 %v2388_v43  ;;  %v5450_v20 = vsel %vm3595_vm0, 4294967295, %v5449_v20  ;;  %v5454_v53 = vsel %vm3609_vm6, 4294967295, %v5453_v53  ;;  %v666_v45 = vsel %vm5185_vm13, %v2584_v29, %v2636_v32  ;;  %v668_v43 = vsel %vm5185_vm13, %v2636_v32, %v2584_v29  ;;  %v2639_v17 = vpop.permute.xlu1 %2638  ;;  %1734 = vrot.lane.b32.xlu1 %v3230_v22, %s5460_s15  ;;  %vm5472_vm4 = vmpackc.low %vm3595_vm0, %vm3595_vm0 }
 0x245   : > { %5451 = vst [vmem:[#allocation62_spill] sm:$0xff] %v5450_v20  ;;  %5455 = vst [vmem:[#allocation63_spill] sm:$0xff] %v5454_v53  ;;  %v665_v34 = vsel %vm5185_vm13, %v2583_v3, %v2635_v60  ;;  %v667_v31 = vsel %vm5185_vm13, %v2635_v60, %v2583_v3  ;;  %vm3631_vm1 = vcmp.eq.s32.totalorder %v703_v0, 1  ;;  %v5456_v32 = vmov 0  ;;  %v3645_v0 = vpop.permute.xlu0 %1897 }
 0x246   : > { %v2395_v33 = vpack.c.bf16 %v666_v45, %v665_v34  ;;  %v2392_v28 = vpack.c.bf16 %v668_v43, %v667_v31  ;;  %v5457_v32 = vsel %vm3631_vm1, 4294967295, %v5456_v32  ;;  %vm5459_vm13 = vmand %vm3473_vm11, %vm3342_vm15  ;;  %v2589_v60 = vunpack.i.h.bf16 %v3279_v54  ;;  %5461 = vst [vmem:[#allocation65_spill] sm:$0xff] %v3645_v0 }
 0x247   : > { %2391 = vmatpush1.bf16.msra.mxu1 %v2390_v11  ;;  %5458 = vst [vmem:[#allocation64_spill] sm:$0xff] %v5457_v32  ;;  %v757_v3 = vsel %vm5459_vm13, 1, %v5395_v18  ;;  %v2588_v11 = vunpack.i.l.bf16 %v3279_v54  ;;  %v2641_v31 = vunpack.i.h.bf16 %v2639_v17  ;;  %v2640_v29 = vunpack.i.l.bf16 %v2639_v17  ;;  %vm2399_vm14 = vmpackc.low %vm3609_vm6, %vm3609_vm6  ;;  %1736 = vrot.lane.b32.xlu0 %v3214_v19, %s5460_s15  ;;  %v3844_v32 = vld [vmem:[%s5094_s4] sm:$0xff] }
 0x248   : > { %2394 = vmatprep.subr.msk.bf16.mxu1 %vm2393_vm7, %v2392_v28  ;;  %vm3648_vm8 = vcmp.eq.s32.totalorder %v736_v38, 1  ;;  %v5462_v45 = vmov 0  ;;  %vm3652_vm11 = vcmp.eq.s32.totalorder %v732_v36, 1  ;;  %v5465_v43 = vmov 0  ;;  %v2644_v38 = vpop.permute.xlu1 %2643  ;;  %1779 = vrot.lane.b32.xlu1 %v3230_v22, %s5473_s9  ;;  %5513 = vst [vmem:[#allocation80_spill] sm:$0xff] %v3844_v32 }
 0x249   : > { %v5463_v45 = vsel %vm3648_vm8, 4294967295, %v5462_v45  ;;  %v5466_v43 = vsel %vm3652_vm11, 4294967295, %v5465_v43  ;;  %vm5468_vm13 = vcmp.lt.s32.totalorder %v3352_v15, 113  ;;  %v2646_v56 = vunpack.i.h.bf16 %v2644_v38 }
 0x24a   : > { %5464 = vst [vmem:[#allocation66_spill] sm:$0xff] %v5463_v45  ;;  %5467 = vst [vmem:[#allocation67_spill] sm:$0xff] %v5466_v43  ;;  %v695_v54 = vsel %vm5468_vm13, %v2589_v60, %v2641_v31  ;;  %v2645_v2 = vunpack.i.l.bf16 %v2644_v38  ;;  %v2599_v38 = vunpack.i.h.bf16 %v3332_v59 }
 0x24b   : > { %vm5469_vm12 = vmmov %vm5468_vm13  ;;  %2397 = vmatpush1.bf16.msk.msra.mxu1 %vm5472_vm4, %v2395_v33  ;;  %v2594_v33 = vunpack.i.h.bf16 %v3306_v51  ;;  %vm5476_vm4 = vcmp.lt.s32.totalorder %v3352_v15, 112  ;;  %965 = vrot.lane.b32.xlu0 %v3230_v22, %s5481_s29 }
 0x24c   : > { %v697_v34 = vsel %vm5469_vm12, %v2641_v31, %v2589_v60  ;;  %vm5470_vm3 = vmmov %vm5469_vm12  ;;  %v765_v31 = vrot.slane %v757_v3, %v3340_v37 }
 0x24d   : > { %v694_v17 = vsel %vm5470_vm3, %v2588_v11, %v2640_v29  ;;  %vm5471_vm7 = vmmov %vm5470_vm3 }
 0x24e   : > { %v696_v28 = vsel %vm5471_vm7, %v2640_v29, %v2588_v11  ;;  %v2401_v36 = vpack.c.bf16 %v695_v54, %v694_v17  ;;  %v761_v11 = vrot.slane %v757_v3, %v3338_v40  ;;  %v2593_v29 = vunpack.i.l.bf16 %v3306_v51  ;;  %vm5477_vm13 = vmmov %vm5476_vm4 }
 0x24f   : > { %v2398_v60 = vpack.c.bf16 %v697_v34, %v696_v28  ;;  %v3685_v54 = vadd.f32 %v3067_v47, %v3047_v25  ;;  %v3687_v34 = vpop.permute.xlu0 %1946  ;;  %v724_v3 = vsel %vm5476_vm4, %v2594_v33, %v2646_v56  ;;  %v726_v51 = vsel %vm5477_vm13, %v2646_v56, %v2594_v33  ;;  %vm5478_vm7 = vmmov %vm5476_vm4  ;;  %v2649_v47 = vpop.permute.xlu1 %2648 }
 0x250   : > { %5475 = vst [vmem:[#allocation69_spill] sm:$0xff] %v3687_v34  ;;  %v723_v17 = vsel %vm5478_vm7, %v2593_v29, %v2645_v2  ;;  %vm5479_vm12 = vmmov %vm5476_vm4  ;;  %vm3711_vm4 = vcmp.eq.s32.totalorder %v765_v31, 1  ;;  %vm3715_vm13 = vcmp.eq.s32.totalorder %v761_v11, 1  ;;  %v2651_v33 = vunpack.i.h.bf16 %v2649_v47 }
 0x251   : > { %5474 = vst [vmem:[#allocation68_spill] sm:$0xff] %v3685_v54  ;;  %2400 = vmatprep.subr.msk.bf16.mxu1 %vm2399_vm14, %v2398_v60  ;;  %v725_v28 = vsel %vm5479_vm12, %v2645_v2, %v2593_v29  ;;  %vm5480_vm14 = vmpackc.low %vm3631_vm1, %vm3631_vm1  ;;  %v2407_v25 = vpack.c.bf16 %v724_v3, %v723_v17  ;;  %v5482_v2 = vmov 0  ;;  %v2598_v60 = vunpack.i.l.bf16 %v3332_v59  ;;  %1016 = vrot.lane.b32.xlu1 %v3685_v54, %s5488_s14  ;;  %s5493_s14 = smov 32  }
 0x252   : > { %2403 = vmatpush1.bf16.msk.msra.mxu1 %vm5480_vm14, %v2401_v36  ;;  %vm2405_vm3 = vmpackc.low %vm3648_vm8, %vm3648_vm8  ;;  %v2404_v56 = vpack.c.bf16 %v726_v51, %v725_v28  ;;  %v5483_v2 = vsel %vm3711_vm4, 4294967295, %v5482_v2  ;;  %v5485_v36 = vmov 0  ;;  %v2650_v29 = vunpack.i.l.bf16 %v2649_v47  ;;  %1057 = vrot.lane.b32.xlu0 %v3230_v22, %s5493_s14 }
 0x253   : > { %vm2408_vm12 = vmpackc.low %vm3652_vm11, %vm3652_vm11  ;;  %5484 = vst [vmem:[#allocation70_spill] sm:$0xff] %v5483_v2  ;;  %v5486_v36 = vsel %vm3715_vm13, 4294967295, %v5485_v36  ;;  %vm5489_vm7 = vcmp.lt.s32.totalorder %v3352_v15, 111  ;;  %v3731_v17 = vpop.permute.xlu0 %1252  ;;  %v3738_v28 = vpop.permute.xlu1 %1942 }
 0x254   : > { %5487 = vst [vmem:[#allocation71_spill] sm:$0xff] %v5486_v36  ;;  %2406 = vmatprep.subr.msk.bf16.mxu1 %vm2405_vm3, %v2404_v56  ;;  %v753_v31 = vsel %vm5489_vm7, %v2599_v38, %v2651_v33  ;;  %vm5490_vm14 = vmmov %vm5489_vm7  ;;  %v772_v56 = vld [vmem:[%s5093_s3] sm:$0xff]  ;;  %vm509_vm3 = vcmp.lt.s32.totalorder %v3277_v49, 18 }
 0x255   : > { %v755_v3 = vsel %vm5490_vm14, %v2651_v33, %v2599_v38  ;;  %vm5491_vm8 = vmmov %vm5489_vm7  ;;  %5494 = vst [vmem:[#allocation72_spill] sm:$0xff] %v3738_v28  ;;  %1106 = vrot.lane.b32.xlu1 %v3685_v54, %s5495_s28 }
 0x256   : > { %v752_v11 = vsel %vm5491_vm8, %v2598_v60, %v2650_v29  ;;  %vm5492_vm11 = vmmov %vm5489_vm7  ;;  %2409 = vmatpush1.bf16.msk.msra.mxu1 %vm2408_vm12, %v2407_v25  ;;  %969 = vrot.lane.b32.xlu0 %v3685_v54, %s5481_s29  ;;  %s2790_s29 = smov 95   ;;  %vm523_vm12 = vcmp.ge.s32.totalorder %v3286_v57, 2  ;;  %vm524_vm7 = vcmp.lt.s32.totalorder %v3286_v57, 18 }
 0x257   : > { %v754_v51 = vsel %vm5492_vm11, %v2650_v29, %v2598_v60  ;;  %vm2411_vm6 = vmpackc.low %vm3711_vm4, %vm3711_vm4  ;;  %v2413_v59 = vpack.c.bf16 %v753_v31, %v752_v11  ;;  %v3745_v25 = vpop.permute.xlu0 %1010  ;;  %v3752_v38 = vpop.permute.xlu1 %963  ;;  %v775_v60 = vld [vmem:[%s5093_s3 + $0x18] sm:$0xff]  ;;  %vm5496_vm11 = vcmask 130048   ;;  %v774_v29 = vld [vmem:[%s5093_s3 + $0x10] sm:$0xff] }
 0x258   : > { %v2410_v47 = vpack.c.bf16 %v755_v3, %v754_v51  ;;  %vm2414_vm8 = vmpackc.low %vm3715_vm13, %vm3715_vm13 }
 0x259   : > { %1151 = vrot.lane.b32.xlu1 %v3685_v54, %s5375_s18  ;;  %s2791_s18 = smov 94  }
 0x25a   : > { %2412 = vmatprep.subr.msk.bf16.mxu1 %vm2411_vm6, %v2410_v47  ;;  %1061 = vrot.lane.b32.xlu0 %v3685_v54, %s5493_s14  ;;  %s5504_s14 = smov 1   ;;  %vm508_vm6 = vcmp.ge.s32.totalorder %v3277_v49, 2 }
 0x25b   : > { %2415 = vmatpush1.bf16.msk.msra.mxu1 %vm2414_vm8, %v2413_v59  ;;  %v3759_v33 = vpop.permute.xlu0 %1100  ;;  %v3767_v31 = vpop.permute.xlu1 %1055  ;;  %vm3829_vm14 = vmand %vm508_vm6, %vm509_vm3  ;;  %vm535_vm3 = vcmp.ge.s32.totalorder %v3286_v57, 4294967294 }
 0x25c   : > { %vm3835_vm8 = vmand %vm523_vm12, %vm524_vm7  ;;  %vm536_vm12 = vcmp.lt.s32.totalorder %v3286_v57, 14 }
 0x25d   : > { %1196 = vrot.lane.b32.xlu1 %v3685_v54, %s5376_s13  ;;  %s5499_s13 = smov 14   ;;  %vm1023_vm6 = vmand %vm3829_vm14, %vm3308_vm9  ;;  %vm5547_vm9 = vcmp.lt.s32.totalorder %v3352_v15, 31 }
 0x25e   : > { %856 = vmatmul.mubr.f32.vlgmr.msra.gmra.mrb[8].mxu1 %v772_v56  ;;  %1781 = vrot.lane.b32.xlu0 %v3214_v19, %s5473_s9  ;;  %vm1068_vm7 = vmand %vm3829_vm14, %vm3314_vm10 }
 0x25f   : > { %2340 = vmatprep.mubr.msk.f32.mxu1 %vm5496_vm11, %v775_v60  ;;  %v3771_v3 = vpop.permute.xlu0 %1145  ;;  %v3775_v11 = vpop.permute.xlu1 %1190  ;;  %vm976_vm11 = vmand %vm3829_vm14, %vm3835_vm8  ;;  %v1069_v63 = vsel %vm1068_vm7, 1, %v5395_v18 }
 0x260   : > { %vm1113_vm4 = vmand %vm3829_vm14, %vm3342_vm15  ;;  %v977_v57 = vsel %vm976_vm11, 1, %v5395_v18  ;;  %v1073_v43 = vrot.slane %v1069_v63, %v3338_v40  ;;  %v1077_v48 = vrot.slane %v1069_v63, %v3340_v37 }
 0x261   : > { %1241 = vrot.lane.b32.xlu1 %v3685_v54, %s5497_s23  ;;  %vm3872_vm13 = vmand %vm535_vm3, %vm536_vm12  ;;  %v1114_v62 = vsel %vm1113_vm4, 1, %v5395_v18  ;;  %v985_v26 = vrot.slane %v977_v57, %v3340_v37  ;;  %vm5264_vm4 = vcmp.lt.s32.totalorder %v3352_v15, 33  ;;  %vm5523_vm3 = vnez %v5382_v41 }
 0x262   : > { %862 = vmatmul.mubr.f32.gmra.mrb[10].mxu1 %v774_v29  ;;  %1822 = vrot.lane.b32.xlu0 %v3145_v12, %s2789_s30  ;;  %vm1158_vm11 = vmand %vm3829_vm14, %vm3872_vm13  ;;  %vm3951_vm0 = vcmp.eq.s32.totalorder %v1073_v43, 1  ;;  %vm3964_vm10 = vcmp.eq.s32.totalorder %v1077_v48, 1 }
 0x263   : > { %v3779_v51 = vpop.permute.xlu0 %1235  ;;  %v3783_v59 = vpop.permute.xlu1 %1267  ;;  %v1159_v27 = vsel %vm1158_vm11, 1, %v5395_v18  ;;  %vm3924_vm14 = vcmp.eq.s32.totalorder %v985_v26, 1  ;;  %vm5535_vm12 = vmand %vm5523_vm3, %vm3835_vm8 }
 0x264   : > { %v5530_v35 = vsel %vm3924_vm14, 4294967295, %v5529_v35  ;;  %v1163_v26 = vrot.slane %v1159_v27, %v3338_v40 }
 0x265   : > { %1273 = vrot.lane.b32.xlu1 %v3685_v54, %s5378_s17 }
 0x266   : > { %1826 = vrot.lane.b32.xlu0 %v3214_v19, %s2789_s30 }
 0x267   : > { %v3787_v47 = vpop.permute.xlu0 %1299  ;;  %v3791_v56 = vpop.permute.xlu1 %1331 }
 0x269   : > { %1305 = vrot.lane.b32.xlu1 %v3685_v54, %s5498_s20 }
 0x26a   : > { %1867 = vrot.lane.b32.xlu0 %v3145_v12, %s2790_s29 }
 0x26b   : > { %v3795_v60 = vpop.permute.xlu0 %1376  ;;  %v3799_v29 = vpop.permute.xlu1 %1421 }
 0x26d   : > { %1337 = vrot.lane.b32.xlu1 %v3685_v54, %s5499_s13  ;;  %s5522_s13 = smov 113  }
 0x26e   : > { %1871 = vrot.lane.b32.xlu0 %v3214_v19, %s2790_s29 }
 0x26f   : > { %v3803_v34 = vpop.permute.xlu0 %1501  ;;  %v3807_v28 = vpop.permute.xlu1 %1469 }
 0x270   : > { %5500 = vst [vmem:[#allocation73_spill] sm:$0xff] %v3803_v34  ;;  %5501 = vst [vmem:[#allocation74_spill] sm:$0xff] %v3807_v28  ;;  %v981_v28 = vrot.slane %v977_v57, %v3338_v40  ;;  %v1118_v57 = vrot.slane %v1114_v62, %v3338_v40 }
 0x271   : > { %1382 = vrot.lane.b32.xlu1 %v3685_v54, %s5390_s19  ;;  %s5509_s19 = smov 127  }
 0x272   : > { %1912 = vrot.lane.b32.xlu0 %v3145_v12, %s2791_s18 }
 0x273   : > { %v3811_v0 = vpop.permute.xlu0 %1591  ;;  %v3815_v2 = vpop.permute.xlu1 %1546 }
 0x274   : > { %5502 = vst [vmem:[#allocation75_spill] sm:$0xff] %v3811_v0  ;;  %5503 = vst [vmem:[#allocation76_spill] sm:$0xff] %v3815_v2  ;;  %v1024_v0 = vsel %vm1023_vm6, 1, %v5395_v18  ;;  %v5517_v2 = vmov 5   ;;  %vm3920_vm6 = vcmp.eq.s32.totalorder %v981_v28, 1 }
 0x275   : > { %1427 = vrot.lane.b32.xlu1 %v3685_v54, %s5504_s14  ;;  %v1028_v34 = vrot.slane %v1024_v0, %v3338_v40 }
 0x276   : > { %1916 = vrot.lane.b32.xlu0 %v3214_v19, %s2791_s18  ;;  %v1032_v19 = vrot.slane %v1024_v0, %v3340_v37  ;;  %v1122_v0 = vrot.slane %v1114_v62, %v3340_v37  ;;  %v5531_v62 = vmov 0 }
 0x277   : > { %v3823_v36 = vpop.permute.xlu0 %1623  ;;  %v3827_v45 = vpop.permute.xlu1 %1687  ;;  %vm3916_vm7 = vcmp.eq.s32.totalorder %v1028_v34, 1 }
 0x278   : > { %5505 = vst [vmem:[#allocation77_spill] sm:$0xff] %v3823_v36  ;;  %5506 = vst [vmem:[#allocation78_spill] sm:$0xff] %v3827_v45  ;;  %vm3928_vm11 = vcmp.eq.s32.totalorder %v1032_v19, 1  ;;  %v1204_v19 = vsel %vm5535_vm12, 1, %v5395_v18  ;;  %vm3959_vm15 = vcmp.eq.s32.totalorder %v1122_v0, 1  ;;  %vm5545_vm12 = vcmp.lt.s32.totalorder %v3352_v15, 32 }
 0x279   : > { %1475 = vrot.lane.b32.xlu1 %v3685_v54, %s5509_s19  ;;  %v5532_v62 = vsel %vm3928_vm11, 4294967295, %v5531_v62  ;;  %vm5546_vm1 = vmmov %vm5545_vm12  ;;  %s2355_s19 = sshll.u32 %s2850_s25, 10 }
 0x27a   : > { %1962 = vperm.xlu0 %2654, %v3844_v32   ;;  %5533 = vst [vmem:[#allocation85_spill] sm:$0xff] %v5532_v62  ;;  %s5039_s23 = scalar_lea.hbm %s5096_s6, %s2355_s19 }
 0x27b   : > { %v3839_v53 = vpop.permute.xlu0 %1655  ;;  %v3847_v45 = vpop.permute.xlu1 %967 }
 0x27c   : > { %5512 = vst [vmem:[#allocation79_spill] sm:$0xff] %v3839_v53 }
 0x27d   : > { %1507 = vrot.lane.b32.xlu1 %v3685_v54, %s5407_s11  ;;  %s5518_s11 = smov 114  }
 0x27e   : > { %2657 = vset.pattern.permute.xlu0 %v5517_v2  ;;  %v1212_v2 = vrot.slane %v1204_v19, %v3340_v37 }
 0x27f   : > { %v3865_v53 = vpop.permute.xlu0 %1732  ;;  %v1060_v36 = vpop.permute.xlu1 %1059 }
 0x280   : > { %5514 = vst [vmem:[#allocation81_spill] sm:$0xff] %v3865_v53  ;;  %v3883_v53 = vld [vmem:[%s5094_s4 + $0x8] sm:$0xff]  ;;  %v1064_v48 = vsel %vm5545_vm12, %v3767_v31, %v1060_v36 }
 0x281   : > { %1552 = vrot.lane.b32.xlu1 %v3685_v54, %s5518_s11  ;;  %5519 = vst [vmem:[#allocation82_spill] sm:$0xff] %v3883_v53  ;;  %875 = vperm.xlu0 %2657, %v3883_v53   ;;  %v1066_v53 = vsel %vm5546_vm1, %v1060_v36, %v3767_v31  ;;  %vm3997_vm1 = vcmp.eq.s32.totalorder %v1163_v26, 1  ;;  %v5550_v36 = vmov 0  ;;  %v5552_v31 = vmov 0 }
 0x282   : > { %v5551_v36 = vsel %vm3997_vm1, 4294967295, %v5550_v36 }
 0x283   : > { %v3887_v20 = vpop.permute.xlu0 %1777  ;;  %v3897_v39 = vpop.permute.xlu1 %1012 }
 0x284   : > { %5520 = vst [vmem:[#allocation83_spill] sm:$0xff] %v3887_v20  ;;  %5521 = vst [vmem:[#allocation84_spill] sm:$0xff] %v3897_v39  ;;  %v5524_v20 = vmov 3   ;;  %v1167_v39 = vrot.slane %v1159_v27, %v3340_v37  ;;  %v2667_v27 = vld [vmem:[%s5094_s4 + $0x18] sm:$0xff] }
 0x285   : > { %1597 = vrot.lane.b32.xlu1 %v3685_v54, %s5522_s13  ;;  %2659 = vset.pattern.permute.xlu0 %v5524_v20  ;;  %v5543_v20 = vmov 0  ;;  %s2792_s13 = smov [#allocation2]  }
 0x286   : > { %2087 = vperm.xlu0 %2659, %v3844_v32   ;;  %v5544_v20 = vsel %vm3964_vm10, 4294967295, %v5543_v20  ;;  %v1208_v32 = vrot.slane %v1204_v19, %v3338_v40 }
 0x287   : > { %v1015_v55 = vpop.permute.xlu0 %1014  ;;  %v3938_v28 = vpop.permute.xlu1 %1102  ;;  %v5713_v9 = vld [vmem:[#allocation81_spill] sm:$0xff] }
 0x288   : > { %v1019_v63 = vsel %vm5264_vm4, %v3745_v25, %v1015_v55  ;;  %v1021_v34 = vsel %vm5264_vm4, %v1015_v55, %v3745_v25  ;;  %5534 = vst [vmem:[#allocation86_spill] sm:$0xff] %v3938_v28  ;;  %v5536_v55 = vmov 0  ;;  %vm3955_vm4 = vcmp.eq.s32.totalorder %v1118_v57, 1 }
 0x289   : > { %1629 = vrot.lane.b32.xlu1 %v3685_v54, %s5436_s12  ;;  %v5537_v55 = vsel %vm3951_vm0, 4294967295, %v5536_v55  ;;  %v5540_v28 = vmov 0  ;;  %v1035_v43 = vsel %vm3916_vm7, %v1021_v34, 0.0  ;;  %v1036_v57 = vsel %vm3928_vm11, %v1019_v63, 0.0  ;;  %vm5548_vm11 = vmmov %vm5547_vm9  ;;  %s2682_s12 = sshll.u32 %s2792_s13, 4  ;;  %s2683_s12 = int_to_ptr.vmem [resolvable:$false] %s2682_s12 }
 0x28a   : > { %v5541_v28 = vsel %vm3959_vm15, 4294967295, %v5540_v28  ;;  %2099 = vperm.xlu0 %2659, %v2667_v27  }
 0x28b   : > { %5542 = vst [vmem:[#allocation87_spill] sm:$0xff] %v5541_v28  ;;  %v1105_v0 = vpop.permute.xlu0 %1104  ;;  %v3989_v27 = vpop.permute.xlu1 %1147 }
 0x28c   : > { %v1109_v34 = vsel %vm5547_vm9, %v3759_v33, %v1105_v0  ;;  %v1111_v63 = vsel %vm5548_vm11, %v1105_v0, %v3759_v33  ;;  %5549 = vst [vmem:[#allocation88_spill] sm:$0xff] %v3989_v27  ;;  %vm4001_vm9 = vcmp.eq.s32.totalorder %v1167_v39, 1  ;;  %v1047_v33 = vmul.f32 %v3072_v50, %v1035_v43 }
 0x28d   : > { %v1125_v19 = vsel %vm3955_vm4, %v1111_v63, 0.0  ;;  %v1126_v62 = vsel %vm3959_vm15, %v1109_v34, 0.0  ;;  %1661 = vrot.lane.b32.xlu1 %v3685_v54, %s5443_s16  ;;  %v5553_v31 = vsel %vm4001_vm9, 4294967295, %v5552_v31  ;;  %v1048_v0 = vmul.f32 %v3072_v50, %v1036_v57 }
 0x28e   : > { %5554 = vst [vmem:[#allocation89_spill] sm:$0xff] %v5553_v31  ;;  %v1137_v63 = vmul.f32 %v3119_v4, %v1125_v19  ;;  %v1138_v27 = vmul.f32 %v3119_v4, %v1126_v62  ;;  %vm5555_vm11 = vcmp.lt.s32.totalorder %v3352_v15, 34  ;;  %v1080_v43 = vsel %vm3951_vm0, %v1066_v53, 0.0  ;;  %v5649_v53 = vld [vmem:[#allocation14_spill] sm:$0xff] }
 0x28f   : > { %v972_v26 = vsel %vm5555_vm11, %v3752_v38, %v3847_v45  ;;  %vm5556_vm12 = vmmov %vm5555_vm11  ;;  %v1150_v34 = vpop.permute.xlu0 %1149  ;;  %v1081_v50 = vsel %vm3964_vm10, %v1064_v48, 0.0  ;;  %vm5557_vm15 = vcmp.lt.s32.totalorder %v3352_v15, 30  ;;  %v4027_v28 = vpop.permute.xlu1 %1192  ;;  %vm4032_vm0 = vcmp.eq.s32.totalorder %v1208_v32, 1 }
 0x290   : > { %v974_v39 = vsel %vm5556_vm12, %v3847_v45, %v3752_v38  ;;  %v1141_v57 = vadd.f32 %v1137_v63, %v1047_v33  ;;  %v1142_v19 = vadd.f32 %v1138_v27, %v1048_v0  ;;  %v1154_v4 = vsel %vm5557_vm15, %v3771_v3, %v1150_v34  ;;  %vm5558_vm11 = vmmov %vm5557_vm15 }
 0x291   : > { %v1156_v62 = vsel %vm5558_vm11, %v1150_v34, %v3771_v3  ;;  %1693 = vrot.lane.b32.xlu1 %v3685_v54, %s5452_s10  ;;  %vm5283_vm12 = vcmp.lt.s32.totalorder %v3352_v15, 18  ;;  %vm4036_vm10 = vcmp.eq.s32.totalorder %v1212_v2, 1  ;;  %v988_v38 = vsel %vm3920_vm6, %v974_v39, 0.0  ;;  %vm1344_vm15 = vmand %vm5523_vm3, %vm3872_vm13 }
 0x292   : > { %v989_v3 = vsel %vm3924_vm14, %v972_v26, 0.0  ;;  %v1170_v48 = vsel %vm3997_vm1, %v1156_v62, 0.0  ;;  %v1171_v27 = vsel %vm4001_vm9, %v1154_v4, 0.0  ;;  %v1092_v33 = vmul.f32 %v3063_v44, %v1080_v43 }
 0x293   : > { %v1195_v32 = vpop.permute.xlu0 %1194  ;;  %v1093_v2 = vmul.f32 %v3063_v44, %v1081_v50  ;;  %v4056_v26 = vpop.permute.xlu1 %1237  ;;  %v1002_v44 = vmul.f32 %v3045_v23, %v988_v38  ;;  %v1003_v43 = vmul.f32 %v3045_v23, %v989_v3  ;;  %v1182_v50 = vmul.f32 %v3089_v58, %v1170_v48 }
 0x294   : > { %v1199_v0 = vsel %vm5283_vm12, %v3775_v11, %v1195_v32  ;;  %v1201_v63 = vsel %vm5283_vm12, %v1195_v32, %v3775_v11  ;;  %v1183_v4 = vmul.f32 %v3089_v58, %v1171_v27  ;;  %vm5563_vm11 = vcmp.lt.s32.totalorder %v3352_v15, 17 }
 0x295   : > { %v1215_v39 = vsel %vm4032_vm0, %v1201_v63, 0.0  ;;  %v1216_v34 = vsel %vm4036_vm10, %v1199_v0, 0.0  ;;  %1738 = vrot.lane.b32.xlu1 %v3685_v54, %s5460_s15  ;;  %v1096_v0 = vadd.f32 %v1092_v33, %v1002_v44  ;;  %v1097_v63 = vadd.f32 %v1093_v2, %v1003_v43  ;;  %vm5564_vm12 = vmmov %vm5563_vm11 }
 0x296   : > { %v1227_v11 = vmul.f32 %v3098_v61, %v1215_v39  ;;  %v1228_v62 = vmul.f32 %v3098_v61, %v1216_v34  ;;  %vm5565_vm9 = vnez %v5403_v16  ;;  %vm5566_vm3 = vnez %v5401_v7 }
 0x297   : > { %v1240_v32 = vpop.permute.xlu0 %1239  ;;  %v4080_v3 = vpop.permute.xlu1 %1269  ;;  %v1186_v27 = vadd.f32 %v1182_v50, %v1096_v0  ;;  %v1187_v33 = vadd.f32 %v1183_v4, %v1097_v63 }
 0x298   : > { %v1231_v31 = vadd.f32 %v1227_v11, %v1141_v57  ;;  %v1232_v38 = vadd.f32 %v1228_v62, %v1142_v19  ;;  %v1243_v23 = vsel %vm5563_vm11, %v3779_v51, %v1240_v32  ;;  %v1245_v58 = vsel %vm5564_vm12, %v1240_v32, %v3779_v51 }
 0x299   : > { %v1247_v61 = vsel %vm5565_vm9, %v1245_v58, 0.0  ;;  %v1248_v41 = vsel %vm5566_vm3, %v1243_v23, 0.0  ;;  %1783 = vrot.lane.b32.xlu1 %v3685_v54, %s5473_s9  ;;  %v1345_v57 = vsel %vm1344_vm15, 1, %v5395_v18  ;;  %vm5567_vm12 = vcmp.lt.s32.totalorder %v3352_v15, 16  ;;  %vm1389_vm15 = vmand %vm3367_vm5, %vm3835_vm8 }
 0x29a   : > { %v1259_v19 = vmul.f32 %v3731_v17, %v1247_v61  ;;  %v1260_v48 = vmul.f32 %v3731_v17, %v1248_v41  ;;  %vm5568_vm11 = vmmov %vm5567_vm12  ;;  %vm5569_vm3 = vnez %v5405_v6  ;;  %v1353_v4 = vrot.slane %v1345_v57, %v3340_v37 }
 0x29b   : > { %v1272_v51 = vpop.permute.xlu0 %1271  ;;  %v4097_v34 = vpop.permute.xlu1 %1301  ;;  %v1390_v0 = vsel %vm1389_vm15, 1, %v5395_v18  ;;  %vm5574_vm9 = vnez %v5414_v10 }
 0x29c   : > { %v1275_v2 = vsel %vm5567_vm12, %v3783_v59, %v1272_v51  ;;  %v1277_v39 = vsel %vm5568_vm11, %v1272_v51, %v3783_v59  ;;  %v1263_v44 = vadd.f32 %v1259_v19, %v1186_v27  ;;  %v1264_v17 = vadd.f32 %v1260_v48, %v1187_v33 }
 0x29d   : > { %v1279_v43 = vsel %vm3401_vm2, %v1277_v39, 0.0  ;;  %v1280_v50 = vsel %vm5569_vm3, %v1275_v2, 0.0  ;;  %1824 = vrot.lane.b32.xlu1 %v3230_v22, %s2789_s30  ;;  %v1349_v59 = vrot.slane %v1345_v57, %v3338_v40  ;;  %vm5286_vm12 = vcmp.lt.s32.totalorder %v3352_v15, 14 }
 0x29e   : > { %v1291_v11 = vmul.f32 %v3117_v1, %v1279_v43  ;;  %v1292_v62 = vmul.f32 %v3117_v1, %v1280_v50  ;;  %vm5570_vm11 = vcmp.lt.s32.totalorder %v3352_v15, 15  ;;  %vm5573_vm2 = vnez %v5417_v46 }
 0x29f   : > { %v1304_v32 = vpop.permute.xlu0 %1303  ;;  %vm5571_vm3 = vmmov %vm5570_vm11  ;;  %v4121_v41 = vpop.permute.xlu1 %1333  ;;  %vm4129_vm15 = vcmp.eq.s32.totalorder %v1349_v59, 1  ;;  %v1394_v48 = vrot.slane %v1390_v0, %v3338_v40  ;;  %v1398_v27 = vrot.slane %v1390_v0, %v3340_v37 }
 0x2a0   : > { %v1295_v63 = vadd.f32 %v1291_v11, %v1231_v31  ;;  %v1296_v23 = vadd.f32 %v1292_v62, %v1232_v38  ;;  %v1307_v58 = vsel %vm5570_vm11, %v3787_v47, %v1304_v32  ;;  %v1309_v61 = vsel %vm5571_vm3, %v1304_v32, %v3787_v47  ;;  %5572 = vst [vmem:[#allocation90_spill] sm:$0xff] %v4121_v41 }
 0x2a1   : > { %v1311_v1 = vsel %vm5573_vm2, %v1309_v61, 0.0  ;;  %v1312_v57 = vsel %vm5574_vm9, %v1307_v58, 0.0  ;;  %1828 = vrot.lane.b32.xlu1 %v3685_v54, %s2789_s30  ;;  %v5575_v31 = vmov 0  ;;  %vm4133_vm11 = vcmp.eq.s32.totalorder %v1353_v4, 1  ;;  %s242_s30 = sand.u32 1, %s2732_s22  }
 0x2a2   : > { %v5576_v31 = vsel %vm4129_vm15, 4294967295, %v5575_v31  ;;  %v5578_v38 = vmov 0  ;;  %v1323_v47 = vmul.f32 %v3124_v5, %v1311_v1  ;;  %v1324_v19 = vmul.f32 %v3124_v5, %v1312_v57  ;;  %s5048_s25 = scalar_lea.sflag [#allocation3], %s242_s30 }
 0x2a3   : > { %5577 = vst [vmem:[#allocation91_spill] sm:$0xff] %v5576_v31  ;;  %v5579_v38 = vsel %vm4133_vm11, 4294967295, %v5578_v38  ;;  %v1336_v33 = vpop.permute.xlu0 %1335  ;;  %v4147_v39 = vpop.permute.xlu1 %1378  ;;  %vm5288_vm3 = vcmp.lt.s32.totalorder %v3352_v15, 2  ;;  %vm4162_vm9 = vcmp.eq.s32.totalorder %v1398_v27, 1 }
 0x2a4   : > { %5580 = vst [vmem:[#allocation92_spill] sm:$0xff] %v5579_v38  ;;  %v1340_v51 = vsel %vm5286_vm12, %v3791_v56, %v1336_v33  ;;  %v1342_v2 = vsel %vm5286_vm12, %v1336_v33, %v3791_v56  ;;  %5581 = vst [vmem:[#allocation93_spill] sm:$0xff] %v4147_v39  ;;  %v1327_v43 = vadd.f32 %v1323_v47, %v1263_v44  ;;  %vm4158_vm12 = vcmp.eq.s32.totalorder %v1394_v48, 1 }
 0x2a5   : > { %v1328_v50 = vadd.f32 %v1324_v19, %v1264_v17  ;;  %v1356_v5 = vsel %vm4129_vm15, %v1342_v2, 0.0  ;;  %v1357_v59 = vsel %vm4133_vm11, %v1340_v51, 0.0  ;;  %1869 = vrot.lane.b32.xlu1 %v3230_v22, %s2790_s29  ;;  %v5582_v56 = vmov 0 }
 0x2a6   : > { %v1368_v4 = vmul.f32 %v3133_v8, %v1356_v5  ;;  %v1369_v11 = vmul.f32 %v3133_v8, %v1357_v59  ;;  %v5583_v56 = vsel %vm4158_vm12, 4294967295, %v5582_v56  ;;  %v5585_v44 = vmov 0 }
 0x2a7   : > { %5584 = vst [vmem:[#allocation94_spill] sm:$0xff] %v5583_v56  ;;  %v5586_v44 = vsel %vm4162_vm9, 4294967295, %v5585_v44  ;;  %v1381_v17 = vpop.permute.xlu0 %1380  ;;  %v4172_v8 = vpop.permute.xlu1 %1423  ;;  %vm5589_vm11 = vcmp.lt.s32.totalorder %v3352_v15, 1  ;;  %vm5593_vm15 = vnez %v5424_v30  ;;  %v5650_v56 = vld [vmem:[#allocation73_spill] sm:$0xff] }
 0x2a8   : > { %5587 = vst [vmem:[#allocation95_spill] sm:$0xff] %v5586_v44  ;;  %v1372_v62 = vadd.f32 %v1368_v4, %v1295_v63  ;;  %v1373_v32 = vadd.f32 %v1369_v11, %v1296_v23  ;;  %v1385_v0 = vsel %vm5288_vm3, %v3795_v60, %v1381_v17  ;;  %v1387_v58 = vsel %vm5288_vm3, %v1381_v17, %v3795_v60  ;;  %vm5590_vm3 = vmmov %vm5589_vm11  ;;  %v5596_v11 = vld [vmem:[#allocation82_spill] sm:$0xff] }
 0x2a9   : > { %5588 = vst [vmem:[#allocation96_spill] sm:$0xff] %v4172_v8  ;;  %v1401_v61 = vsel %vm4158_vm12, %v1387_v58, 0.0  ;;  %v1402_v1 = vsel %vm4162_vm9, %v1385_v0, 0.0  ;;  %1873 = vrot.lane.b32.xlu1 %v3685_v54, %s2790_s29  ;;  %vm5592_vm9 = vnez %v5433_v21  ;;  %v5598_v0 = vmov 5   ;;  %v5622_v21 = vld [vmem:[#allocation11_spill] sm:$0xff]  ;;  %s2299_s29 = sshll.u32 %s242_s30, 6 }
 0x2aa   : > { %v1413_v63 = vmul.f32 %v3156_v24, %v1401_v61  ;;  %v1414_v23 = vmul.f32 %v3156_v24, %v1402_v1  ;;  %v5601_v61 = vmov 7  }
 0x2ab   : > { %v1426_v57 = vpop.permute.xlu0 %1425  ;;  %v4188_v19 = vpop.permute.xlu1 %1471 }
 0x2ac   : > { %v1429_v60 = vsel %vm5589_vm11, %v3799_v29, %v1426_v57  ;;  %v1431_v47 = vsel %vm5590_vm3, %v1426_v57, %v3799_v29  ;;  %5591 = vst [vmem:[#allocation97_spill] sm:$0xff] %v4188_v19  ;;  %v4190_v48 = vadd.f32 %v1413_v63, %v1327_v43  ;;  %v4192_v27 = vadd.f32 %v1414_v23, %v1328_v50  ;;  %vm1514_vm11 = vmand %vm3367_vm5, %vm3872_vm13 }
 0x2ad   : > { %v1433_v33 = vsel %vm5592_vm9, %v1431_v47, 0.0  ;;  %v1434_v24 = vsel %vm5593_vm15, %v1429_v60, 0.0  ;;  %1914 = vrot.lane.b32.xlu1 %v3230_v22, %s2791_s18  ;;  %v5604_v47 = vmov 3   ;;  %vm5608_vm3 = vcmp.lt.s32.totalorder %v3352_v15, 33  ;;  %v5644_v22 = vld [vmem:[#allocation45_spill] sm:$0xff] }
 0x2ae   : > { %v1445_v51 = vmul.f32 %v3158_v13, %v1433_v33  ;;  %v1446_v2 = vmul.f32 %v3158_v13, %v1434_v24  ;;  %vm5609_vm15 = vmmov %vm5608_vm3 }
 0x2af   : > { %v4202_v29 = vpop.permute.xlu0 %1473  ;;  %v4208_v50 = vpop.permute.xlu1 %1503 }
 0x2b0   : > { %v4204_v5 = vadd.f32 %v1445_v51, %v1372_v62  ;;  %v4206_v43 = vadd.f32 %v1446_v2, %v1373_v32  ;;  %5594 = vst [vmem:[#allocation98_spill] sm:$0xff] %v4208_v50  ;;  %v5599_v62 = vld [vmem:[#allocation80_spill] sm:$0xff]  ;;  %v2668_v2 = vld [vmem:[%s5094_s4 + $0x10] sm:$0xff] }
 0x2b1   : > { %1918 = vrot.lane.b32.xlu1 %v3685_v54, %s2791_s18  ;;  %s5021_s18 = scalar_lea.vmem [#allocation2], %s2299_s29 }
 0x2b2   : > { %s2233_s28 = sshll.u32 %s5021_s18, 4  ;;  %s5042_s28 = int_to_ptr.vmem [resolvable:$true] %s2233_s28 }
 0x2b3   : > { %v4212_v59 = vpop.permute.xlu0 %1505  ;;  %v4214_v4 = vpop.permute.xlu1 %1548  ;;  %s2678_s20 = scalar_lea.vmem %s5042_s28, 1024  ;;  %p2685_p0 = scmp.lt.s32.totalorder %s5042_s28, %s2683_s12 }
 0x2b4   : > { %5595 = vst [vmem:[#allocation99_spill] sm:$0xff] %v4214_v4  ;;  %v5621_v4 = vld [vmem:[#allocation10_spill] sm:$0xff]  ;;  %p2679_p11 = scmp.ne.s32.totalorder %s5042_s28, %s2678_s20 }
 0x2b5   : > { %1966 = vperm.xlu1 %2655, %v5596_v11  }
 0x2b6   : > { %p2680_p12 = pnand %p2679_p11, %p2867_p5 }
 0x2b7   : > { %v4217_v17 = vpop.permute.xlu0 %1550  ;;  %v4219_v13 = vpop.permute.xlu1 %1593 }
 0x2b8   : > { %5597 = vst [vmem:[#allocation82_spill] sm:$0xff] %v4219_v13  ;;  %v5616_v13 = vld [vmem:[#allocation86_spill] sm:$0xff]  ;;  %p2681_p13 = pneg %p2680_p12 }
 0x2b9   : > { %2656 = vset.pattern.permute.xlu1 %v5598_v0 }
 0x2ba   : > { %871 = vperm.xlu1 %2656, %v5599_v62  }
 0x2bb   : > { %v4223_v32 = vpop.permute.xlu0 %1595  ;;  %v4225_v58 = vpop.permute.xlu1 %1625 }
 0x2bc   : > { %5600 = vst [vmem:[#allocation80_spill] sm:$0xff] %v4225_v58 }
 0x2be   : > { %2658 = vset.pattern.permute.xlu1 %v5601_v61  ;;  %v5607_v61 = vld [vmem:[#allocation84_spill] sm:$0xff] }
 0x2bf   : > { %v4228_v1 = vpop.permute.xlu0 %1627  ;;  %1976 = vperm.xlu1 %2658, %v5599_v62   ;;  %v4231_v63 = vpop.permute.xlu1 %1657 }
 0x2c0   : > { %5602 = vst [vmem:[#allocation100_spill] sm:$0xff] %v4231_v63 }
 0x2c3   : > { %v4233_v23 = vpop.permute.xlu0 %1659  ;;  %1980 = vperm.xlu1 %2658, %v5596_v11   ;;  %v4236_v57 = vpop.permute.xlu1 %1689 }
 0x2c4   : > { %5603 = vst [vmem:[#allocation101_spill] sm:$0xff] %v4236_v57  ;;  %v5612_v57 = vld [vmem:[#allocation85_spill] sm:$0xff] }
 0x2c5   : > { %vm5613_vm5 = vnez %v5612_v57 }
 0x2c7   : > { %v4238_v60 = vpop.permute.xlu0 %1691  ;;  %2660 = vset.pattern.permute.xlu1 %v5604_v47  ;;  %v4241_v33 = vpop.permute.xlu1 %1734 }
 0x2c8   : > { %5605 = vst [vmem:[#allocation102_spill] sm:$0xff] %v4241_v33  ;;  %2091 = vperm.xlu1 %2660, %v5596_v11  }
 0x2cb   : > { %v4244_v24 = vpop.permute.xlu0 %1736  ;;  %v4246_v51 = vpop.permute.xlu1 %1779 }
 0x2cc   : > { %5606 = vst [vmem:[#allocation103_spill] sm:$0xff] %v4246_v51  ;;  %2095 = vperm.xlu1 %2660, %v2668_v2   ;;  %v5610_v51 = vld [vmem:[#allocation54_spill] sm:$0xff]  ;;  %v2669_v2 = vld [vmem:[%s5095_s5] ss:$2 sm:$0x3] }
 0x2cd   : > { %vm5611_vm9 = vnez %v5610_v51  ;;  %vm520_vm2 = vcmp.ge.s32.totalorder %v2669_v2, 4294967294  ;;  %vm521_vm1 = vcmp.lt.s32.totalorder %v2669_v2, 14  ;;  %v5624_v51 = vld [vmem:[#allocation25_spill] sm:$0xff] }
 0x2ce   : > { %vm1559_vm12 = vmand %vm5611_vm9, %vm3835_vm8 }
 0x2cf   : > { %v4251_v0 = vpop.permute.xlu0 %965  ;;  %v1017_v62 = vpop.permute.xlu1 %1016  ;;  %v1560_v58 = vsel %vm1559_vm12, 1, %v5395_v18 }
 0x2d0   : > { %v1020_v11 = vsel %vm5608_vm3, %v5607_v61, %v1017_v62  ;;  %v1022_v47 = vsel %vm5609_vm15, %v1017_v62, %v5607_v61  ;;  %v1515_v61 = vsel %vm1514_vm11, 1, %v5395_v18  ;;  %vm4278_vm15 = vmand %vm520_vm2, %vm521_vm1  ;;  %vm5617_vm3 = vcmp.lt.s32.totalorder %v3352_v15, 31 }
 0x2d1   : > { %v1037_v33 = vsel %vm3916_vm7, %v1022_v47, 0.0  ;;  %v1038_v63 = vsel %vm5613_vm5, %v1020_v11, 0.0  ;;  %vm5618_vm14 = vmmov %vm5617_vm3  ;;  %v5619_v11 = vld [vmem:[#allocation87_spill] sm:$0xff]  ;;  %v1519_v25 = vrot.slane %v1515_v61, %v3338_v40 }
 0x2d2   : > { %vm5620_vm7 = vnez %v5619_v11  ;;  %vm1700_vm2 = vmand %vm5611_vm9, %vm3872_vm13  ;;  %v1049_v30 = vmul.f32 %v5621_v4, %v1037_v33  ;;  %v1050_v50 = vmul.f32 %v5621_v4, %v1038_v63 }
 0x2d3   : > { %v4270_v42 = vpop.permute.xlu0 %1057  ;;  %v1107_v62 = vpop.permute.xlu1 %1106  ;;  %v1701_v11 = vsel %vm1700_vm2, 1, %v5395_v18  ;;  %vm4330_vm12 = vcmp.eq.s32.totalorder %v1519_v25, 1 }
 0x2d4   : > { %v1110_v2 = vsel %vm5617_vm3, %v5616_v13, %v1107_v62  ;;  %v1112_v12 = vsel %vm5618_vm14, %v1107_v62, %v5616_v13  ;;  %v1523_v62 = vrot.slane %v1515_v61, %v3340_v37  ;;  %v5625_v61 = vld [vmem:[#allocation41_spill] sm:$0xff] }
 0x2d5   : > { %v1127_v57 = vsel %vm3955_vm4, %v1112_v12, 0.0  ;;  %v1128_v47 = vsel %vm5620_vm7, %v1110_v2, 0.0  ;;  %v1564_v2 = vrot.slane %v1560_v58, %v3338_v40  ;;  %v1568_v12 = vrot.slane %v1560_v58, %v3340_v37  ;;  %vm1745_vm4 = vmand %vm4278_vm15, %vm3835_vm8  ;;  %v5627_v58 = vld [vmem:[#allocation32_spill] sm:$0xff] }
 0x2d6   : > { %v1139_v19 = vmul.f32 %v5622_v21, %v1127_v57  ;;  %v1140_v44 = vmul.f32 %v5622_v21, %v1128_v47  ;;  %v5623_v21 = vld [vmem:[#allocation21_spill] sm:$0xff]  ;;  %vm5626_vm14 = vnez %v5625_v61  ;;  %v4323_v49 = vmul.f32 %v5624_v51, %v5627_v58 }
 0x2d7   : > { %v4300_v13 = vpop.permute.xlu0 %969  ;;  %v4310_v4 = vpop.permute.xlu1 %1151  ;;  %v4314_v57 = vmul.f32 %v5624_v51, %v5623_v21  ;;  %vm1790_vm1 = vmand %vm4278_vm15, %vm5626_vm14  ;;  %vm5316_vm8 = vcmp.lt.s32.totalorder %v3352_v15, 126  ;;  %vm4334_vm11 = vcmp.eq.s32.totalorder %v1523_v62, 1  ;;  %vm4338_vm5 = vcmp.eq.s32.totalorder %v1564_v2, 1  ;;  %v5642_v21 = vld [vmem:[#allocation43_spill] sm:$0xff] }
 0x2d8   : > { %v1143_v63 = vadd.f32 %v1139_v19, %v1049_v30  ;;  %v1144_v33 = vadd.f32 %v1140_v44, %v1050_v50  ;;  %v1746_v30 = vsel %vm1745_vm4, 1, %v5395_v18  ;;  %v5628_v19 = vmov 0 }
 0x2d9   : > { %v5629_v19 = vsel %vm4330_vm12, 4294967295, %v5628_v19  ;;  %v5631_v50 = vmov 0  ;;  %v5634_v47 = vmov 0  ;;  %vm4342_vm3 = vcmp.eq.s32.totalorder %v1568_v12, 1 }
 0x2da   : > { %5630 = vst [vmem:[#allocation84_spill] sm:$0xff] %v5629_v19  ;;  %v5632_v50 = vsel %vm4334_vm11, 4294967295, %v5631_v50  ;;  %v5635_v47 = vsel %vm4338_vm5, 4294967295, %v5634_v47  ;;  %v5637_v51 = vmov 0  ;;  %v1705_v58 = vrot.slane %v1701_v11, %v3338_v40 }
 0x2db   : > { %v4328_v44 = vpop.permute.xlu0 %1061  ;;  %5633 = vst [vmem:[#allocation54_spill] sm:$0xff] %v5632_v50  ;;  %5636 = vst [vmem:[#allocation85_spill] sm:$0xff] %v5635_v47  ;;  %v5638_v51 = vsel %vm4342_vm3, 4294967295, %v5637_v51  ;;  %v1197_v61 = vpop.permute.xlu1 %1196  ;;  %vm5640_vm7 = vcmp.lt.s32.totalorder %v3352_v15, 18  ;;  %v1791_v2 = vsel %vm1790_vm1, 1, %v5395_v18  ;;  %vm5643_vm4 = vnez %v5642_v21 }
 0x2dc   : > { %5639 = vst [vmem:[#allocation86_spill] sm:$0xff] %v5638_v51  ;;  %v1200_v25 = vsel %vm5640_vm7, %v4027_v28, %v1197_v61  ;;  %vm5641_vm2 = vmmov %vm5640_vm7  ;;  %v1709_v12 = vrot.slane %v1701_v11, %v3340_v37  ;;  %v1750_v8 = vrot.slane %v1746_v30, %v3338_v40  ;;  %vm5645_vm7 = vnez %v5644_v22  ;;  %v5682_v51 = vld [vmem:[#allocation29_spill] sm:$0xff] }
 0x2dd   : > { %v1202_v62 = vsel %vm5641_vm2, %v1197_v61, %v4027_v28  ;;  %vm1835_vm14 = vmand %vm4278_vm15, %vm5643_vm4  ;;  %v1218_v31 = vsel %vm4036_vm10, %v1200_v25, 0.0  ;;  %v5646_v28 = vld [vmem:[#allocation74_spill] sm:$0xff]  ;;  %vm5647_vm2 = vcmp.lt.s32.totalorder %v3352_v15, 127  ;;  %v1510_v10 = vsel %vm5316_vm8, %v5650_v56, %v4212_v59 }
 0x2de   : > { %v1217_v38 = vsel %vm4032_vm0, %v1202_v62, 0.0  ;;  %vm1880_vm1 = vmand %vm4278_vm15, %vm5645_vm7  ;;  %v1477_v61 = vsel %vm5647_vm2, %v5646_v28, %v4202_v29  ;;  %v1230_v45 = vmul.f32 %v5649_v53, %v1218_v31  ;;  %v1512_v41 = vsel %vm5316_vm8, %v4212_v59, %v5650_v56 }
 0x2df   : > { %vm5648_vm9 = vmmov %vm5647_vm2  ;;  %v1229_v62 = vmul.f32 %v5649_v53, %v1217_v38  ;;  %v4378_v25 = vpop.permute.xlu0 %1781  ;;  %v1795_v38 = vrot.slane %v1791_v2, %v3338_v40  ;;  %v1836_v56 = vsel %vm1835_vm14, 1, %v5395_v18  ;;  %v1881_v59 = vsel %vm1880_vm1, 1, %v5395_v18 }
 0x2e0   : > { %v1479_v11 = vsel %vm5648_vm9, %v4202_v29, %v5646_v28  ;;  %v1754_v29 = vrot.slane %v1746_v30, %v3340_v37  ;;  %v4391_v28 = vpop.permute.xlu1 %1241  ;;  %vm1925_vm0 = vmand %vm4278_vm15, %vm3872_vm13  ;;  %v4399_v53 = vadd.f32 %v1230_v45, %v1144_v33  ;;  %v5653_v30 = vld [vmem:[#allocation62_spill] sm:$0xff]  ;;  %v5657_v45 = vld [vmem:[#allocation76_spill] sm:$0xff]  ;;  %vm5658_vm8 = vcmp.lt.s32.totalorder %v3352_v15, 114 }
 0x2e1   : > { %v4397_v31 = vadd.f32 %v1229_v62, %v1143_v63  ;;  %vm5654_vm9 = vnez %v5653_v30  ;;  %v5655_v62 = vld [vmem:[#allocation61_spill] sm:$0xff]  ;;  %v1555_v21 = vsel %vm5658_vm8, %v5657_v45, %v4217_v17  ;;  %vm5659_vm4 = vmmov %vm5658_vm8  ;;  %v1526_v22 = vsel %vm4330_vm12, %v1510_v10, 0.0 }
 0x2e2   : > { %5652 = vst [vmem:[#allocation10_spill] sm:$0xff] %v4399_v53  ;;  %v1481_v63 = vsel %vm5654_vm9, %v1477_v61, 0.0  ;;  %vm5656_vm2 = vnez %v5655_v62  ;;  %v1557_v53 = vsel %vm5659_vm4, %v4217_v17, %v5657_v45  ;;  %v1527_v61 = vsel %vm4334_vm11, %v1512_v41, 0.0  ;;  %v5665_v45 = vld [vmem:[#allocation24_spill] sm:$0xff] }
 0x2e3   : > { %5651 = vst [vmem:[#allocation87_spill] sm:$0xff] %v4397_v31  ;;  %v1482_v33 = vsel %vm5656_vm2, %v1479_v11, 0.0  ;;  %vm4430_vm7 = vcmp.eq.s32.totalorder %v1705_v58, 1  ;;  %vm4434_vm1 = vcmp.eq.s32.totalorder %v1709_v12, 1  ;;  %v5662_v62 = vmov 0  ;;  %v4439_v31 = vpop.permute.xlu0 %1822 }
 0x2e4   : > { %v5663_v62 = vsel %vm4434_vm1, 4294967295, %v5662_v62  ;;  %v1799_v30 = vrot.slane %v1791_v2, %v3340_v37  ;;  %v4447_v10 = vsel %vm1925_vm0, 1, %v5395_v18  ;;  %v4450_v41 = vpop.permute.xlu1 %1273  ;;  %v1840_v17 = vrot.slane %v1836_v56, %v3338_v40 }
 0x2e5   : > { %5664 = vst [vmem:[#allocation11_spill] sm:$0xff] %v5663_v62  ;;  %v1844_v58 = vrot.slane %v1836_v56, %v3340_v37  ;;  %v1885_v2 = vrot.slane %v1881_v59, %v3338_v40  ;;  %v1889_v12 = vrot.slane %v1881_v59, %v3340_v37  ;;  %v1493_v50 = vmul.f32 %v5665_v45, %v1481_v63  ;;  %v5672_v59 = vld [vmem:[#allocation28_spill] sm:$0xff] }
 0x2e6   : > { %v1494_v54 = vmul.f32 %v5665_v45, %v1482_v33  ;;  %v1571_v14 = vsel %vm4338_vm5, %v1555_v21, 0.0  ;;  %v1572_v18 = vsel %vm4342_vm3, %v1557_v53, 0.0  ;;  %vm4462_vm13 = vcmp.eq.s32.totalorder %v1750_v8, 1  ;;  %v5673_v8 = vld [vmem:[#allocation75_spill] sm:$0xff] }
 0x2e7   : > { %v5666_v19 = vmov 0  ;;  %vm4466_vm15 = vcmp.eq.s32.totalorder %v1754_v29, 1  ;;  %v5669_v56 = vmov 0  ;;  %v1538_v63 = vmul.f32 %v5672_v59, %v1526_v22 }
 0x2e8   : > { %v5667_v19 = vsel %vm4462_vm13, 4294967295, %v5666_v19  ;;  %v5670_v56 = vsel %vm4466_vm15, 4294967295, %v5669_v56  ;;  %v1539_v33 = vmul.f32 %v5672_v59, %v1527_v61  ;;  %vm5674_vm4 = vcmp.lt.s32.totalorder %v3352_v15, 113  ;;  %v1827_v59 = vpop.permute.xlu0 %1826 }
 0x2e9   : > { %5668 = vst [vmem:[#allocation25_spill] sm:$0xff] %v5667_v19  ;;  %5671 = vst [vmem:[#allocation41_spill] sm:$0xff] %v5670_v56  ;;  %v1599_v29 = vsel %vm5674_vm4, %v5673_v8, %v4223_v32  ;;  %vm4485_vm0 = vcmp.eq.s32.totalorder %v1795_v38, 1  ;;  %v5676_v22 = vmov 0  ;;  %vm4489_vm14 = vcmp.eq.s32.totalorder %v1799_v30, 1  ;;  %v5683_v38 = vld [vmem:[#allocation77_spill] sm:$0xff] }
 0x2ea   : > { %vm5675_vm8 = vmmov %vm5674_vm4  ;;  %v5677_v22 = vsel %vm4485_vm0, 4294967295, %v5676_v22  ;;  %v5679_v61 = vmov 0  ;;  %v1465_v53 = vadd.f32 %v4314_v57, %v4190_v48  ;;  %v1466_v21 = vadd.f32 %v4323_v49, %v4192_v27  ;;  %v4516_v57 = vpop.permute.xlu1 %1305  ;;  %v5868_v48 = vld [vmem:[#allocation60_spill] sm:$0xff] }
 0x2eb   : > { %v1601_v45 = vsel %vm5675_vm8, %v4223_v32, %v5673_v8  ;;  %5678 = vst [vmem:[#allocation43_spill] sm:$0xff] %v5677_v22  ;;  %v5680_v61 = vsel %vm4489_vm14, 4294967295, %v5679_v61  ;;  %v1583_v47 = vmul.f32 %v5682_v51, %v1571_v14  ;;  %v1584_v32 = vmul.f32 %v5682_v51, %v1572_v18  ;;  %v5690_v14 = vld [vmem:[#allocation79_spill] sm:$0xff] }
 0x2ec   : > { %5681 = vst [vmem:[#allocation45_spill] sm:$0xff] %v5680_v61  ;;  %vm5684_vm8 = vcmp.lt.s32.totalorder %v3352_v15, 112  ;;  %vm4508_vm3 = vcmp.eq.s32.totalorder %v1840_v17, 1  ;;  %vm4512_vm5 = vcmp.eq.s32.totalorder %v1844_v58, 1  ;;  %v1497_v49 = vadd.f32 %v1493_v50, %v4204_v5  ;;  %v5693_v17 = vld [vmem:[#allocation64_spill] sm:$0xff]  ;;  %v5727_v61 = vld [vmem:[#allocation42_spill] sm:$0xff] }
 0x2ed   : > { %v1631_v30 = vsel %vm5684_vm8, %v5683_v38, %v4228_v1  ;;  %vm5685_vm10 = vmmov %vm5684_vm8  ;;  %v1498_v51 = vadd.f32 %v1494_v54, %v4206_v43  ;;  %vm5691_vm8 = vcmp.lt.s32.totalorder %v3352_v15, 111  ;;  %vm5694_vm4 = vnez %v5693_v17  ;;  %v5701_v54 = vld [vmem:[#allocation67_spill] sm:$0xff] }
 0x2ee   : > { %v1633_v8 = vsel %vm5685_vm10, %v4228_v1, %v5683_v38  ;;  %v1663_v18 = vsel %vm5691_vm8, %v5690_v14, %v4233_v23  ;;  %vm5692_vm10 = vmmov %vm5691_vm8  ;;  %v1603_v58 = vsel %vm5694_vm4, %v1599_v29, 0.0  ;;  %v5695_v38 = vld [vmem:[#allocation63_spill] sm:$0xff]  ;;  %v1542_v46 = vadd.f32 %v1538_v63, %v1465_v53  ;;  %v5705_v29 = vld [vmem:[#allocation78_spill] sm:$0xff] }
 0x2ef   : > { %v1665_v1 = vsel %vm5692_vm10, %v4233_v23, %v5690_v14  ;;  %vm5696_vm11 = vnez %v5695_v38  ;;  %v1543_v5 = vadd.f32 %v1539_v33, %v1466_v21  ;;  %vm4532_vm12 = vcmp.eq.s32.totalorder %v1885_v2, 1  ;;  %v5703_v23 = vld [vmem:[#allocation66_spill] sm:$0xff]  ;;  %v5708_v53 = vld [vmem:[#allocation71_spill] sm:$0xff] }
 0x2f0   : > { %v1604_v39 = vsel %vm5696_vm11, %v1601_v45, 0.0  ;;  %vm4536_vm2 = vcmp.eq.s32.totalorder %v1889_v12, 1  ;;  %v5699_v50 = vmov 0  ;;  %vm5702_vm8 = vnez %v5701_v54  ;;  %v1868_v12 = vpop.permute.xlu0 %1867  ;;  %v5712_v54 = vld [vmem:[#allocation33_spill] sm:$0xff] }
 0x2f1   : > { %v5700_v50 = vsel %vm4536_vm2, 4294967295, %v5699_v50  ;;  %v1635_v6 = vsel %vm5702_vm8, %v1631_v30, 0.0  ;;  %vm5704_vm10 = vnez %v5703_v23  ;;  %vm5706_vm11 = vcmp.lt.s32.totalorder %v3352_v15, 110  ;;  %v5710_v30 = vld [vmem:[#allocation70_spill] sm:$0xff] }
 0x2f2   : > { %v1636_v14 = vsel %vm5704_vm10, %v1633_v8, 0.0  ;;  %v1696_v63 = vsel %vm5706_vm11, %v5705_v29, %v4238_v60  ;;  %vm5707_vm4 = vmmov %vm5706_vm11  ;;  %v1587_v33 = vadd.f32 %v1583_v47, %v1497_v49  ;;  %v1588_v21 = vadd.f32 %v1584_v32, %v1498_v51  ;;  %v4556_v8 = vpop.permute.xlu1 %1337  ;;  %v5716_v32 = vld [vmem:[#allocation34_spill] sm:$0xff] }
 0x2f3   : > { %v1698_v2 = vsel %vm5707_vm4, %v4238_v60, %v5705_v29  ;;  %vm5709_vm9 = vnez %v5708_v53  ;;  %vm5711_vm8 = vnez %v5710_v30  ;;  %v1615_v38 = vmul.f32 %v5712_v54, %v1603_v58  ;;  %v5718_v29 = vld [vmem:[#allocation83_spill] sm:$0xff] }
 0x2f4   : > { %v1667_v45 = vsel %vm5709_vm9, %v1663_v18, 0.0  ;;  %v1668_v23 = vsel %vm5711_vm8, %v1665_v1, 0.0  ;;  %v1616_v17 = vmul.f32 %v5712_v54, %v1604_v39  ;;  %vm5714_vm11 = vcmp.lt.s32.totalorder %v3352_v15, 98  ;;  %v5717_v1 = vld [vmem:[#allocation37_spill] sm:$0xff] }
 0x2f5   : > { %v1741_v60 = vsel %vm5714_vm11, %v5713_v9, %v4244_v24  ;;  %vm5715_vm4 = vmmov %vm5714_vm11  ;;  %v1647_v49 = vmul.f32 %v5716_v32, %v1635_v6  ;;  %v1648_v51 = vmul.f32 %v5716_v32, %v1636_v14  ;;  %v1712_v18 = vsel %vm4430_vm7, %v1696_v63, 0.0  ;;  %v5723_v32 = vld [vmem:[#allocation49_spill] sm:$0xff] }
 0x2f6   : > { %v1743_v47 = vsel %vm5715_vm4, %v4244_v24, %v5713_v9  ;;  %v1713_v39 = vsel %vm4434_vm1, %v1698_v2, 0.0  ;;  %v1679_v58 = vmul.f32 %v5717_v1, %v1667_v45  ;;  %v1680_v54 = vmul.f32 %v5717_v1, %v1668_v23  ;;  %v1872_v24 = vpop.permute.xlu0 %1871  ;;  %v4595_v45 = vpop.permute.xlu1 %1382 }
 0x2f7   : > { %vm5719_vm11 = vcmp.lt.s32.totalorder %v3352_v15, 97  ;;  %v1757_v14 = vsel %vm4462_vm13, %v1741_v60, 0.0  ;;  %v1758_v63 = vsel %vm4466_vm15, %v1743_v47, 0.0  ;;  %vm5721_vm9 = vcmp.lt.s32.totalorder %v3352_v15, 96 }
 0x2f8   : > { %v1786_v9 = vsel %vm5719_vm11, %v5718_v29, %v4378_v25  ;;  %vm5720_vm4 = vmmov %vm5719_vm11  ;;  %v1831_v23 = vsel %vm5721_vm9, %v4439_v31, %v1827_v59  ;;  %v1724_v1 = vmul.f32 %v5723_v32, %v1712_v18  ;;  %v1620_v19 = vadd.f32 %v1616_v17, %v1543_v5 }
 0x2f9   : > { %v1788_v6 = vsel %vm5720_vm4, %v4378_v25, %v5718_v29  ;;  %vm5722_vm1 = vmmov %vm5721_vm9  ;;  %v1725_v25 = vmul.f32 %v5723_v32, %v1713_v39  ;;  %v1619_v29 = vadd.f32 %v1615_v38, %v1542_v46  ;;  %v1802_v60 = vsel %vm4485_vm0, %v1786_v9, 0.0 }
 0x2fa   : > { %v1833_v2 = vsel %vm5722_vm1, %v1827_v59, %v4439_v31  ;;  %v1803_v47 = vsel %vm4489_vm14, %v1788_v6, 0.0  ;;  %vm5724_vm9 = vcmp.lt.s32.totalorder %v3352_v15, 95  ;;  %v5726_v59 = vld [vmem:[#allocation39_spill] sm:$0xff]  ;;  %v1847_v46 = vsel %vm4508_vm3, %v1831_v23, 0.0  ;;  %v1913_v38 = vpop.permute.xlu0 %1912  ;;  %v4613_v32 = vpop.permute.xlu1 %1427 }
 0x2fb   : > { %v1876_v56 = vsel %vm5724_vm9, %v1868_v12, %v1872_v24  ;;  %vm5725_vm11 = vmmov %vm5724_vm9  ;;  %v1769_v62 = vmul.f32 %v5726_v59, %v1757_v14  ;;  %v1770_v18 = vmul.f32 %v5726_v59, %v1758_v63  ;;  %v1848_v17 = vsel %vm4512_vm5, %v1833_v2, 0.0  ;;  %v5728_v63 = vld [vmem:[#allocation44_spill] sm:$0xff] }
 0x2fc   : > { %v1878_v31 = vsel %vm5725_vm11, %v1872_v24, %v1868_v12  ;;  %v1651_v5 = vadd.f32 %v1647_v49, %v1587_v33  ;;  %v1652_v39 = vadd.f32 %v1648_v51, %v1588_v21  ;;  %v1683_v9 = vadd.f32 %v1679_v58, %v1619_v29  ;;  %v5735_v29 = vld [vmem:[#allocation65_spill] sm:$0xff] }
 0x2fd   : > { %v1684_v6 = vadd.f32 %v1680_v54, %v1620_v19  ;;  %v1814_v22 = vmul.f32 %v5727_v61, %v1802_v60  ;;  %v1815_v12 = vmul.f32 %v5727_v61, %v1803_v47  ;;  %v1892_v24 = vsel %vm4532_vm12, %v1876_v56, 0.0 }
 0x2fe   : > { %v1893_v14 = vsel %vm4536_vm2, %v1878_v31, 0.0  ;;  %v1859_v23 = vmul.f32 %v5728_v63, %v1847_v46  ;;  %v1860_v2 = vmul.f32 %v5728_v63, %v1848_v17  ;;  %v5729_v33 = vrot.slane %v4447_v10, %v3338_v40  ;;  %v1917_v54 = vpop.permute.xlu0 %1916  ;;  %v5738_v46 = vld [vmem:[#allocation72_spill] sm:$0xff] }
 0x2ff   : > { %v5730_v19 = vmov 0  ;;  %v5732_v61 = vrot.slane %v4447_v10, %v3340_v37  ;;  %v5733_v21 = vmov 0  ;;  %v1728_v56 = vadd.f32 %v1724_v1, %v1651_v5  ;;  %v4643_v37 = vpop.permute.xlu1 %1475 }
 0x300   : > { %vm4626_vm1 = vcmp.eq.s32.totalorder %v5729_v33, 1  ;;  %v1729_v49 = vadd.f32 %v1725_v25, %v1652_v39  ;;  %v1773_v51 = vadd.f32 %v1769_v62, %v1683_v9  ;;  %v1774_v58 = vadd.f32 %v1770_v18, %v1684_v6 }
 0x301   : > { %v5731_v19 = vsel %vm4626_vm1, 4294967295, %v5730_v19  ;;  %vm4633_vm4 = vcmp.eq.s32.totalorder %v5732_v61, 1  ;;  %v1904_v60 = vmul.f32 %v5735_v29, %v1892_v24  ;;  %v1905_v40 = vmul.f32 %v5735_v29, %v1893_v14  ;;  %v5749_v29 = vld [vmem:[#allocation9_spill] sm:$0xff] }
 0x302   : > { %v5734_v21 = vsel %vm4633_vm4, 4294967295, %v5733_v21  ;;  %vm5736_vm9 = vcmp.lt.s32.totalorder %v3352_v15, 94  ;;  %v1818_v10 = vadd.f32 %v1814_v22, %v1728_v56  ;;  %v1819_v59 = vadd.f32 %v1815_v12, %v1729_v49 }
 0x303   : > { %v1921_v47 = vsel %vm5736_vm9, %v1913_v38, %v1917_v54  ;;  %vm5737_vm11 = vmmov %vm5736_vm9  ;;  %v1863_v25 = vadd.f32 %v1859_v23, %v1773_v51  ;;  %v1864_v18 = vadd.f32 %v1860_v2, %v1774_v58  ;;  %v4651_v24 = vpop.permute.xlu1 %1507  ;;  %vm5739_vm9 = vcmp.lt.s32.totalorder %v3352_v15, 32  ;;  %v5744_v51 = vld [vmem:[#allocation88_spill] sm:$0xff] }
 0x304   : > { %v1923_v31 = vsel %vm5737_vm11, %v1917_v54, %v1913_v38  ;;  %v1937_v1 = vsel %vm4626_vm1, %v1921_v47, 0.0  ;;  %v1908_v39 = vadd.f32 %v1904_v60, %v1818_v10  ;;  %v1909_v9 = vadd.f32 %v1905_v40, %v1819_v59  ;;  %v5756_v10 = vld [vmem:[#allocation56_spill] sm:$0xff] }
 0x305   : > { %v1938_v62 = vsel %vm4633_vm4, %v1923_v31, 0.0  ;;  %v1949_v17 = vmul.f32 %v5738_v46, %v1937_v1  ;;  %v1067_v14 = vsel %vm5739_vm9, %v4328_v44, %v4270_v42  ;;  %vm5740_vm11 = vcmp.lt.s32.totalorder %v3352_v15, 34  ;;  %vm5741_vm4 = vmmov %vm5739_vm9  ;;  %v5754_v31 = vld [vmem:[#allocation89_spill] sm:$0xff] }
 0x306   : > { %v1950_v5 = vmul.f32 %v5738_v46, %v1938_v62  ;;  %v975_v23 = vsel %vm5740_vm11, %v4300_v13, %v4251_v0  ;;  %v1065_v2 = vsel %vm5741_vm4, %v4270_v42, %v4328_v44  ;;  %vm5742_vm1 = vnez %v5537_v55  ;;  %vm5743_vm2 = vmmov %vm5740_vm11  ;;  %v5747_v55 = vld [vmem:[#allocation16_spill] sm:$0xff] }
 0x307   : > { %v1953_v6 = vadd.f32 %v1949_v17, %v1863_v25  ;;  %v4661_v63 = vpop.permute.xlu1 %1552  ;;  %v1082_v33 = vsel %vm5742_vm1, %v1067_v14, 0.0  ;;  %v973_v61 = vsel %vm5743_vm2, %v4251_v0, %v4300_v13  ;;  %v990_v49 = vsel %vm3920_vm6, %v975_v23, 0.0  ;;  %v5768_v14 = vld [vmem:[#allocation53_spill] sm:$0xff] }
 0x308   : > { %v1954_v38 = vadd.f32 %v1950_v5, %v1864_v18  ;;  %vm5745_vm9 = vcmp.lt.s32.totalorder %v3352_v15, 30  ;;  %vm5746_vm4 = vnez %v5544_v20  ;;  %v1094_v44 = vmul.f32 %v5747_v55, %v1082_v33  ;;  %v5770_v23 = vld [vmem:[#allocation93_spill] sm:$0xff] }
 0x309   : > { %v4653_v22 = vadd.f32 %v1953_v6, %v1908_v39  ;;  %v1157_v58 = vsel %vm5745_vm9, %v4310_v4, %v5744_v51  ;;  %v1083_v42 = vsel %vm5746_vm4, %v1065_v2, 0.0  ;;  %vm5748_vm1 = vnez %v5530_v35  ;;  %vm5750_vm2 = vmmov %vm5745_vm9  ;;  %v5766_v6 = vld [vmem:[#allocation48_spill] sm:$0xff] }
 0x30a   : > { %v4655_v12 = vadd.f32 %v1954_v38, %v1909_v9  ;;  %v991_v54 = vsel %vm5748_vm1, %v973_v61, 0.0  ;;  %v1004_v0 = vmul.f32 %v5749_v29, %v990_v49  ;;  %v1155_v52 = vsel %vm5750_vm2, %v5744_v51, %v4310_v4  ;;  %v5772_v49 = vld [vmem:[#allocation90_spill] sm:$0xff]  ;;  %v5774_v51 = vld [vmem:[#allocation17_spill] sm:$0xff] }
 0x30b   : > { %v4677_v56 = vpop.permute.xlu1 %1597  ;;  %vm5751_vm6 = vnez %v5551_v36  ;;  %v1095_v60 = vmul.f32 %v5747_v55, %v1083_v42  ;;  %vm5752_vm11 = vcmp.lt.s32.totalorder %v3352_v15, 17  ;;  %v1005_v20 = vmul.f32 %v5749_v29, %v991_v54  ;;  %v5775_v42 = vld [vmem:[#allocation52_spill] sm:$0xff]  ;;  %v5778_v29 = vld [vmem:[#allocation18_spill] sm:$0xff] }
 0x30c   : > { %v1172_v13 = vsel %vm5751_vm6, %v1157_v58, 0.0  ;;  %v1246_v35 = vsel %vm5752_vm11, %v4391_v28, %v4056_v26  ;;  %v1098_v47 = vadd.f32 %v1094_v44, %v1004_v0  ;;  %vm5753_vm9 = vmmov %vm5752_vm11  ;;  %vm5755_vm4 = vnez %v5754_v31  ;;  %v5784_v31 = vld [vmem:[#allocation91_spill] sm:$0xff] }
 0x30d   : > { %v1244_v4 = vsel %vm5753_vm9, %v4056_v26, %v4391_v28  ;;  %v1173_v36 = vsel %vm5755_vm4, %v1155_v52, 0.0  ;;  %v1184_v59 = vmul.f32 %v5756_v10, %v1172_v13  ;;  %vm5757_vm1 = vcmp.lt.s32.totalorder %v3352_v15, 16  ;;  %v5780_v13 = vld [vmem:[#allocation94_spill] sm:$0xff] }
 0x30e   : > { %v1278_v1 = vsel %vm5757_vm1, %v4450_v41, %v4080_v3  ;;  %v1099_v62 = vadd.f32 %v1095_v60, %v1005_v20  ;;  %vm5758_vm2 = vnez %v5403_v16  ;;  %vm5759_vm6 = vmmov %vm5757_vm1  ;;  %vm5760_vm11 = vcmp.lt.s32.totalorder %v3352_v15, 15  ;;  %v5762_v16 = vld [vmem:[#allocation50_spill] sm:$0xff]  ;;  %v5783_v20 = vld [vmem:[#allocation23_spill] sm:$0xff] }
 0x30f   : > { %v4698_v40 = vpop.permute.xlu1 %1629  ;;  %v1249_v25 = vsel %vm5758_vm2, %v1246_v35, 0.0  ;;  %v1276_v18 = vsel %vm5759_vm6, %v4080_v3, %v4450_v41  ;;  %v1310_v26 = vsel %vm5760_vm11, %v4516_v57, %v4097_v34  ;;  %vm5761_vm9 = vnez %v5401_v7  ;;  %vm5764_vm1 = vmmov %vm5760_vm11  ;;  %v5765_v41 = vld [vmem:[#allocation15_spill] sm:$0xff] }
 0x310   : > { %v1250_v46 = vsel %vm5761_vm9, %v1244_v4, 0.0  ;;  %v1185_v17 = vmul.f32 %v5756_v10, %v1173_v36  ;;  %v1188_v5 = vadd.f32 %v1184_v59, %v1098_v47  ;;  %vm5763_vm4 = vnez %v5762_v16  ;;  %v5782_v35 = vld [vmem:[#allocation35_spill] sm:$0xff]  ;;  %v5786_v59 = vld [vmem:[#allocation92_spill] sm:$0xff] }
 0x311   : > { %v1281_v39 = vsel %vm5763_vm4, %v1278_v1, 0.0  ;;  %v1308_v3 = vsel %vm5764_vm1, %v4097_v34, %v4516_v57  ;;  %v1261_v9 = vmul.f32 %v5765_v41, %v1249_v25  ;;  %vm5767_vm2 = vnez %v5766_v6  ;;  %v5796_v6 = vld [vmem:[#allocation19_spill] sm:$0xff] }
 0x312   : > { %v1282_v38 = vsel %vm5767_vm2, %v1276_v18, 0.0  ;;  %vm5769_vm6 = vnez %v5768_v14  ;;  %vm5771_vm11 = vcmp.lt.s32.totalorder %v3352_v15, 2  ;;  %v1189_v33 = vadd.f32 %v1185_v17, %v1099_v62  ;;  %v5788_v62 = vld [vmem:[#allocation96_spill] sm:$0xff]  ;;  %v5790_v18 = vld [vmem:[#allocation87_spill] sm:$0xff]  ;;  %v5797_v14 = vld [vmem:[#allocation97_spill] sm:$0xff] }
 0x313   : > { %v4726_v28 = vpop.permute.xlu1 %1661  ;;  %v1313_v7 = vsel %vm5769_vm6, %v1310_v26, 0.0  ;;  %v1388_v2 = vsel %vm5771_vm11, %v4595_v45, %v5770_v23  ;;  %v1262_v61 = vmul.f32 %v5765_v41, %v1250_v46  ;;  %vm5773_vm9 = vcmp.lt.s32.totalorder %v3352_v15, 14  ;;  %vm5779_vm2 = vmmov %vm5771_vm11  ;;  %v5791_v46 = vld [vmem:[#allocation95_spill] sm:$0xff] }
 0x314   : > { %v1343_v34 = vsel %vm5773_vm9, %v4556_v8, %v5772_v49  ;;  %v1293_v58 = vmul.f32 %v5774_v51, %v1281_v39  ;;  %vm5776_vm4 = vnez %v5775_v42  ;;  %vm5777_vm1 = vmmov %vm5773_vm9  ;;  %v1294_v54 = vmul.f32 %v5774_v51, %v1282_v38 }
 0x315   : > { %v1314_v55 = vsel %vm5776_vm4, %v1308_v3, 0.0  ;;  %v1341_v44 = vsel %vm5777_vm1, %v5772_v49, %v4556_v8  ;;  %v1325_v0 = vmul.f32 %v5778_v29, %v1313_v7  ;;  %v1386_v52 = vsel %vm5779_vm2, %v5770_v23, %v4595_v45  ;;  %v5795_v3 = vld [vmem:[#allocation10_spill] sm:$0xff] }
 0x316   : > { %vm5781_vm6 = vnez %v5780_v13  ;;  %v1463_v47 = vmul.f32 %v5783_v20, %v5782_v35  ;;  %v1265_v4 = vadd.f32 %v1261_v9, %v1188_v5  ;;  %vm5785_vm11 = vnez %v5784_v31  ;;  %v5793_v5 = vld [vmem:[#allocation20_spill] sm:$0xff]  ;;  %v5813_v31 = vld [vmem:[#allocation61_spill] sm:$0xff] }
 0x317   : > { %v4751_v57 = vpop.permute.xlu1 %1693  ;;  %v1403_v60 = vsel %vm5781_vm6, %v1388_v2, 0.0  ;;  %v1358_v36 = vsel %vm5785_vm11, %v1343_v34, 0.0  ;;  %v1266_v8 = vadd.f32 %v1262_v61, %v1189_v33  ;;  %v1326_v10 = vmul.f32 %v5778_v29, %v1314_v55  ;;  %v5799_v2 = vld [vmem:[#allocation57_spill] sm:$0xff]  ;;  %v5802_v61 = vld [vmem:[#allocation98_spill] sm:$0xff] }
 0x318   : > { %vm5787_vm9 = vnez %v5786_v59  ;;  %vm5789_vm4 = vcmp.lt.s32.totalorder %v3352_v15, 1  ;;  %v1297_v26 = vadd.f32 %v1293_v58, %v5790_v18  ;;  %vm5792_vm1 = vnez %v5791_v46  ;;  %v5804_v58 = vld [vmem:[#allocation55_spill] sm:$0xff]  ;;  %v5807_v29 = vld [vmem:[#allocation62_spill] sm:$0xff] }
 0x319   : > { %v1359_v1 = vsel %vm5787_vm9, %v1341_v44, 0.0  ;;  %v1432_v45 = vsel %vm5789_vm4, %v4613_v32, %v5788_v62  ;;  %v1404_v17 = vsel %vm5792_vm1, %v1386_v52, 0.0  ;;  %v1415_v16 = vmul.f32 %v5793_v5, %v1403_v60  ;;  %vm5794_vm2 = vmmov %vm5789_vm4  ;;  %v5812_v60 = vld [vmem:[#allocation22_spill] sm:$0xff] }
 0x31a   : > { %v1430_v39 = vsel %vm5794_vm2, %v5788_v62, %v4613_v32  ;;  %v1298_v41 = vadd.f32 %v1294_v54, %v5795_v3  ;;  %v1329_v9 = vadd.f32 %v1325_v0, %v1265_v4  ;;  %v1370_v38 = vmul.f32 %v5796_v6, %v1358_v36  ;;  %v5809_v0 = vld [vmem:[#allocation99_spill] sm:$0xff]  ;;  %v5815_v36 = vld [vmem:[#allocation84_spill] sm:$0xff]  ;;  %v5819_v18 = vld [vmem:[#allocation54_spill] sm:$0xff] }
 0x31b   : > { %v4779_v25 = vpop.permute.xlu1 %1738  ;;  %vm5798_vm6 = vcmp.lt.s32.totalorder %v3352_v15, 127  ;;  %v1371_v23 = vmul.f32 %v5796_v6, %v1359_v1  ;;  %vm5800_vm11 = vnez %v5799_v2  ;;  %vm5803_vm4 = vcmp.lt.s32.totalorder %v3352_v15, 126  ;;  %v5824_v3 = vld [vmem:[#allocation86_spill] sm:$0xff]  ;;  %v5830_v2 = vld [vmem:[#allocation68_spill] sm:$0xff] }
 0x31c   : > { %v1478_v7 = vsel %vm5798_vm6, %v5797_v14, %v4643_v37  ;;  %v1435_v33 = vsel %vm5800_vm11, %v1432_v45, 0.0  ;;  %vm5801_vm9 = vmmov %vm5798_vm6  ;;  %v1511_v49 = vsel %vm5803_vm4, %v5802_v61, %v4651_v24  ;;  %v1330_v34 = vadd.f32 %v1326_v10, %v1266_v8  ;;  %v5817_v10 = vld [vmem:[#allocation82_spill] sm:$0xff] }
 0x31d   : > { %v1480_v32 = vsel %vm5801_vm9, %v4643_v37, %v5797_v14  ;;  %v1416_v51 = vmul.f32 %v5793_v5, %v1404_v17  ;;  %vm5805_vm1 = vnez %v5804_v58  ;;  %vm5806_vm2 = vmmov %vm5803_vm4  ;;  %v1419_v54 = vadd.f32 %v1415_v16, %v1329_v9  ;;  %v5821_v17 = vld [vmem:[#allocation26_spill] sm:$0xff]  ;;  %v5822_v16 = vld [vmem:[#allocation85_spill] sm:$0xff] }
 0x31e   : > { %v1436_v42 = vsel %vm5805_vm1, %v1430_v39, 0.0  ;;  %v1513_v55 = vsel %vm5806_vm2, %v4651_v24, %v5802_v61  ;;  %vm5808_vm6 = vnez %v5807_v29  ;;  %vm5810_vm11 = vcmp.lt.s32.totalorder %v3352_v15, 114 }
 0x31f   : > { %v1784_v44 = vpop.permute.xlu1 %1783  ;;  %v1483_v37 = vsel %vm5808_vm6, %v1478_v7, 0.0  ;;  %v1556_v52 = vsel %vm5810_vm11, %v5809_v0, %v4661_v63  ;;  %vm5811_vm9 = vmmov %vm5810_vm11  ;;  %v1447_v4 = vmul.f32 %v5812_v60, %v1435_v33  ;;  %vm5814_vm4 = vnez %v5813_v31  ;;  %v5826_v7 = vld [vmem:[#allocation27_spill] sm:$0xff] }
 0x320   : > { %v1558_v13 = vsel %vm5811_vm9, %v4661_v63, %v5809_v0  ;;  %v1484_v24 = vsel %vm5814_vm4, %v1480_v32, 0.0  ;;  %vm5816_vm1 = vnez %v5815_v36  ;;  %vm5818_vm2 = vcmp.lt.s32.totalorder %v3352_v15, 113 }
 0x321   : > { %v1528_v8 = vsel %vm5816_vm1, %v1511_v49, 0.0  ;;  %v1600_v59 = vsel %vm5818_vm2, %v5817_v10, %v4677_v56  ;;  %v1374_v1 = vadd.f32 %v1370_v38, %v1297_v26  ;;  %v1375_v62 = vadd.f32 %v1371_v23, %v1298_v41  ;;  %vm5827_vm4 = vmmov %vm5818_vm2  ;;  %v5828_v38 = vld [vmem:[#allocation64_spill] sm:$0xff] }
 0x322   : > { %v1448_v45 = vmul.f32 %v5812_v60, %v1436_v42  ;;  %vm5820_vm6 = vnez %v5819_v18  ;;  %v1420_v46 = vadd.f32 %v1416_v51, %v1330_v34  ;;  %v1495_v5 = vmul.f32 %v5821_v17, %v1483_v37  ;;  %v5831_v51 = vld [vmem:[#allocation30_spill] sm:$0xff]  ;;  %v5834_v37 = vld [vmem:[#allocation63_spill] sm:$0xff] }
 0x323   : > { %v1529_v63 = vsel %vm5820_vm6, %v1513_v55, 0.0  ;;  %vm5823_vm11 = vnez %v5822_v16  ;;  %vm5825_vm9 = vnez %v5824_v3  ;;  %v1825_v6 = vpop.permute.xlu1 %1824  ;;  %v1496_v14 = vmul.f32 %v5821_v17, %v1484_v24  ;;  %v5832_v55 = vld [vmem:[#allocation80_spill] sm:$0xff]  ;;  %v5838_v24 = vld [vmem:[#allocation67_spill] sm:$0xff] }
 0x324   : > { %v1573_v39 = vsel %vm5823_vm11, %v1556_v52, 0.0  ;;  %v1574_v9 = vsel %vm5825_vm9, %v1558_v13, 0.0  ;;  %v1540_v26 = vmul.f32 %v5826_v7, %v1528_v8  ;;  %v1602_v41 = vsel %vm5827_vm4, %v4677_v56, %v5817_v10  ;;  %v5836_v52 = vld [vmem:[#allocation31_spill] sm:$0xff]  ;;  %v5840_v8 = vld [vmem:[#allocation100_spill] sm:$0xff] }
 0x325   : > { %vm5829_vm1 = vnez %v5828_v38  ;;  %v1464_v33 = vmul.f32 %v5783_v20, %v5830_v2  ;;  %v1451_v32 = vadd.f32 %v1447_v4, %v1374_v1  ;;  %v1467_v61 = vadd.f32 %v1463_v47, %v1419_v54  ;;  %v5849_v3 = vld [vmem:[#allocation36_spill] sm:$0xff] }
 0x326   : > { %v1605_v23 = vsel %vm5829_vm1, %v1600_v59, 0.0  ;;  %v1541_v49 = vmul.f32 %v5826_v7, %v1529_v63  ;;  %v1452_v34 = vadd.f32 %v1448_v45, %v1375_v62  ;;  %v1585_v58 = vmul.f32 %v5831_v51, %v1573_v39 }
 0x327   : > { %v1586_v42 = vmul.f32 %v5831_v51, %v1574_v9  ;;  %vm5833_vm2 = vcmp.lt.s32.totalorder %v3352_v15, 112  ;;  %v1468_v29 = vadd.f32 %v1464_v33, %v1420_v46  ;;  %vm5835_vm6 = vnez %v5834_v37  ;;  %v1829_v13 = vpop.permute.xlu1 %1828  ;;  %v5856_v33 = vld [vmem:[#allocation11_spill] sm:$0xff] }
 0x328   : > { %v1632_v56 = vsel %vm5833_vm2, %v5832_v55, %v4698_v40  ;;  %v1606_v0 = vsel %vm5835_vm6, %v1602_v41, 0.0  ;;  %v1617_v20 = vmul.f32 %v5836_v52, %v1605_v23  ;;  %v1499_v47 = vadd.f32 %v1495_v5, %v1451_v32  ;;  %vm5837_vm11 = vmmov %vm5833_vm2  ;;  %v5852_v41 = vld [vmem:[#allocation103_spill] sm:$0xff] }
 0x329   : > { %v1500_v54 = vadd.f32 %v1496_v14, %v1452_v34  ;;  %v1544_v60 = vadd.f32 %v1540_v26, %v1467_v61  ;;  %v1634_v4 = vsel %vm5837_vm11, %v4698_v40, %v5832_v55  ;;  %v1545_v31 = vadd.f32 %v1541_v49, %v1468_v29  ;;  %v5843_v40 = vld [vmem:[#allocation101_spill] sm:$0xff]  ;;  %v5860_v34 = vld [vmem:[#allocation47_spill] sm:$0xff] }
 0x32a   : > { %vm5839_vm9 = vnez %v5838_v24  ;;  %vm5841_vm4 = vcmp.lt.s32.totalorder %v3352_v15, 111  ;;  %v1589_v1 = vadd.f32 %v1585_v58, %v1499_v47  ;;  %v1618_v45 = vmul.f32 %v5836_v52, %v1606_v0  ;;  %v5865_v47 = vld [vmem:[#allocation51_spill] sm:$0xff] }
 0x32b   : > { %v1637_v36 = vsel %vm5839_vm9, %v1632_v56, 0.0  ;;  %v1664_v10 = vsel %vm5841_vm4, %v5840_v8, %v4726_v28  ;;  %vm5842_vm1 = vmmov %vm5841_vm4  ;;  %v1590_v62 = vadd.f32 %v1586_v42, %v1500_v54  ;;  %vm5844_vm2 = vcmp.lt.s32.totalorder %v3352_v15, 110  ;;  %v1870_v39 = vpop.permute.xlu1 %1869  ;;  %v5862_v56 = vld [vmem:[#allocation38_spill] sm:$0xff] }
 0x32c   : > { %v1666_v59 = vsel %vm5842_vm1, %v4726_v28, %v5840_v8  ;;  %v1697_v18 = vsel %vm5844_vm2, %v5843_v40, %v4751_v57  ;;  %v1621_v63 = vadd.f32 %v1617_v20, %v1544_v60  ;;  %v1638_v17 = vsel %vm5704_vm10, %v1634_v4, 0.0  ;;  %vm5846_vm6 = vmmov %vm5844_vm2  ;;  %v5847_v28 = vld [vmem:[#allocation102_spill] sm:$0xff] }
 0x32d   : > { %v1699_v5 = vsel %vm5846_vm6, %v4751_v57, %v5843_v40  ;;  %vm5848_vm11 = vcmp.lt.s32.totalorder %v3352_v15, 98  ;;  %v1649_v9 = vmul.f32 %v5849_v3, %v1637_v36  ;;  %vm5850_vm9 = vnez %v5708_v53  ;;  %v5869_v40 = vld [vmem:[#allocation46_spill] sm:$0xff] }
 0x32e   : > { %v1742_v16 = vsel %vm5848_vm11, %v5847_v28, %v4779_v25  ;;  %v1669_v14 = vsel %vm5850_vm9, %v1664_v10, 0.0  ;;  %v1670_v7 = vsel %vm5711_vm8, %v1666_v59, 0.0  ;;  %vm5851_vm10 = vmmov %vm5848_vm11  ;;  %v1714_v57 = vsel %vm4430_vm7, %v1697_v18, 0.0 }
 0x32f   : > { %v1744_v26 = vsel %vm5851_vm10, %v4779_v25, %v5847_v28  ;;  %vm5853_vm4 = vcmp.lt.s32.totalorder %v3352_v15, 97  ;;  %vm5855_vm2 = vcmp.lt.s32.totalorder %v3352_v15, 96  ;;  %v1650_v23 = vmul.f32 %v5849_v3, %v1638_v17  ;;  %v1874_v55 = vpop.permute.xlu1 %1873 }
 0x330   : > { %v1787_v38 = vsel %vm5853_vm4, %v5852_v41, %v1784_v44  ;;  %vm5854_vm1 = vmmov %vm5853_vm4  ;;  %v1832_v30 = vsel %vm5855_vm2, %v1825_v6, %v1829_v13  ;;  %vm5857_vm8 = vnez %v5856_v33  ;;  %v1759_v11 = vsel %vm4462_vm13, %v1742_v16, 0.0 }
 0x331   : > { %v1789_v53 = vsel %vm5854_vm1, %v1784_v44, %v5852_v41  ;;  %v1715_v32 = vsel %vm5857_vm8, %v1699_v5, 0.0  ;;  %vm5859_vm7 = vmmov %vm5855_vm2  ;;  %v1622_v49 = vadd.f32 %v1618_v45, %v1545_v31  ;;  %v1681_v51 = vmul.f32 %v5860_v34, %v1669_v14 }
 0x332   : > { %v1834_v61 = vsel %vm5859_vm7, %v1829_v13, %v1825_v6  ;;  %v1682_v58 = vmul.f32 %v5860_v34, %v1670_v7  ;;  %v1760_v42 = vsel %vm4466_vm15, %v1744_v26, 0.0  ;;  %v1726_v29 = vmul.f32 %v5862_v56, %v1714_v57  ;;  %v5871_v26 = vld [vmem:[#allocation59_spill] sm:$0xff] }
 0x333   : > { %v1804_v0 = vsel %vm4485_vm0, %v1787_v38, 0.0  ;;  %v1805_v20 = vsel %vm4489_vm14, %v1789_v53, 0.0  ;;  %v1849_v6 = vsel %vm4508_vm3, %v1832_v30, 0.0  ;;  %v1727_v13 = vmul.f32 %v5862_v56, %v1715_v32  ;;  %v1915_v46 = vpop.permute.xlu1 %1914 }
 0x334   : > { %v1771_v54 = vmul.f32 %v5865_v47, %v1759_v11  ;;  %v1850_v60 = vsel %vm4512_vm5, %v1834_v61, 0.0  ;;  %vm5866_vm13 = vcmp.lt.s32.totalorder %v3352_v15, 95  ;;  %v1653_v31 = vadd.f32 %v1649_v9, %v1589_v1  ;;  %v5877_v11 = vld [vmem:[#allocation40_spill] sm:$0xff] }
 0x335   : > { %v1877_v4 = vsel %vm5866_vm13, %v1870_v39, %v1874_v55  ;;  %v1654_v24 = vadd.f32 %v1650_v23, %v1590_v62  ;;  %v1772_v36 = vmul.f32 %v5865_v47, %v1760_v42  ;;  %vm5867_vm15 = vmmov %vm5866_vm13  ;;  %v1685_v10 = vadd.f32 %v1681_v51, %v1621_v63  ;;  %v857_v62 = vpop.f32.mrb[8].mxu1  ;;  %v5878_v51 = vld [vmem:[#allocation69_spill] sm:$0xff] }
 0x336   : > { %v1879_v8 = vsel %vm5867_vm15, %v1874_v55, %v1870_v39  ;;  %v1816_v59 = vmul.f32 %v5868_v48, %v1804_v0  ;;  %v1817_v45 = vmul.f32 %v5868_v48, %v1805_v20  ;;  %v1861_v18 = vmul.f32 %v5869_v40, %v1849_v6  ;;  %v859_v39 = vpop.f32.mrb[9].mxu1  ;;  %v1963_v20 = vpop.permute.xlu0 %1962  ;;  %v868_v6 = vld [vmem:[%s5092_s2] sm:$0xff] }
 0x337   : > { %v1686_v27 = vadd.f32 %v1682_v58, %v1622_v49  ;;  %v1862_v17 = vmul.f32 %v5869_v40, %v1850_v60  ;;  %v1894_v1 = vsel %vm4532_vm12, %v1877_v4, 0.0  ;;  %v1730_v5 = vadd.f32 %v1726_v29, %v1653_v31  ;;  %v1919_v41 = vpop.permute.xlu1 %1918  ;;  %v863_v23 = vpop.f32.mrb[10].mxu1 }
 0x338   : > { %v1731_v28 = vadd.f32 %v1727_v13, %v1654_v24  ;;  %v1775_v16 = vadd.f32 %v1771_v54, %v1685_v10  ;;  %vm5870_vm5 = vnez %v5700_v50  ;;  %v1906_v57 = vmul.f32 %v5871_v26, %v1894_v1  ;;  %v5874_v50 = vld [vmem:[#allocation58_spill] sm:$0xff]  ;;  %v865_v49 = vpop.f32.mrb[11].mxu1 }
 0x339   : > { %v1895_v63 = vsel %vm5870_vm5, %v1879_v8, 0.0  ;;  %v1776_v3 = vadd.f32 %v1772_v36, %v1686_v27  ;;  %v1820_v9 = vadd.f32 %v1816_v59, %v1730_v5  ;;  %vm5872_vm12 = vcmp.lt.s32.totalorder %v3352_v15, 94  ;;  %v869_v36 = vld [vmem:[%s5092_s2 + $0x8] sm:$0xff] }
 0x33a   : > { %v1821_v14 = vadd.f32 %v1817_v45, %v1731_v28  ;;  %v1865_v7 = vadd.f32 %v1861_v18, %v1775_v16  ;;  %v1907_v53 = vmul.f32 %v5871_v26, %v1895_v63  ;;  %v1922_v43 = vsel %vm5872_vm12, %v1915_v46, %v1919_v41  ;;  %vm5873_vm3 = vmmov %vm5872_vm12  ;;  %v876_v40 = vpop.permute.xlu0 %875  ;;  %v5886_v63 = vld [vmem:[#allocation8_spill] sm:$0xff] }
 0x33b   : > { %v1866_v38 = vadd.f32 %v1862_v17, %v1776_v3  ;;  %v1924_v30 = vsel %vm5873_vm3, %v1919_v41, %v1915_v46  ;;  %v858_v33 = vadd.f32 %v857_v62, %v5874_v50  ;;  %vm5875_vm14 = vnez %v5731_v19  ;;  %v1967_v0 = vpop.permute.xlu1 %1966  ;;  %v5884_v46 = vld [vmem:[#allocation7_spill] sm:$0xff]  ;;  %v5885_v62 = vld [vmem:[#allocation13_spill] sm:$0xff]  ;;  %v5887_v3 = vld [vmem:[#allocation12_spill] sm:$0xff] }
 0x33c   : > { %v1939_v32 = vsel %vm5875_vm14, %v1922_v43, 0.0  ;;  %vm5876_vm0 = vnez %v5734_v21  ;;  %v864_v61 = vadd.f32 %v863_v23, %v5877_v11  ;;  %v860_v34 = vadd.f32 %v859_v39, %v5874_v50 }
 0x33d   : > { %v1940_v25 = vsel %vm5876_vm0, %v1924_v30, 0.0  ;;  %v1951_v58 = vmul.f32 %v5878_v51, %v1939_v32  ;;  %v866_v15 = vadd.f32 %v865_v49, %v5877_v11  ;;  %v1910_v42 = vadd.f32 %v1906_v57, %v1820_v9  ;;  %v5888_v32 = vld [vmem:[#allocation21_spill] sm:$0xff]  ;;  %v5889_v49 = vld [vmem:[#allocation32_spill] sm:$0xff] }
 0x33e   : > { %v1952_v44 = vmul.f32 %v5878_v51, %v1940_v25  ;;  %v2418_v55 = vpack.c.bf16 %v864_v61, %v858_v33  ;;  %v1911_v29 = vadd.f32 %v1907_v53, %v1821_v14  ;;  %v1969_v13 = vadd.f32 %v1963_v20, %v4653_v22  ;;  %v1973_v22 = vld [vmem:[%s5092_s2 + $0x10] sm:$0xff] }
 0x33f   : > { %v2416_v56 = vpack.c.bf16 %v866_v15, %v860_v34  ;;  %v1955_v19 = vadd.f32 %v1951_v58, %v1865_v7  ;;  %v1970_v47 = vadd.f32 %v1963_v20, %v4655_v12  ;;  %vm5879_vm6 = vcmask 130048   ;;  %v1974_v12 = vld [vmem:[%s5092_s2 + $0x18] sm:$0xff]  ;;  %v872_v8 = vpop.permute.xlu1 %871 }
 0x340   : > { %v1956_v37 = vadd.f32 %v1952_v44, %v1866_v38  ;;  %v5880_v24 = vmov 0.0   ;;  %vm5881_vm11 = vmmov %vm5879_vm6  ;;  %vm5890_vm4 = vcmask 261120  }
 0x341   : > { %2417 = vmatprep.subr.bf16.mxu0 %v2416_v56  ;;  %v1959_v21 = vadd.f32 %v1955_v19, %v1910_v42  ;;  %vm5882_vm9 = vmmov %vm5879_vm6 }
 0x342   : > { %v1960_v52 = vadd.f32 %v1956_v37, %v1911_v29  ;;  %2419 = vmatpush1.bf16.msra.mxu0 %v2418_v55  ;;  %vm5883_vm10 = vmmov %vm5879_vm6  ;;  %v2082_v37 = vld [vmem:[%s5091_s1 + $0x20] sm:$0xff] }
 0x343   : > { %v1971_v54 = vadd.f32 %v1967_v0, %v1959_v21  ;;  %v1977_v16 = vpop.permute.xlu1 %1976  ;;  %vm5891_vm1 = vmmov %vm5890_vm4  ;;  %v2088_v21 = vpop.permute.xlu0 %2087 }
 0x344   : > { %v1972_v60 = vadd.f32 %v1967_v0, %v1960_v52  ;;  %vm5892_vm2 = vmmov %vm5891_vm1  ;;  %v2085_v0 = vld [vmem:[%s5091_s1 + $0x38] sm:$0xff] }
 0x345   : > { %v2422_v31 = vpack.c.bf16 %v1971_v54, %v1969_v13  ;;  %2341 = vmatmul.mubr.msk.f32.vlgmr.msra.gmra.mrb[0].mxu0 %vm5879_vm6, %v868_v6  ;;  %vm5893_vm8 = vmmov %vm5891_vm1  ;;  %v2670_v54 = vld [vmem:[%s2907_s26] sm:$0xff] }
 0x346   : > { %v2420_v4 = vpack.c.bf16 %v1972_v60, %v1970_v47  ;;  %954 = vmatprep.mubr.f32.mxu0 %v5880_v24 }
 0x347   : > { %v1981_v23 = vpop.permute.xlu1 %1980 }
 0x348   : > { %2421 = vmatprep.subr.bf16.mxu0 %v2420_v4  ;;  %v2671_v4 = vld [vmem:[%s2907_s26 + $0x8] sm:$0xff] }
 0x349   : > { %2423 = vmatpush1.bf16.msra.mxu0 %v2422_v31 }
 0x34a   : > { %2342 = vmatmul.mubr.msk.f32.gmra.mrb[2].mxu0 %vm5881_vm11, %v869_v36 }
 0x34b   : > { %2053 = vmatprep.mubr.f32.mxu0 %v5880_v24  ;;  %v2092_v20 = vpop.permute.xlu1 %2091 }
 0x34e   : > { %2343 = vmatmul.mubr.msk.f32.vlgmr.msra.gmra.mrb[4].mxu0 %vm5882_vm9, %v1973_v22 }
 0x34f   : > { %2059 = vmatprep.mubr.f32.mxu0 %v5880_v24 }
 0x352   : > { %2344 = vmatmul.mubr.msk.f32.gmra.mrb[6].mxu0 %vm5883_vm10, %v1974_v12 }
 0x353   : > { %2178 = vmatprep.mubr.f32.mxu0 %v5880_v24 }
 0x418   : > { %v950_v10 = vpop.f32.mrb[0].mxu0 }
 0x419   : > { %v951_v48 = vadd.f32 %v950_v10, %v872_v8  ;;  %v952_v59 = vpop.f32.mrb[1].mxu0  ;;  %v2672_v10 = vld [vmem:[%s2907_s26 + $0x10] sm:$0xff] }
 0x41a   : > { %v953_v45 = vadd.f32 %v952_v59, %v872_v8  ;;  %v2096_v8 = vpop.permute.xlu1 %2095  ;;  %v2673_v59 = vld [vmem:[%s2907_s26 + $0x18] sm:$0xff] }
 0x41b   : > { %v2066_v27 = vmul.f32 %v951_v48, %v5884_v46 }
 0x41c   : > { %v2067_v5 = vmul.f32 %v953_v45, %v5885_v62 }
 0x41d   : > { %v956_v18 = vpop.f32.mrb[2].mxu0  ;;  %v2070_v7 = vmul.f32 %v2066_v27, %v5884_v46 }
 0x41e   : > { %v957_v17 = vadd.f32 %v956_v18, %v876_v40  ;;  %v958_v1 = vpop.f32.mrb[3].mxu0  ;;  %v2071_v38 = vmul.f32 %v2067_v5, %v5885_v62  ;;  %v2675_v62 = vld [vmem:[%s2907_s26 + $0x28] sm:$0xff] }
 0x41f   : > { %v959_v28 = vadd.f32 %v958_v1, %v876_v40 }
 0x420   : > { %v2068_v39 = vmul.f32 %v957_v17, %v5886_v63  ;;  %v2674_v17 = vld [vmem:[%s2907_s26 + $0x20] sm:$0xff] }
 0x421   : > { %v2069_v9 = vmul.f32 %v959_v28, %v5887_v3  ;;  %v2055_v14 = vpop.f32.mrb[4].mxu0  ;;  %v2100_v28 = vpop.permute.xlu0 %2099 }
 0x422   : > { %v2072_v26 = vmul.f32 %v2068_v39, %v5886_v63  ;;  %v2056_v57 = vadd.f32 %v2055_v14, %v1977_v16  ;;  %v2057_v41 = vpop.f32.mrb[5].mxu0 }
 0x423   : > { %v2073_v53 = vmul.f32 %v2069_v9, %v5887_v3  ;;  %v2058_v43 = vadd.f32 %v2057_v41, %v1977_v16  ;;  %v2676_v9 = vld [vmem:[%s2907_s26 + $0x30] sm:$0xff] }
 0x424   : > { %v2426_v30 = vpack.c.bf16 %v2072_v26, %v2070_v7  ;;  %v2074_v25 = vmul.f32 %v2056_v57, %v5888_v32  ;;  %v2677_v7 = vld [vmem:[%s2907_s26 + $0x38] sm:$0xff]  ;;  %s2684_s26 = scalar_lea.vmem %s2683_s12, 2048 }
 0x425   : > { %v2061_v50 = vpop.f32.mrb[6].mxu0  ;;  %v2424_v33 = vpack.c.bf16 %v2073_v53, %v2071_v38  ;;  %v2075_v34 = vmul.f32 %v2058_v43, %v5889_v49  ;;  %p2686_p1 = scmp.lt.s32.totalorder %s2684_s26, %s2678_s20 }
 0x426   : > { %v2062_v11 = vadd.f32 %v2061_v50, %v1981_v23  ;;  %v2063_v61 = vpop.f32.mrb[7].mxu0  ;;  %v2078_v15 = vmul.f32 %v2074_v25, %v5888_v32 }
 0x427   : > { %v2064_v51 = vadd.f32 %v2063_v61, %v1981_v23  ;;  %2425 = vmatprep.subr.bf16.mxu0 %v2424_v33  ;;  %v2079_v55 = vmul.f32 %v2075_v34, %v5889_v49  ;;  %p2687_p2 = por %p2686_p1, %p2685_p0 }
 0x428   : > { %v2076_v58 = vmul.f32 %v2062_v11, %v5782_v35  ;;  %2427 = vmatpush1.bf16.msra.mxu0 %v2426_v30 }
 0x429   : > { %v2077_v44 = vmul.f32 %v2064_v51, %v5830_v2  ;;  %p2688_p3 = pnand %p2687_p2, %p2681_p13 }
 0x42a   : > { %v2080_v42 = vmul.f32 %v2076_v58, %v5782_v35  ;;  %v2083_v35 = vld [vmem:[%s5091_s1 + $0x28] sm:$0xff] }
 0x42b   : > { %v2081_v56 = vmul.f32 %v2077_v44, %v5830_v2  ;;  %v2084_v2 = vld [vmem:[%s5091_s1 + $0x30] sm:$0xff] }
 0x42c   : > { %v2430_v29 = vpack.c.bf16 %v2080_v42, %v2078_v15 }
 0x42d   : > { %v2428_v19 = vpack.c.bf16 %v2081_v56, %v2079_v55 }
 0x42f   : > { %2429 = vmatprep.subr.bf16.mxu0 %v2428_v19 }
 0x430   : > { %2431 = vmatpush1.bf16.msra.mxu0 %v2430_v29 }
 0x433   : > { %2345 = vmatmul.mubr.msk.f32.vlgmr.msra.gmra.mrb[8].mxu0 %vm5890_vm4, %v2082_v37 }
 0x434   : > { %2184 = vmatprep.mubr.f32.mxu0 %v5880_v24 }
 0x437   : > { %2346 = vmatmul.mubr.msk.f32.gmra.mrb[10].mxu0 %vm5891_vm1, %v2083_v35 }
 0x438   : > { %2190 = vmatprep.mubr.f32.mxu0 %v5880_v24 }
 0x43b   : > { %2347 = vmatmul.mubr.msk.f32.gmra.mrb[12].mxu0 %vm5892_vm2, %v2084_v2 }
 0x43c   : > { %2196 = vmatprep.mubr.f32.mxu0 %v5880_v24 }
 0x43f   : > { %2348 = vmatmul.mubr.msk.f32.gmra.mrb[14].mxu0 %vm5893_vm8, %v2085_v0 }
 0x506   : > { %v2180_v52 = vpop.f32.mrb[8].mxu0 }
 0x507   : > { %v2181_v6 = vadd.f32 %v2180_v52, %v2088_v21  ;;  %v2182_v13 = vpop.f32.mrb[9].mxu0 }
 0x508   : > { %v2183_v47 = vadd.f32 %v2182_v13, %v2088_v21 }
 0x509   : > { %v2203_v60 = vadd.f32 %v2670_v54, %v2181_v6 }
 0x50a   : > { %v2204_v31 = vadd.f32 %v2671_v4, %v2183_v47  ;;  %v2186_v24 = vpop.f32.mrb[10].mxu0 }
 0x50b   : > { %2211 = vst [vmem:[%s5021_s18] sm:$0xff] %v2203_v60  ;;  %v2187_v36 = vadd.f32 %v2186_v24, %v2092_v20  ;;  %v2188_v22 = vpop.f32.mrb[11].mxu0 }
 0x50c   : > { %2212 = vst [vmem:[%s5021_s18 + $0x8] sm:$0xff] %v2204_v31  ;;  %v2189_v12 = vadd.f32 %v2188_v22, %v2092_v20 }
 0x50d   : > { %v2205_v48 = vadd.f32 %v2672_v10, %v2187_v36 }
 0x50e   : > { %v2206_v45 = vadd.f32 %v2673_v59, %v2189_v12  ;;  %v2192_v40 = vpop.f32.mrb[12].mxu0 }
 0x50f   : > { %2213 = vst [vmem:[%s5021_s18 + $0x10] sm:$0xff] %v2205_v48  ;;  %v2193_v18 = vadd.f32 %v2192_v40, %v2096_v8  ;;  %v2194_v46 = vpop.f32.mrb[13].mxu0 }
 0x510   : > { %2214 = vst [vmem:[%s5021_s18 + $0x18] sm:$0xff] %v2206_v45  ;;  %v2195_v27 = vadd.f32 %v2194_v46, %v2096_v8 }
 0x511   : > { %v2207_v1 = vadd.f32 %v2674_v17, %v2193_v18 }
 0x512   : > { %v2208_v5 = vadd.f32 %v2675_v62, %v2195_v27  ;;  %v2198_v16 = vpop.f32.mrb[14].mxu0 }
 0x513   : > { %2215 = vst [vmem:[%s5021_s18 + $0x20] sm:$0xff] %v2207_v1  ;;  %v2199_v63 = vadd.f32 %v2198_v16, %v2100_v28  ;;  %v2200_v39 = vpop.f32.mrb[15].mxu0 }
 0x514   : > { %2216 = vst [vmem:[%s5021_s18 + $0x28] sm:$0xff] %v2208_v5  ;;  %v2201_v3 = vadd.f32 %v2200_v39, %v2100_v28 }
 0x515   : > { %v2209_v14 = vadd.f32 %v2676_v9, %v2199_v63 }
 0x516   : > { %v2210_v26 = vadd.f32 %v2677_v7, %v2201_v3 }
 0x517   : > { %2217 = vst [vmem:[%s5021_s18 + $0x30] sm:$0xff] %v2209_v14 }
 0x518   : > { %2218 = vst [vmem:[%s5021_s18 + $0x38] sm:$0xff] %v2210_v26 }
 0x519   : > { %2691 = shalt.err (!%p2688_p3)
}
 0x51a   : > { %s2692_s14 = scalar_lea.hbm %s5039_s23, 1024  ;;  %s2696_s15 = scalar_lea.hbm %s5096_s6, 2048 }
 0x51b   : > { %p2693_p4 = scmp.ne.s32.totalorder %s5039_s23, %s2692_s14  ;;  %p2697_p9 = scmp.lt.u32.totalorder %s5039_s23, %s5096_s6 }
 0x51c   : > { %p2698_p10 = scmp.lt.u32.totalorder %s2696_s15, %s2692_s14  ;;  %p2700_p12 = scmp.lt.u32.totalorder %s2692_s14, %s5039_s23 }
 0x51d   : > { %p2694_p7 = pnand %p2693_p4, %p2867_p5 }
 0x51e   : > { %p2699_p11 = por %p2698_p10, %p2697_p9 }
 0x51f   : > { %p2695_p8 = pneg %p2694_p7 }
 0x520   : > { %p2701_p13 = por %p2700_p12, %p2699_p11 }
 0x522   : > { %p2702_p0 = pnand %p2701_p13, %p2695_p8 }
 0x524   : > { %2705 = shalt.err (!%p2702_p0)
}
 0x525   : > { %s2793_s29 = smov 256  }
 0x526   : > { %2432 = dma.vmem_to_hbm [thread:$0]  (%p2867_p5), %s5042_s28, 1024, %s5039_s23, %s5048_s25, %s2793_s29, %s2793_s29, %s5378_s17  }
 0x527 PF: > { %p2438_p1 = scmp.ge.s32.totalorder %s2740_s24, 2  ;;  %s2248_s18 = sand.u32 1, %s2728_s21  }
 0x528   : > { %s2249_s19 = scalar_lea.sflag [#allocation3], %s2248_s18 }
 0x529   : > { %p2435_p2 = pnand %p2438_p1, %p2871_p6 }
 0x52b   : > { %2723 = dma.done.wait (!%p2435_p2), %s2249_s19, 1024  }
 0x52c   : > { %2725 = vsyncadd (!%p2435_p2), %s2249_s19, 4294966272  ;;  %s5894_s0 = sld [smem:[#allocation5_spill]]  ;;  %s5895_s23 = sld [smem:[#allocation6_spill]] }
 0x52d   : > { %p16_p3 = scmp.ge.s32.totalorder %s2854_s27, 4   ;;  %s5896_s21 = smov %s2732_s22 }
 0x52e   : > { %s5898_s24 = smov %s2854_s27 }
 0x52f   :  { %18 = sbr.rel (!%p16_p3) target bundleno = 5 (0x5), region = 80 }
 0x532   : > { %s5897_s22 = smov %s5894_s0 }
 0x536   :  { %2254 = vsyncpa [#allocation3], 1 }
 0x537   :  { %2256 = vsyncpa [#allocation3 + $0x1], 1 }

</bundles_post_ra>
